<compile_context>
chip_gen: v6e
topology: v6e:2x2x1
jax: 0.10.0
libtpu: 0.0.40
codegen_flags: <defaults>
</compile_context>

<pallas_src>
import functools
import math

import jax
import jax.numpy as jnp
import numpy as np
from jax.experimental import pallas as pl
from jax.experimental.pallas import tpu as pltpu

# ----------------------------- config -----------------------------
DIM = 32
N_HEADS = 4
HEAD_DIM = DIM // N_HEADS
HIDDEN_DIM = 64
N_LAYERS = 2
EPS = 1e-5
BATCH = 2
SEQ_DEC = 8
SEQ_ENC = 8
NEG_INF = -1.0e9


# ----------------------------- fused kernel -----------------------------
def decoder_kernel(x_ref, enc_ref, dbias_ref, ebias_ref,
                   snw_ref, swqkv_ref, sbqkv_ref, swo_ref, sbo_ref,
                   cnw_ref, cwq_ref, cbq_ref, cwkv_ref, cbkv_ref, cwo_ref, cbo_ref,
                   fnw_ref, fw1_ref, fb1_ref, fw2_ref, fb2_ref,
                   finw_ref, o_ref, *,
                   n_layers, n_heads, head_dim, eps):
    dim = n_heads * head_dim

    def rms(x, w):
        # x: (N, D), w: (1, D)
        ms = jnp.mean(x * x, axis=-1, keepdims=True)
        return x * jax.lax.rsqrt(ms + eps) * w

    def mha(q_all, k_all, v_all, bias, wo):
        # Batch folded into rows. q_all: (Nq, D), k_all/v_all: (Nk, D),
        # bias: (Nq, Nk) block-diagonal additive mask (-1e9 on masked and
        # cross-batch positions). Q is pre-scaled by 1/sqrt(head_dim).
        # Head outputs are accumulated directly through wo row-slices, so no
        # per-head concatenation / lane shuffles are needed.
        acc = None
        for h in range(n_heads):
            lo = h * head_dim
            hi = lo + head_dim
            s = jax.lax.dot_general(
                q_all[:, lo:hi], k_all[:, lo:hi],
                dimension_numbers=(((1,), (1,)), ((), ())),
                preferred_element_type=jnp.float32) + bias
            m = jnp.max(s, axis=-1, keepdims=True)
            ex = jnp.exp(s - m)
            p = ex * pl.reciprocal(jnp.sum(ex, axis=-1, keepdims=True), approx=True)
            att = jnp.dot(p, v_all[:, lo:hi], preferred_element_type=jnp.float32)
            contrib = jnp.dot(att, wo[lo:hi, :], preferred_element_type=jnp.float32)
            acc = contrib if acc is None else acc + contrib
        return acc

    x = x_ref[...].astype(jnp.float32)        # (B*Sd, D)
    enc = enc_ref[...].astype(jnp.float32)    # (B*Se, D)
    d_bias = dbias_ref[...]                   # (B*Sd, B*Sd)
    e_bias = ebias_ref[...]                   # (B*Sd, B*Se)

    # Encoder K|V projection for ALL layers, hoisted out of the layer loop:
    # one (B*Se, D) x (D, L*2D) matmul (full 128-lane width at these sizes).
    ekv_all = (jnp.dot(enc, cwkv_ref[...], preferred_element_type=jnp.float32)
               + cbkv_ref[...])

    for l in range(n_layers):                 # static unroll; weights VMEM-resident
        # ---- self-attention sublayer ----
        xn = rms(x, snw_ref[l])
        qkv = (jnp.dot(xn, swqkv_ref[l], preferred_element_type=jnp.float32)
               + sbqkv_ref[l])
        att = mha(qkv[:, 0:dim], qkv[:, dim:2 * dim], qkv[:, 2 * dim:3 * dim],
                  d_bias, swo_ref[l])
        x = x + att + sbo_ref[l]

        # ---- cross-attention sublayer ----
        xn = rms(x, cnw_ref[l])
        q = (jnp.dot(xn, cwq_ref[l], preferred_element_type=jnp.float32)
             + cbq_ref[l])
        base = l * 2 * dim
        att = mha(q, ekv_all[:, base:base + dim], ekv_all[:, base + dim:base + 2 * dim],
                  e_bias, cwo_ref[l])
        x = x + att + cbo_ref[l]

        # ---- feed-forward sublayer ----
        xn = rms(x, fnw_ref[l])
        h = jnp.maximum(
            jnp.dot(xn, fw1_ref[l], preferred_element_type=jnp.float32) + fb1_ref[l],
            0.0)
        x = x + jnp.dot(h, fw2_ref[l], preferred_element_type=jnp.float32) + fb2_ref[l]

    o_ref[...] = rms(x, finw_ref[...]).astype(o_ref.dtype)


# ----------------------------- packing (called ONCE, not per forward) -----------------------------
def pack_params(params):
    """Stack per-layer weights ([L, ...]), fuse QKV / cross-KV, fold the
    1/sqrt(head_dim) scale into the Q columns. Call once at init time."""
    blocks = params["blocks"]
    scale = 1.0 / math.sqrt(HEAD_DIM)

    def stack(fn):
        return jnp.stack([fn(bp) for bp in blocks], axis=0)

    return {
        "self_nw": stack(lambda b: b["self_norm_w"]),                               # (L,1,D)
        "self_wqkv": stack(lambda b: jnp.concatenate(
            [b["self_att"]["wq"] * scale, b["self_att"]["wk"], b["self_att"]["wv"]],
            axis=1)),                                                               # (L,D,3D)
        "self_bqkv": stack(lambda b: jnp.concatenate(
            [b["self_att"]["bq"] * scale, b["self_att"]["bk"], b["self_att"]["bv"]],
            axis=1)),                                                               # (L,1,3D)
        "self_wo": stack(lambda b: b["self_att"]["wo"]),
        "self_bo": stack(lambda b: b["self_att"]["bo"]),
        "cross_nw": stack(lambda b: b["cross_norm_w"]),
        "cross_wq": stack(lambda b: b["cross_att"]["wq"] * scale),
        "cross_bq": stack(lambda b: b["cross_att"]["bq"] * scale),
        # Encoder K|V for all layers pre-concatenated along the output dim:
        "cross_wkv": jnp.concatenate(
            [jnp.concatenate([b["cross_att"]["wk"], b["cross_att"]["wv"]], axis=1)
             for b in blocks], axis=1),                                             # (D, L*2D)
        "cross_bkv": jnp.concatenate(
            [jnp.concatenate([b["cross_att"]["bk"], b["cross_att"]["bv"]], axis=1)
             for b in blocks], axis=1),                                             # (1, L*2D)
        "cross_wo": stack(lambda b: b["cross_att"]["wo"]),
        "cross_bo": stack(lambda b: b["cross_att"]["bo"]),
        "ff_nw": stack(lambda b: b["ff_norm_w"]),
        "ff_w1": stack(lambda b: b["ff"]["w1"]),
        "ff_b1": stack(lambda b: b["ff"]["b1"]),
        "ff_w2": stack(lambda b: b["ff"]["w2"]),
        "ff_b2": stack(lambda b: b["ff"]["b2"]),
        "final_nw": params["final_norm_w"],
    }


def _block_diag_bias(mask):
    """mask: (B, Sq, Sk), 1=keep / 0=mask -> additive bias (B*Sq, B*Sk) with 0 on
    kept positions, -1e9 on masked positions and on all cross-batch blocks."""
    B, Sq, Sk = mask.shape
    keep = jnp.where(mask == 0.0, NEG_INF, 0.0).astype(jnp.float32)     # (B,Sq,Sk)
    eye = (jnp.eye(B, dtype=jnp.float32) > 0)[:, None, :, None]          # (B,1,B,1)
    full = jnp.where(eye, keep[:, :, None, :], NEG_INF)                  # (B,Sq,B,Sk)
    return full.reshape(B * Sq, B * Sk)


# ----------------------------- wrapper -----------------------------
def _decoder_forward_impl(x, e_output, d_mask, e_mask, packed):
    B, Sd, D = x.shape
    Se = e_output.shape[1]

    # Mask -> block-diagonal additive bias (batch folded into attention rows).
    d_bias = _block_diag_bias(d_mask)     # (B*Sd, B*Sd)
    e_bias = _block_diag_bias(e_mask)     # (B*Sd, B*Se)

    # Fold batch into matmul rows.
    x2 = x.reshape(B * Sd, D)
    e2 = e_output.reshape(B * Se, D)

    inputs = (x2, e2, d_bias, e_bias,
              packed["self_nw"], packed["self_wqkv"], packed["self_bqkv"],
              packed["self_wo"], packed["self_bo"],
              packed["cross_nw"], packed["cross_wq"], packed["cross_bq"],
              packed["cross_wkv"], packed["cross_bkv"],
              packed["cross_wo"], packed["cross_bo"],
              packed["ff_nw"], packed["ff_w1"], packed["ff_b1"],
              packed["ff_w2"], packed["ff_b2"],
              packed["final_nw"])

    vmem = pl.BlockSpec(memory_space=pltpu.MemorySpace.VMEM)
    out = pl.pallas_call(
        functools.partial(
            decoder_kernel,
            n_layers=N_LAYERS, n_heads=N_HEADS, head_dim=D // N_HEADS, eps=EPS),
        out_shape=jax.ShapeDtypeStruct((B * Sd, D), x.dtype),
        in_specs=[vmem] * len(inputs),
        out_specs=vmem,
    )(*inputs)
    return out.reshape(B, Sd, D)


decoder_forward = jax.jit(_decoder_forward_impl)


# ----------------------------- params -----------------------------
def init_params(key):
    def linear(k, fan_in, fan_out):
        kw, kb = jax.random.split(k)
        w = jax.random.normal(kw, (fan_in, fan_out), jnp.float32) * 0.05
        b = jax.random.normal(kb, (1, fan_out), jnp.float32) * 0.01
        return w, b

    blocks = []
    for _ in range(N_LAYERS):
        key, *ks = jax.random.split(key, 11)
        wq, bq = linear(ks[0], DIM, DIM)
        wk, bk = linear(ks[1], DIM, DIM)
        wv, bv = linear(ks[2], DIM, DIM)
        wo, bo = linear(ks[3], DIM, DIM)
        cwq, cbq = linear(ks[4], DIM, DIM)
        cwk, cbk = linear(ks[5], DIM, DIM)
        cwv, cbv = linear(ks[6], DIM, DIM)
        cwo, cbo = linear(ks[7], DIM, DIM)
        w1, b1 = linear(ks[8], DIM, HIDDEN_DIM)
        w2, b2 = linear(ks[9], HIDDEN_DIM, DIM)
        blocks.append({
            "self_att": {"wq": wq, "bq": bq, "wk": wk, "bk": bk,
                         "wv": wv, "bv": bv, "wo": wo, "bo": bo},
            "self_norm_w": jnp.ones((1, DIM), jnp.float32),
            "cross_att": {"wq": cwq, "bq": cbq, "wk": cwk, "bk": cbk,
                          "wv": cwv, "bv": cbv, "wo": cwo, "bo": cbo},
            "cross_norm_w": jnp.ones((1, DIM), jnp.float32),
            "ff": {"w1": w1, "b1": b1, "w2": w2, "b2": b2},
            "ff_norm_w": jnp.ones((1, DIM), jnp.float32),
        })
    return {"blocks": blocks, "final_norm_w": jnp.ones((1, DIM), jnp.float32)}


# ----------------------------- pure-JAX reference -----------------------------
def ref_rmsnorm(x, w, eps=EPS):
    xf = x.astype(jnp.float32)
    ms = jnp.mean(xf * xf, axis=-1, keepdims=True)
    return (xf * jax.lax.rsqrt(ms + eps)).astype(x.dtype) * w[0]


def ref_attention(q_in, kv, mask, p, n_heads=N_HEADS):
    B, Sq, D = q_in.shape
    hd = D // n_heads
    q = q_in @ p["wq"] + p["bq"][0]
    k = kv @ p["wk"] + p["bk"][0]
    v = kv @ p["wv"] + p["bv"][0]
    q = q.reshape(B, Sq, n_heads, hd).transpose(0, 2, 1, 3)
    k = k.reshape(B, -1, n_heads, hd).transpose(0, 2, 1, 3)
    v = v.reshape(B, -1, n_heads, hd).transpose(0, 2, 1, 3)
    s = jnp.einsum("bhqd,bhkd->bhqk", q, k) / math.sqrt(hd)
    s = jnp.where(mask[:, None, :, :] == 0, NEG_INF, s)
    a = jax.nn.softmax(s, axis=-1)
    o = jnp.einsum("bhqk,bhkd->bhqd", a, v)
    o = o.transpose(0, 2, 1, 3).reshape(B, Sq, D)
    return o @ p["wo"] + p["bo"][0]


def ref_ff(x, p):
    h = jnp.maximum(x @ p["w1"] + p["b1"][0], 0.0)
    return h @ p["w2"] + p["b2"][0]


def ref_decoder(x, e_output, d_mask, e_mask, params):
    for lp in params["blocks"]:
        xn = ref_rmsnorm(x, lp["self_norm_w"])
        x = x + ref_attention(xn, xn, d_mask, lp["self_att"])
        xn = ref_rmsnorm(x, lp["cross_norm_w"])
        x = x + ref_attention(xn, e_output, e_mask, lp["cross_att"])
        xn = ref_rmsnorm(x, lp["ff_norm_w"])
        x = x + ref_ff(xn, lp["ff"])
    return ref_rmsnorm(x, params["final_norm_w"])


# ----------------------------- main -----------------------------
if __name__ == "__main__":
    key = jax.random.PRNGKey(0)
    k_x, k_e, k_p = jax.random.split(key, 3)

    x = jax.random.normal(k_x, (BATCH, SEQ_DEC, DIM), jnp.float32)
    e_output = jax.random.normal(k_e, (BATCH, SEQ_ENC, DIM), jnp.float32)

    # causal decoder self-attention mask (1=keep, 0=mask), full encoder mask
    d_mask = jnp.tril(jnp.ones((SEQ_DEC, SEQ_DEC), jnp.float32))
    d_mask = jnp.broadcast_to(d_mask, (BATCH, SEQ_DEC, SEQ_DEC))
    e_mask = jnp.ones((BATCH, SEQ_DEC, SEQ_ENC), jnp.float32)

    params = init_params(k_p)
    packed = pack_params(params)      # packed ONCE, outside the per-call jit path

    out = decoder_forward(x, e_output, d_mask, e_mask, packed)
    out = jax.block_until_ready(out)

    ref = jax.block_until_ready(ref_decoder(x, e_output, d_mask, e_mask, params))
    np.testing.assert_allclose(np.asarray(out), np.asarray(ref), rtol=1e-3, atol=1e-3)

    print("KERNEL_OK")
</pallas_src>

<mosaic_0001>
module attributes {stable_mosaic.version = 11 : i64} {
  func.func @decoder_kernel(%arg0: memref<16x32xf32, #tpu.memory_space<vmem>>, %arg1: memref<16x32xf32, #tpu.memory_space<vmem>>, %arg2: memref<16x16xf32, #tpu.memory_space<vmem>>, %arg3: memref<16x16xf32, #tpu.memory_space<vmem>>, %arg4: memref<2x1x32xf32, #tpu.memory_space<vmem>>, %arg5: memref<2x32x96xf32, #tpu.memory_space<vmem>>, %arg6: memref<2x1x96xf32, #tpu.memory_space<vmem>>, %arg7: memref<2x32x32xf32, #tpu.memory_space<vmem>>, %arg8: memref<2x1x32xf32, #tpu.memory_space<vmem>>, %arg9: memref<2x1x32xf32, #tpu.memory_space<vmem>>, %arg10: memref<2x32x32xf32, #tpu.memory_space<vmem>>, %arg11: memref<2x1x32xf32, #tpu.memory_space<vmem>>, %arg12: memref<32x128xf32, #tpu.memory_space<vmem>>, %arg13: memref<1x128xf32, #tpu.memory_space<vmem>>, %arg14: memref<2x32x32xf32, #tpu.memory_space<vmem>>, %arg15: memref<2x1x32xf32, #tpu.memory_space<vmem>>, %arg16: memref<2x1x32xf32, #tpu.memory_space<vmem>>, %arg17: memref<2x32x64xf32, #tpu.memory_space<vmem>>, %arg18: memref<2x1x64xf32, #tpu.memory_space<vmem>>, %arg19: memref<2x64x32xf32, #tpu.memory_space<vmem>>, %arg20: memref<2x1x32xf32, #tpu.memory_space<vmem>>, %arg21: memref<1x32xf32, #tpu.memory_space<vmem>>, %arg22: memref<16x32xf32, #tpu.memory_space<vmem>>) attributes {dimension_semantics = [], scalar_prefetch = 0 : i64, scratch_operands = 0 : i64, tpu.core_type = #tpu.core_type<tc>} {
    %c0 = arith.constant 0 : index
    %c0_0 = arith.constant 0 : index
    %0 = vector.load %arg0[%c0, %c0_0] : memref<16x32xf32, #tpu.memory_space<vmem>>, vector<16x32xf32>
    %c0_1 = arith.constant 0 : index
    %c0_2 = arith.constant 0 : index
    %1 = vector.load %arg1[%c0_1, %c0_2] : memref<16x32xf32, #tpu.memory_space<vmem>>, vector<16x32xf32>
    %c0_3 = arith.constant 0 : index
    %c0_4 = arith.constant 0 : index
    %2 = vector.load %arg2[%c0_3, %c0_4] : memref<16x16xf32, #tpu.memory_space<vmem>>, vector<16x16xf32>
    %c0_5 = arith.constant 0 : index
    %c0_6 = arith.constant 0 : index
    %3 = vector.load %arg3[%c0_5, %c0_6] : memref<16x16xf32, #tpu.memory_space<vmem>>, vector<16x16xf32>
    %c0_7 = arith.constant 0 : index
    %c0_8 = arith.constant 0 : index
    %4 = vector.load %arg12[%c0_7, %c0_8] : memref<32x128xf32, #tpu.memory_space<vmem>>, vector<32x128xf32>
    %cst = arith.constant dense<0.000000e+00> : vector<16x128xf32>
    %5 = tpu.matmul %1, %4, %cst {dimension_numbers = #tpu.dot_dimension_numbers<[1], [0], [0], [1], [0, 0, 1, 1], [], []>} : vector<16x32xf32>, vector<32x128xf32>, vector<16x128xf32> -> vector<16x128xf32>
    %c0_9 = arith.constant 0 : index
    %c0_10 = arith.constant 0 : index
    %6 = vector.load %arg13[%c0_9, %c0_10] : memref<1x128xf32, #tpu.memory_space<vmem>>, vector<1x128xf32>
    %7 = vector.broadcast %6 : vector<1x128xf32> to vector<16x128xf32>
    %8 = arith.addf %5, %7 : vector<16x128xf32>
    %c0_11 = arith.constant 0 : index
    %c0_12 = arith.constant 0 : index
    %c0_13 = arith.constant 0 : index
    %9 = vector.load %arg4[%c0_11, %c0_12, %c0_13] : memref<2x1x32xf32, #tpu.memory_space<vmem>>, vector<1x1x32xf32>
    %10 = vector.shape_cast %9 : vector<1x1x32xf32> to vector<1x32xf32>
    %11 = arith.mulf %0, %0 : vector<16x32xf32>
    %cst_14 = arith.constant dense<0.000000e+00> : vector<16xf32>
    %12 = vector.multi_reduction <add>, %11, %cst_14 [1] : vector<16x32xf32> to vector<16xf32>
    %13 = vector.shape_cast %12 : vector<16xf32> to vector<16x1xf32>
    %cst_15 = arith.constant 3.200000e+01 : f32
    %14 = vector.broadcast %cst_15 : f32 to vector<16x1xf32>
    %15 = arith.divf %13, %14 : vector<16x1xf32>
    %cst_16 = arith.constant 9.99999974E-6 : f32
    %16 = vector.broadcast %cst_16 : f32 to vector<16x1xf32>
    %17 = arith.addf %15, %16 : vector<16x1xf32>
    %18 = math.rsqrt %17 : vector<16x1xf32>
    %19 = vector.broadcast %18 : vector<16x1xf32> to vector<16x32xf32>
    %20 = arith.mulf %0, %19 : vector<16x32xf32>
    %21 = vector.broadcast %10 : vector<1x32xf32> to vector<16x32xf32>
    %22 = arith.mulf %20, %21 : vector<16x32xf32>
    %c0_17 = arith.constant 0 : index
    %c0_18 = arith.constant 0 : index
    %c0_19 = arith.constant 0 : index
    %23 = vector.load %arg5[%c0_17, %c0_18, %c0_19] : memref<2x32x96xf32, #tpu.memory_space<vmem>>, vector<1x32x96xf32>
    %24 = vector.shape_cast %23 : vector<1x32x96xf32> to vector<32x96xf32>
    %cst_20 = arith.constant dense<0.000000e+00> : vector<16x96xf32>
    %25 = tpu.matmul %22, %24, %cst_20 {dimension_numbers = #tpu.dot_dimension_numbers<[1], [0], [0], [1], [0, 0, 1, 1], [], []>} : vector<16x32xf32>, vector<32x96xf32>, vector<16x96xf32> -> vector<16x96xf32>
    %c0_21 = arith.constant 0 : index
    %c0_22 = arith.constant 0 : index
    %c0_23 = arith.constant 0 : index
    %26 = vector.load %arg6[%c0_21, %c0_22, %c0_23] : memref<2x1x96xf32, #tpu.memory_space<vmem>>, vector<1x1x96xf32>
    %27 = vector.shape_cast %26 : vector<1x1x96xf32> to vector<1x96xf32>
    %28 = vector.broadcast %27 : vector<1x96xf32> to vector<16x96xf32>
    %29 = arith.addf %25, %28 : vector<16x96xf32>
    %30 = vector.extract_strided_slice %29 {offsets = [0, 0], sizes = [16, 32], strides = [1, 1]} : vector<16x96xf32> to vector<16x32xf32>
    %31 = vector.extract_strided_slice %29 {offsets = [0, 32], sizes = [16, 32], strides = [1, 1]} : vector<16x96xf32> to vector<16x32xf32>
    %32 = vector.extract_strided_slice %29 {offsets = [0, 64], sizes = [16, 32], strides = [1, 1]} : vector<16x96xf32> to vector<16x32xf32>
    %c0_24 = arith.constant 0 : index
    %c0_25 = arith.constant 0 : index
    %c0_26 = arith.constant 0 : index
    %33 = vector.load %arg7[%c0_24, %c0_25, %c0_26] : memref<2x32x32xf32, #tpu.memory_space<vmem>>, vector<1x32x32xf32>
    %34 = vector.shape_cast %33 : vector<1x32x32xf32> to vector<32x32xf32>
    %35 = vector.extract_strided_slice %30 {offsets = [0, 0], sizes = [16, 8], strides = [1, 1]} : vector<16x32xf32> to vector<16x8xf32>
    %36 = vector.extract_strided_slice %31 {offsets = [0, 0], sizes = [16, 8], strides = [1, 1]} : vector<16x32xf32> to vector<16x8xf32>
    %cst_27 = arith.constant dense<0.000000e+00> : vector<16x16xf32>
    %37 = tpu.matmul %35, %36, %cst_27 {dimension_numbers = #tpu.dot_dimension_numbers<[1], [1], [0], [0], [0, 0, 1, 0], [], []>} : vector<16x8xf32>, vector<16x8xf32>, vector<16x16xf32> -> vector<16x16xf32>
    %38 = arith.addf %37, %2 : vector<16x16xf32>
    %cst_28 = arith.constant dense<0xFF800000> : vector<16xf32>
    %39 = vector.multi_reduction <maximumf>, %38, %cst_28 [1] : vector<16x16xf32> to vector<16xf32>
    %40 = vector.shape_cast %39 : vector<16xf32> to vector<16x1xf32>
    %41 = vector.broadcast %40 : vector<16x1xf32> to vector<16x16xf32>
    %42 = arith.subf %38, %41 : vector<16x16xf32>
    %43 = math.exp %42 : vector<16x16xf32>
    %cst_29 = arith.constant dense<0.000000e+00> : vector<16xf32>
    %44 = vector.multi_reduction <add>, %43, %cst_29 [1] : vector<16x16xf32> to vector<16xf32>
    %45 = vector.shape_cast %44 : vector<16xf32> to vector<16x1xf32>
    %46 = tpu.reciprocal %45 {approx = true} : vector<16x1xf32> -> vector<16x1xf32>
    %47 = vector.broadcast %46 : vector<16x1xf32> to vector<16x16xf32>
    %48 = arith.mulf %43, %47 : vector<16x16xf32>
    %49 = vector.extract_strided_slice %32 {offsets = [0, 0], sizes = [16, 8], strides = [1, 1]} : vector<16x32xf32> to vector<16x8xf32>
    %cst_30 = arith.constant dense<0.000000e+00> : vector<16x8xf32>
    %50 = tpu.matmul %48, %49, %cst_30 {dimension_numbers = #tpu.dot_dimension_numbers<[1], [0], [0], [1], [0, 0, 1, 1], [], []>} : vector<16x16xf32>, vector<16x8xf32>, vector<16x8xf32> -> vector<16x8xf32>
    %51 = vector.extract_strided_slice %34 {offsets = [0, 0], sizes = [8, 32], strides = [1, 1]} : vector<32x32xf32> to vector<8x32xf32>
    %cst_31 = arith.constant dense<0.000000e+00> : vector<16x32xf32>
    %52 = tpu.matmul %50, %51, %cst_31 {dimension_numbers = #tpu.dot_dimension_numbers<[1], [0], [0], [1], [0, 0, 1, 1], [], []>} : vector<16x8xf32>, vector<8x32xf32>, vector<16x32xf32> -> vector<16x32xf32>
    %53 = vector.extract_strided_slice %30 {offsets = [0, 8], sizes = [16, 8], strides = [1, 1]} : vector<16x32xf32> to vector<16x8xf32>
    %54 = vector.extract_strided_slice %31 {offsets = [0, 8], sizes = [16, 8], strides = [1, 1]} : vector<16x32xf32> to vector<16x8xf32>
    %cst_32 = arith.constant dense<0.000000e+00> : vector<16x16xf32>
    %55 = tpu.matmul %53, %54, %cst_32 {dimension_numbers = #tpu.dot_dimension_numbers<[1], [1], [0], [0], [0, 0, 1, 0], [], []>} : vector<16x8xf32>, vector<16x8xf32>, vector<16x16xf32> -> vector<16x16xf32>
    %56 = arith.addf %55, %2 : vector<16x16xf32>
    %cst_33 = arith.constant dense<0xFF800000> : vector<16xf32>
    %57 = vector.multi_reduction <maximumf>, %56, %cst_33 [1] : vector<16x16xf32> to vector<16xf32>
    %58 = vector.shape_cast %57 : vector<16xf32> to vector<16x1xf32>
    %59 = vector.broadcast %58 : vector<16x1xf32> to vector<16x16xf32>
    %60 = arith.subf %56, %59 : vector<16x16xf32>
    %61 = math.exp %60 : vector<16x16xf32>
    %cst_34 = arith.constant dense<0.000000e+00> : vector<16xf32>
    %62 = vector.multi_reduction <add>, %61, %cst_34 [1] : vector<16x16xf32> to vector<16xf32>
    %63 = vector.shape_cast %62 : vector<16xf32> to vector<16x1xf32>
    %64 = tpu.reciprocal %63 {approx = true} : vector<16x1xf32> -> vector<16x1xf32>
    %65 = vector.broadcast %64 : vector<16x1xf32> to vector<16x16xf32>
    %66 = arith.mulf %61, %65 : vector<16x16xf32>
    %67 = vector.extract_strided_slice %32 {offsets = [0, 8], sizes = [16, 8], strides = [1, 1]} : vector<16x32xf32> to vector<16x8xf32>
    %cst_35 = arith.constant dense<0.000000e+00> : vector<16x8xf32>
    %68 = tpu.matmul %66, %67, %cst_35 {dimension_numbers = #tpu.dot_dimension_numbers<[1], [0], [0], [1], [0, 0, 1, 1], [], []>} : vector<16x16xf32>, vector<16x8xf32>, vector<16x8xf32> -> vector<16x8xf32>
    %69 = vector.extract_strided_slice %34 {offsets = [8, 0], sizes = [8, 32], strides = [1, 1]} : vector<32x32xf32> to vector<8x32xf32>
    %cst_36 = arith.constant dense<0.000000e+00> : vector<16x32xf32>
    %70 = tpu.matmul %68, %69, %cst_36 {dimension_numbers = #tpu.dot_dimension_numbers<[1], [0], [0], [1], [0, 0, 1, 1], [], []>} : vector<16x8xf32>, vector<8x32xf32>, vector<16x32xf32> -> vector<16x32xf32>
    %71 = arith.addf %52, %70 : vector<16x32xf32>
    %72 = vector.extract_strided_slice %30 {offsets = [0, 16], sizes = [16, 8], strides = [1, 1]} : vector<16x32xf32> to vector<16x8xf32>
    %73 = vector.extract_strided_slice %31 {offsets = [0, 16], sizes = [16, 8], strides = [1, 1]} : vector<16x32xf32> to vector<16x8xf32>
    %cst_37 = arith.constant dense<0.000000e+00> : vector<16x16xf32>
    %74 = tpu.matmul %72, %73, %cst_37 {dimension_numbers = #tpu.dot_dimension_numbers<[1], [1], [0], [0], [0, 0, 1, 0], [], []>} : vector<16x8xf32>, vector<16x8xf32>, vector<16x16xf32> -> vector<16x16xf32>
    %75 = arith.addf %74, %2 : vector<16x16xf32>
    %cst_38 = arith.constant dense<0xFF800000> : vector<16xf32>
    %76 = vector.multi_reduction <maximumf>, %75, %cst_38 [1] : vector<16x16xf32> to vector<16xf32>
    %77 = vector.shape_cast %76 : vector<16xf32> to vector<16x1xf32>
    %78 = vector.broadcast %77 : vector<16x1xf32> to vector<16x16xf32>
    %79 = arith.subf %75, %78 : vector<16x16xf32>
    %80 = math.exp %79 : vector<16x16xf32>
    %cst_39 = arith.constant dense<0.000000e+00> : vector<16xf32>
    %81 = vector.multi_reduction <add>, %80, %cst_39 [1] : vector<16x16xf32> to vector<16xf32>
    %82 = vector.shape_cast %81 : vector<16xf32> to vector<16x1xf32>
    %83 = tpu.reciprocal %82 {approx = true} : vector<16x1xf32> -> vector<16x1xf32>
    %84 = vector.broadcast %83 : vector<16x1xf32> to vector<16x16xf32>
    %85 = arith.mulf %80, %84 : vector<16x16xf32>
    %86 = vector.extract_strided_slice %32 {offsets = [0, 16], sizes = [16, 8], strides = [1, 1]} : vector<16x32xf32> to vector<16x8xf32>
    %cst_40 = arith.constant dense<0.000000e+00> : vector<16x8xf32>
    %87 = tpu.matmul %85, %86, %cst_40 {dimension_numbers = #tpu.dot_dimension_numbers<[1], [0], [0], [1], [0, 0, 1, 1], [], []>} : vector<16x16xf32>, vector<16x8xf32>, vector<16x8xf32> -> vector<16x8xf32>
    %88 = vector.extract_strided_slice %34 {offsets = [16, 0], sizes = [8, 32], strides = [1, 1]} : vector<32x32xf32> to vector<8x32xf32>
    %cst_41 = arith.constant dense<0.000000e+00> : vector<16x32xf32>
    %89 = tpu.matmul %87, %88, %cst_41 {dimension_numbers = #tpu.dot_dimension_numbers<[1], [0], [0], [1], [0, 0, 1, 1], [], []>} : vector<16x8xf32>, vector<8x32xf32>, vector<16x32xf32> -> vector<16x32xf32>
    %90 = arith.addf %71, %89 : vector<16x32xf32>
    %91 = vector.extract_strided_slice %30 {offsets = [0, 24], sizes = [16, 8], strides = [1, 1]} : vector<16x32xf32> to vector<16x8xf32>
    %92 = vector.extract_strided_slice %31 {offsets = [0, 24], sizes = [16, 8], strides = [1, 1]} : vector<16x32xf32> to vector<16x8xf32>
    %cst_42 = arith.constant dense<0.000000e+00> : vector<16x16xf32>
    %93 = tpu.matmul %91, %92, %cst_42 {dimension_numbers = #tpu.dot_dimension_numbers<[1], [1], [0], [0], [0, 0, 1, 0], [], []>} : vector<16x8xf32>, vector<16x8xf32>, vector<16x16xf32> -> vector<16x16xf32>
    %94 = arith.addf %93, %2 : vector<16x16xf32>
    %cst_43 = arith.constant dense<0xFF800000> : vector<16xf32>
    %95 = vector.multi_reduction <maximumf>, %94, %cst_43 [1] : vector<16x16xf32> to vector<16xf32>
    %96 = vector.shape_cast %95 : vector<16xf32> to vector<16x1xf32>
    %97 = vector.broadcast %96 : vector<16x1xf32> to vector<16x16xf32>
    %98 = arith.subf %94, %97 : vector<16x16xf32>
    %99 = math.exp %98 : vector<16x16xf32>
    %cst_44 = arith.constant dense<0.000000e+00> : vector<16xf32>
    %100 = vector.multi_reduction <add>, %99, %cst_44 [1] : vector<16x16xf32> to vector<16xf32>
    %101 = vector.shape_cast %100 : vector<16xf32> to vector<16x1xf32>
    %102 = tpu.reciprocal %101 {approx = true} : vector<16x1xf32> -> vector<16x1xf32>
    %103 = vector.broadcast %102 : vector<16x1xf32> to vector<16x16xf32>
    %104 = arith.mulf %99, %103 : vector<16x16xf32>
    %105 = vector.extract_strided_slice %32 {offsets = [0, 24], sizes = [16, 8], strides = [1, 1]} : vector<16x32xf32> to vector<16x8xf32>
    %cst_45 = arith.constant dense<0.000000e+00> : vector<16x8xf32>
    %106 = tpu.matmul %104, %105, %cst_45 {dimension_numbers = #tpu.dot_dimension_numbers<[1], [0], [0], [1], [0, 0, 1, 1], [], []>} : vector<16x16xf32>, vector<16x8xf32>, vector<16x8xf32> -> vector<16x8xf32>
    %107 = vector.extract_strided_slice %34 {offsets = [24, 0], sizes = [8, 32], strides = [1, 1]} : vector<32x32xf32> to vector<8x32xf32>
    %cst_46 = arith.constant dense<0.000000e+00> : vector<16x32xf32>
    %108 = tpu.matmul %106, %107, %cst_46 {dimension_numbers = #tpu.dot_dimension_numbers<[1], [0], [0], [1], [0, 0, 1, 1], [], []>} : vector<16x8xf32>, vector<8x32xf32>, vector<16x32xf32> -> vector<16x32xf32>
    %109 = arith.addf %90, %108 : vector<16x32xf32>
    %110 = arith.addf %0, %109 : vector<16x32xf32>
    %c0_47 = arith.constant 0 : index
    %c0_48 = arith.constant 0 : index
    %c0_49 = arith.constant 0 : index
    %111 = vector.load %arg8[%c0_47, %c0_48, %c0_49] : memref<2x1x32xf32, #tpu.memory_space<vmem>>, vector<1x1x32xf32>
    %112 = vector.shape_cast %111 : vector<1x1x32xf32> to vector<1x32xf32>
    %113 = vector.broadcast %112 : vector<1x32xf32> to vector<16x32xf32>
    %114 = arith.addf %110, %113 : vector<16x32xf32>
    %c0_50 = arith.constant 0 : index
    %c0_51 = arith.constant 0 : index
    %c0_52 = arith.constant 0 : index
    %115 = vector.load %arg9[%c0_50, %c0_51, %c0_52] : memref<2x1x32xf32, #tpu.memory_space<vmem>>, vector<1x1x32xf32>
    %116 = vector.shape_cast %115 : vector<1x1x32xf32> to vector<1x32xf32>
    %117 = arith.mulf %114, %114 : vector<16x32xf32>
    %cst_53 = arith.constant dense<0.000000e+00> : vector<16xf32>
    %118 = vector.multi_reduction <add>, %117, %cst_53 [1] : vector<16x32xf32> to vector<16xf32>
    %119 = vector.shape_cast %118 : vector<16xf32> to vector<16x1xf32>
    %cst_54 = arith.constant 3.200000e+01 : f32
    %120 = vector.broadcast %cst_54 : f32 to vector<16x1xf32>
    %121 = arith.divf %119, %120 : vector<16x1xf32>
    %cst_55 = arith.constant 9.99999974E-6 : f32
    %122 = vector.broadcast %cst_55 : f32 to vector<16x1xf32>
    %123 = arith.addf %121, %122 : vector<16x1xf32>
    %124 = math.rsqrt %123 : vector<16x1xf32>
    %125 = vector.broadcast %124 : vector<16x1xf32> to vector<16x32xf32>
    %126 = arith.mulf %114, %125 : vector<16x32xf32>
    %127 = vector.broadcast %116 : vector<1x32xf32> to vector<16x32xf32>
    %128 = arith.mulf %126, %127 : vector<16x32xf32>
    %c0_56 = arith.constant 0 : index
    %c0_57 = arith.constant 0 : index
    %c0_58 = arith.constant 0 : index
    %129 = vector.load %arg10[%c0_56, %c0_57, %c0_58] : memref<2x32x32xf32, #tpu.memory_space<vmem>>, vector<1x32x32xf32>
    %130 = vector.shape_cast %129 : vector<1x32x32xf32> to vector<32x32xf32>
    %cst_59 = arith.constant dense<0.000000e+00> : vector<16x32xf32>
    %131 = tpu.matmul %128, %130, %cst_59 {dimension_numbers = #tpu.dot_dimension_numbers<[1], [0], [0], [1], [0, 0, 1, 1], [], []>} : vector<16x32xf32>, vector<32x32xf32>, vector<16x32xf32> -> vector<16x32xf32>
    %c0_60 = arith.constant 0 : index
    %c0_61 = arith.constant 0 : index
    %c0_62 = arith.constant 0 : index
    %132 = vector.load %arg11[%c0_60, %c0_61, %c0_62] : memref<2x1x32xf32, #tpu.memory_space<vmem>>, vector<1x1x32xf32>
    %133 = vector.shape_cast %132 : vector<1x1x32xf32> to vector<1x32xf32>
    %134 = vector.broadcast %133 : vector<1x32xf32> to vector<16x32xf32>
    %135 = arith.addf %131, %134 : vector<16x32xf32>
    %136 = vector.extract_strided_slice %8 {offsets = [0, 0], sizes = [16, 32], strides = [1, 1]} : vector<16x128xf32> to vector<16x32xf32>
    %137 = vector.extract_strided_slice %8 {offsets = [0, 32], sizes = [16, 32], strides = [1, 1]} : vector<16x128xf32> to vector<16x32xf32>
    %c0_63 = arith.constant 0 : index
    %c0_64 = arith.constant 0 : index
    %c0_65 = arith.constant 0 : index
    %138 = vector.load %arg14[%c0_63, %c0_64, %c0_65] : memref<2x32x32xf32, #tpu.memory_space<vmem>>, vector<1x32x32xf32>
    %139 = vector.shape_cast %138 : vector<1x32x32xf32> to vector<32x32xf32>
    %140 = vector.extract_strided_slice %135 {offsets = [0, 0], sizes = [16, 8], strides = [1, 1]} : vector<16x32xf32> to vector<16x8xf32>
    %141 = vector.extract_strided_slice %136 {offsets = [0, 0], sizes = [16, 8], strides = [1, 1]} : vector<16x32xf32> to vector<16x8xf32>
    %cst_66 = arith.constant dense<0.000000e+00> : vector<16x16xf32>
    %142 = tpu.matmul %140, %141, %cst_66 {dimension_numbers = #tpu.dot_dimension_numbers<[1], [1], [0], [0], [0, 0, 1, 0], [], []>} : vector<16x8xf32>, vector<16x8xf32>, vector<16x16xf32> -> vector<16x16xf32>
    %143 = arith.addf %142, %3 : vector<16x16xf32>
    %cst_67 = arith.constant dense<0xFF800000> : vector<16xf32>
    %144 = vector.multi_reduction <maximumf>, %143, %cst_67 [1] : vector<16x16xf32> to vector<16xf32>
    %145 = vector.shape_cast %144 : vector<16xf32> to vector<16x1xf32>
    %146 = vector.broadcast %145 : vector<16x1xf32> to vector<16x16xf32>
    %147 = arith.subf %143, %146 : vector<16x16xf32>
    %148 = math.exp %147 : vector<16x16xf32>
    %cst_68 = arith.constant dense<0.000000e+00> : vector<16xf32>
    %149 = vector.multi_reduction <add>, %148, %cst_68 [1] : vector<16x16xf32> to vector<16xf32>
    %150 = vector.shape_cast %149 : vector<16xf32> to vector<16x1xf32>
    %151 = tpu.reciprocal %150 {approx = true} : vector<16x1xf32> -> vector<16x1xf32>
    %152 = vector.broadcast %151 : vector<16x1xf32> to vector<16x16xf32>
    %153 = arith.mulf %148, %152 : vector<16x16xf32>
    %154 = vector.extract_strided_slice %137 {offsets = [0, 0], sizes = [16, 8], strides = [1, 1]} : vector<16x32xf32> to vector<16x8xf32>
    %cst_69 = arith.constant dense<0.000000e+00> : vector<16x8xf32>
    %155 = tpu.matmul %153, %154, %cst_69 {dimension_numbers = #tpu.dot_dimension_numbers<[1], [0], [0], [1], [0, 0, 1, 1], [], []>} : vector<16x16xf32>, vector<16x8xf32>, vector<16x8xf32> -> vector<16x8xf32>
    %156 = vector.extract_strided_slice %139 {offsets = [0, 0], sizes = [8, 32], strides = [1, 1]} : vector<32x32xf32> to vector<8x32xf32>
    %cst_70 = arith.constant dense<0.000000e+00> : vector<16x32xf32>
    %157 = tpu.matmul %155, %156, %cst_70 {dimension_numbers = #tpu.dot_dimension_numbers<[1], [0], [0], [1], [0, 0, 1, 1], [], []>} : vector<16x8xf32>, vector<8x32xf32>, vector<16x32xf32> -> vector<16x32xf32>
    %158 = vector.extract_strided_slice %135 {offsets = [0, 8], sizes = [16, 8], strides = [1, 1]} : vector<16x32xf32> to vector<16x8xf32>
    %159 = vector.extract_strided_slice %136 {offsets = [0, 8], sizes = [16, 8], strides = [1, 1]} : vector<16x32xf32> to vector<16x8xf32>
    %cst_71 = arith.constant dense<0.000000e+00> : vector<16x16xf32>
    %160 = tpu.matmul %158, %159, %cst_71 {dimension_numbers = #tpu.dot_dimension_numbers<[1], [1], [0], [0], [0, 0, 1, 0], [], []>} : vector<16x8xf32>, vector<16x8xf32>, vector<16x16xf32> -> vector<16x16xf32>
    %161 = arith.addf %160, %3 : vector<16x16xf32>
    %cst_72 = arith.constant dense<0xFF800000> : vector<16xf32>
    %162 = vector.multi_reduction <maximumf>, %161, %cst_72 [1] : vector<16x16xf32> to vector<16xf32>
    %163 = vector.shape_cast %162 : vector<16xf32> to vector<16x1xf32>
    %164 = vector.broadcast %163 : vector<16x1xf32> to vector<16x16xf32>
    %165 = arith.subf %161, %164 : vector<16x16xf32>
    %166 = math.exp %165 : vector<16x16xf32>
    %cst_73 = arith.constant dense<0.000000e+00> : vector<16xf32>
    %167 = vector.multi_reduction <add>, %166, %cst_73 [1] : vector<16x16xf32> to vector<16xf32>
    %168 = vector.shape_cast %167 : vector<16xf32> to vector<16x1xf32>
    %169 = tpu.reciprocal %168 {approx = true} : vector<16x1xf32> -> vector<16x1xf32>
    %170 = vector.broadcast %169 : vector<16x1xf32> to vector<16x16xf32>
    %171 = arith.mulf %166, %170 : vector<16x16xf32>
    %172 = vector.extract_strided_slice %137 {offsets = [0, 8], sizes = [16, 8], strides = [1, 1]} : vector<16x32xf32> to vector<16x8xf32>
    %cst_74 = arith.constant dense<0.000000e+00> : vector<16x8xf32>
    %173 = tpu.matmul %171, %172, %cst_74 {dimension_numbers = #tpu.dot_dimension_numbers<[1], [0], [0], [1], [0, 0, 1, 1], [], []>} : vector<16x16xf32>, vector<16x8xf32>, vector<16x8xf32> -> vector<16x8xf32>
    %174 = vector.extract_strided_slice %139 {offsets = [8, 0], sizes = [8, 32], strides = [1, 1]} : vector<32x32xf32> to vector<8x32xf32>
    %cst_75 = arith.constant dense<0.000000e+00> : vector<16x32xf32>
    %175 = tpu.matmul %173, %174, %cst_75 {dimension_numbers = #tpu.dot_dimension_numbers<[1], [0], [0], [1], [0, 0, 1, 1], [], []>} : vector<16x8xf32>, vector<8x32xf32>, vector<16x32xf32> -> vector<16x32xf32>
    %176 = arith.addf %157, %175 : vector<16x32xf32>
    %177 = vector.extract_strided_slice %135 {offsets = [0, 16], sizes = [16, 8], strides = [1, 1]} : vector<16x32xf32> to vector<16x8xf32>
    %178 = vector.extract_strided_slice %136 {offsets = [0, 16], sizes = [16, 8], strides = [1, 1]} : vector<16x32xf32> to vector<16x8xf32>
    %cst_76 = arith.constant dense<0.000000e+00> : vector<16x16xf32>
    %179 = tpu.matmul %177, %178, %cst_76 {dimension_numbers = #tpu.dot_dimension_numbers<[1], [1], [0], [0], [0, 0, 1, 0], [], []>} : vector<16x8xf32>, vector<16x8xf32>, vector<16x16xf32> -> vector<16x16xf32>
    %180 = arith.addf %179, %3 : vector<16x16xf32>
    %cst_77 = arith.constant dense<0xFF800000> : vector<16xf32>
    %181 = vector.multi_reduction <maximumf>, %180, %cst_77 [1] : vector<16x16xf32> to vector<16xf32>
    %182 = vector.shape_cast %181 : vector<16xf32> to vector<16x1xf32>
    %183 = vector.broadcast %182 : vector<16x1xf32> to vector<16x16xf32>
    %184 = arith.subf %180, %183 : vector<16x16xf32>
    %185 = math.exp %184 : vector<16x16xf32>
    %cst_78 = arith.constant dense<0.000000e+00> : vector<16xf32>
    %186 = vector.multi_reduction <add>, %185, %cst_78 [1] : vector<16x16xf32> to vector<16xf32>
    %187 = vector.shape_cast %186 : vector<16xf32> to vector<16x1xf32>
    %188 = tpu.reciprocal %187 {approx = true} : vector<16x1xf32> -> vector<16x1xf32>
    %189 = vector.broadcast %188 : vector<16x1xf32> to vector<16x16xf32>
    %190 = arith.mulf %185, %189 : vector<16x16xf32>
    %191 = vector.extract_strided_slice %137 {offsets = [0, 16], sizes = [16, 8], strides = [1, 1]} : vector<16x32xf32> to vector<16x8xf32>
    %cst_79 = arith.constant dense<0.000000e+00> : vector<16x8xf32>
    %192 = tpu.matmul %190, %191, %cst_79 {dimension_numbers = #tpu.dot_dimension_numbers<[1], [0], [0], [1], [0, 0, 1, 1], [], []>} : vector<16x16xf32>, vector<16x8xf32>, vector<16x8xf32> -> vector<16x8xf32>
    %193 = vector.extract_strided_slice %139 {offsets = [16, 0], sizes = [8, 32], strides = [1, 1]} : vector<32x32xf32> to vector<8x32xf32>
    %cst_80 = arith.constant dense<0.000000e+00> : vector<16x32xf32>
    %194 = tpu.matmul %192, %193, %cst_80 {dimension_numbers = #tpu.dot_dimension_numbers<[1], [0], [0], [1], [0, 0, 1, 1], [], []>} : vector<16x8xf32>, vector<8x32xf32>, vector<16x32xf32> -> vector<16x32xf32>
    %195 = arith.addf %176, %194 : vector<16x32xf32>
    %196 = vector.extract_strided_slice %135 {offsets = [0, 24], sizes = [16, 8], strides = [1, 1]} : vector<16x32xf32> to vector<16x8xf32>
    %197 = vector.extract_strided_slice %136 {offsets = [0, 24], sizes = [16, 8], strides = [1, 1]} : vector<16x32xf32> to vector<16x8xf32>
    %cst_81 = arith.constant dense<0.000000e+00> : vector<16x16xf32>
    %198 = tpu.matmul %196, %197, %cst_81 {dimension_numbers = #tpu.dot_dimension_numbers<[1], [1], [0], [0], [0, 0, 1, 0], [], []>} : vector<16x8xf32>, vector<16x8xf32>, vector<16x16xf32> -> vector<16x16xf32>
    %199 = arith.addf %198, %3 : vector<16x16xf32>
    %cst_82 = arith.constant dense<0xFF800000> : vector<16xf32>
    %200 = vector.multi_reduction <maximumf>, %199, %cst_82 [1] : vector<16x16xf32> to vector<16xf32>
    %201 = vector.shape_cast %200 : vector<16xf32> to vector<16x1xf32>
    %202 = vector.broadcast %201 : vector<16x1xf32> to vector<16x16xf32>
    %203 = arith.subf %199, %202 : vector<16x16xf32>
    %204 = math.exp %203 : vector<16x16xf32>
    %cst_83 = arith.constant dense<0.000000e+00> : vector<16xf32>
    %205 = vector.multi_reduction <add>, %204, %cst_83 [1] : vector<16x16xf32> to vector<16xf32>
    %206 = vector.shape_cast %205 : vector<16xf32> to vector<16x1xf32>
    %207 = tpu.reciprocal %206 {approx = true} : vector<16x1xf32> -> vector<16x1xf32>
    %208 = vector.broadcast %207 : vector<16x1xf32> to vector<16x16xf32>
    %209 = arith.mulf %204, %208 : vector<16x16xf32>
    %210 = vector.extract_strided_slice %137 {offsets = [0, 24], sizes = [16, 8], strides = [1, 1]} : vector<16x32xf32> to vector<16x8xf32>
    %cst_84 = arith.constant dense<0.000000e+00> : vector<16x8xf32>
    %211 = tpu.matmul %209, %210, %cst_84 {dimension_numbers = #tpu.dot_dimension_numbers<[1], [0], [0], [1], [0, 0, 1, 1], [], []>} : vector<16x16xf32>, vector<16x8xf32>, vector<16x8xf32> -> vector<16x8xf32>
    %212 = vector.extract_strided_slice %139 {offsets = [24, 0], sizes = [8, 32], strides = [1, 1]} : vector<32x32xf32> to vector<8x32xf32>
    %cst_85 = arith.constant dense<0.000000e+00> : vector<16x32xf32>
    %213 = tpu.matmul %211, %212, %cst_85 {dimension_numbers = #tpu.dot_dimension_numbers<[1], [0], [0], [1], [0, 0, 1, 1], [], []>} : vector<16x8xf32>, vector<8x32xf32>, vector<16x32xf32> -> vector<16x32xf32>
    %214 = arith.addf %195, %213 : vector<16x32xf32>
    %215 = arith.addf %114, %214 : vector<16x32xf32>
    %c0_86 = arith.constant 0 : index
    %c0_87 = arith.constant 0 : index
    %c0_88 = arith.constant 0 : index
    %216 = vector.load %arg15[%c0_86, %c0_87, %c0_88] : memref<2x1x32xf32, #tpu.memory_space<vmem>>, vector<1x1x32xf32>
    %217 = vector.shape_cast %216 : vector<1x1x32xf32> to vector<1x32xf32>
    %218 = vector.broadcast %217 : vector<1x32xf32> to vector<16x32xf32>
    %219 = arith.addf %215, %218 : vector<16x32xf32>
    %c0_89 = arith.constant 0 : index
    %c0_90 = arith.constant 0 : index
    %c0_91 = arith.constant 0 : index
    %220 = vector.load %arg16[%c0_89, %c0_90, %c0_91] : memref<2x1x32xf32, #tpu.memory_space<vmem>>, vector<1x1x32xf32>
    %221 = vector.shape_cast %220 : vector<1x1x32xf32> to vector<1x32xf32>
    %222 = arith.mulf %219, %219 : vector<16x32xf32>
    %cst_92 = arith.constant dense<0.000000e+00> : vector<16xf32>
    %223 = vector.multi_reduction <add>, %222, %cst_92 [1] : vector<16x32xf32> to vector<16xf32>
    %224 = vector.shape_cast %223 : vector<16xf32> to vector<16x1xf32>
    %cst_93 = arith.constant 3.200000e+01 : f32
    %225 = vector.broadcast %cst_93 : f32 to vector<16x1xf32>
    %226 = arith.divf %224, %225 : vector<16x1xf32>
    %cst_94 = arith.constant 9.99999974E-6 : f32
    %227 = vector.broadcast %cst_94 : f32 to vector<16x1xf32>
    %228 = arith.addf %226, %227 : vector<16x1xf32>
    %229 = math.rsqrt %228 : vector<16x1xf32>
    %230 = vector.broadcast %229 : vector<16x1xf32> to vector<16x32xf32>
    %231 = arith.mulf %219, %230 : vector<16x32xf32>
    %232 = vector.broadcast %221 : vector<1x32xf32> to vector<16x32xf32>
    %233 = arith.mulf %231, %232 : vector<16x32xf32>
    %c0_95 = arith.constant 0 : index
    %c0_96 = arith.constant 0 : index
    %c0_97 = arith.constant 0 : index
    %234 = vector.load %arg17[%c0_95, %c0_96, %c0_97] : memref<2x32x64xf32, #tpu.memory_space<vmem>>, vector<1x32x64xf32>
    %235 = vector.shape_cast %234 : vector<1x32x64xf32> to vector<32x64xf32>
    %cst_98 = arith.constant dense<0.000000e+00> : vector<16x64xf32>
    %236 = tpu.matmul %233, %235, %cst_98 {dimension_numbers = #tpu.dot_dimension_numbers<[1], [0], [0], [1], [0, 0, 1, 1], [], []>} : vector<16x32xf32>, vector<32x64xf32>, vector<16x64xf32> -> vector<16x64xf32>
    %c0_99 = arith.constant 0 : index
    %c0_100 = arith.constant 0 : index
    %c0_101 = arith.constant 0 : index
    %237 = vector.load %arg18[%c0_99, %c0_100, %c0_101] : memref<2x1x64xf32, #tpu.memory_space<vmem>>, vector<1x1x64xf32>
    %238 = vector.shape_cast %237 : vector<1x1x64xf32> to vector<1x64xf32>
    %239 = vector.broadcast %238 : vector<1x64xf32> to vector<16x64xf32>
    %240 = arith.addf %236, %239 : vector<16x64xf32>
    %cst_102 = arith.constant 0.000000e+00 : f32
    %241 = vector.broadcast %cst_102 : f32 to vector<16x64xf32>
    %242 = arith.maximumf %240, %241 : vector<16x64xf32>
    %c0_103 = arith.constant 0 : index
    %c0_104 = arith.constant 0 : index
    %c0_105 = arith.constant 0 : index
    %243 = vector.load %arg19[%c0_103, %c0_104, %c0_105] : memref<2x64x32xf32, #tpu.memory_space<vmem>>, vector<1x64x32xf32>
    %244 = vector.shape_cast %243 : vector<1x64x32xf32> to vector<64x32xf32>
    %cst_106 = arith.constant dense<0.000000e+00> : vector<16x32xf32>
    %245 = tpu.matmul %242, %244, %cst_106 {dimension_numbers = #tpu.dot_dimension_numbers<[1], [0], [0], [1], [0, 0, 1, 1], [], []>} : vector<16x64xf32>, vector<64x32xf32>, vector<16x32xf32> -> vector<16x32xf32>
    %246 = arith.addf %219, %245 : vector<16x32xf32>
    %c0_107 = arith.constant 0 : index
    %c0_108 = arith.constant 0 : index
    %c0_109 = arith.constant 0 : index
    %247 = vector.load %arg20[%c0_107, %c0_108, %c0_109] : memref<2x1x32xf32, #tpu.memory_space<vmem>>, vector<1x1x32xf32>
    %248 = vector.shape_cast %247 : vector<1x1x32xf32> to vector<1x32xf32>
    %249 = vector.broadcast %248 : vector<1x32xf32> to vector<16x32xf32>
    %250 = arith.addf %246, %249 : vector<16x32xf32>
    %c1 = arith.constant 1 : index
    %c0_110 = arith.constant 0 : index
    %c0_111 = arith.constant 0 : index
    %251 = vector.load %arg4[%c1, %c0_110, %c0_111] : memref<2x1x32xf32, #tpu.memory_space<vmem>>, vector<1x1x32xf32>
    %252 = vector.shape_cast %251 : vector<1x1x32xf32> to vector<1x32xf32>
    %253 = arith.mulf %250, %250 : vector<16x32xf32>
    %cst_112 = arith.constant dense<0.000000e+00> : vector<16xf32>
    %254 = vector.multi_reduction <add>, %253, %cst_112 [1] : vector<16x32xf32> to vector<16xf32>
    %255 = vector.shape_cast %254 : vector<16xf32> to vector<16x1xf32>
    %cst_113 = arith.constant 3.200000e+01 : f32
    %256 = vector.broadcast %cst_113 : f32 to vector<16x1xf32>
    %257 = arith.divf %255, %256 : vector<16x1xf32>
    %cst_114 = arith.constant 9.99999974E-6 : f32
    %258 = vector.broadcast %cst_114 : f32 to vector<16x1xf32>
    %259 = arith.addf %257, %258 : vector<16x1xf32>
    %260 = math.rsqrt %259 : vector<16x1xf32>
    %261 = vector.broadcast %260 : vector<16x1xf32> to vector<16x32xf32>
    %262 = arith.mulf %250, %261 : vector<16x32xf32>
    %263 = vector.broadcast %252 : vector<1x32xf32> to vector<16x32xf32>
    %264 = arith.mulf %262, %263 : vector<16x32xf32>
    %c1_115 = arith.constant 1 : index
    %c0_116 = arith.constant 0 : index
    %c0_117 = arith.constant 0 : index
    %265 = vector.load %arg5[%c1_115, %c0_116, %c0_117] : memref<2x32x96xf32, #tpu.memory_space<vmem>>, vector<1x32x96xf32>
    %266 = vector.shape_cast %265 : vector<1x32x96xf32> to vector<32x96xf32>
    %cst_118 = arith.constant dense<0.000000e+00> : vector<16x96xf32>
    %267 = tpu.matmul %264, %266, %cst_118 {dimension_numbers = #tpu.dot_dimension_numbers<[1], [0], [0], [1], [0, 0, 1, 1], [], []>} : vector<16x32xf32>, vector<32x96xf32>, vector<16x96xf32> -> vector<16x96xf32>
    %c1_119 = arith.constant 1 : index
    %c0_120 = arith.constant 0 : index
    %c0_121 = arith.constant 0 : index
    %268 = vector.load %arg6[%c1_119, %c0_120, %c0_121] : memref<2x1x96xf32, #tpu.memory_space<vmem>>, vector<1x1x96xf32>
    %269 = vector.shape_cast %268 : vector<1x1x96xf32> to vector<1x96xf32>
    %270 = vector.broadcast %269 : vector<1x96xf32> to vector<16x96xf32>
    %271 = arith.addf %267, %270 : vector<16x96xf32>
    %272 = vector.extract_strided_slice %271 {offsets = [0, 0], sizes = [16, 32], strides = [1, 1]} : vector<16x96xf32> to vector<16x32xf32>
    %273 = vector.extract_strided_slice %271 {offsets = [0, 32], sizes = [16, 32], strides = [1, 1]} : vector<16x96xf32> to vector<16x32xf32>
    %274 = vector.extract_strided_slice %271 {offsets = [0, 64], sizes = [16, 32], strides = [1, 1]} : vector<16x96xf32> to vector<16x32xf32>
    %c1_122 = arith.constant 1 : index
    %c0_123 = arith.constant 0 : index
    %c0_124 = arith.constant 0 : index
    %275 = vector.load %arg7[%c1_122, %c0_123, %c0_124] : memref<2x32x32xf32, #tpu.memory_space<vmem>>, vector<1x32x32xf32>
    %276 = vector.shape_cast %275 : vector<1x32x32xf32> to vector<32x32xf32>
    %277 = vector.extract_strided_slice %272 {offsets = [0, 0], sizes = [16, 8], strides = [1, 1]} : vector<16x32xf32> to vector<16x8xf32>
    %278 = vector.extract_strided_slice %273 {offsets = [0, 0], sizes = [16, 8], strides = [1, 1]} : vector<16x32xf32> to vector<16x8xf32>
    %cst_125 = arith.constant dense<0.000000e+00> : vector<16x16xf32>
    %279 = tpu.matmul %277, %278, %cst_125 {dimension_numbers = #tpu.dot_dimension_numbers<[1], [1], [0], [0], [0, 0, 1, 0], [], []>} : vector<16x8xf32>, vector<16x8xf32>, vector<16x16xf32> -> vector<16x16xf32>
    %280 = arith.addf %279, %2 : vector<16x16xf32>
    %cst_126 = arith.constant dense<0xFF800000> : vector<16xf32>
    %281 = vector.multi_reduction <maximumf>, %280, %cst_126 [1] : vector<16x16xf32> to vector<16xf32>
    %282 = vector.shape_cast %281 : vector<16xf32> to vector<16x1xf32>
    %283 = vector.broadcast %282 : vector<16x1xf32> to vector<16x16xf32>
    %284 = arith.subf %280, %283 : vector<16x16xf32>
    %285 = math.exp %284 : vector<16x16xf32>
    %cst_127 = arith.constant dense<0.000000e+00> : vector<16xf32>
    %286 = vector.multi_reduction <add>, %285, %cst_127 [1] : vector<16x16xf32> to vector<16xf32>
    %287 = vector.shape_cast %286 : vector<16xf32> to vector<16x1xf32>
    %288 = tpu.reciprocal %287 {approx = true} : vector<16x1xf32> -> vector<16x1xf32>
    %289 = vector.broadcast %288 : vector<16x1xf32> to vector<16x16xf32>
    %290 = arith.mulf %285, %289 : vector<16x16xf32>
    %291 = vector.extract_strided_slice %274 {offsets = [0, 0], sizes = [16, 8], strides = [1, 1]} : vector<16x32xf32> to vector<16x8xf32>
    %cst_128 = arith.constant dense<0.000000e+00> : vector<16x8xf32>
    %292 = tpu.matmul %290, %291, %cst_128 {dimension_numbers = #tpu.dot_dimension_numbers<[1], [0], [0], [1], [0, 0, 1, 1], [], []>} : vector<16x16xf32>, vector<16x8xf32>, vector<16x8xf32> -> vector<16x8xf32>
    %293 = vector.extract_strided_slice %276 {offsets = [0, 0], sizes = [8, 32], strides = [1, 1]} : vector<32x32xf32> to vector<8x32xf32>
    %cst_129 = arith.constant dense<0.000000e+00> : vector<16x32xf32>
    %294 = tpu.matmul %292, %293, %cst_129 {dimension_numbers = #tpu.dot_dimension_numbers<[1], [0], [0], [1], [0, 0, 1, 1], [], []>} : vector<16x8xf32>, vector<8x32xf32>, vector<16x32xf32> -> vector<16x32xf32>
    %295 = vector.extract_strided_slice %272 {offsets = [0, 8], sizes = [16, 8], strides = [1, 1]} : vector<16x32xf32> to vector<16x8xf32>
    %296 = vector.extract_strided_slice %273 {offsets = [0, 8], sizes = [16, 8], strides = [1, 1]} : vector<16x32xf32> to vector<16x8xf32>
    %cst_130 = arith.constant dense<0.000000e+00> : vector<16x16xf32>
    %297 = tpu.matmul %295, %296, %cst_130 {dimension_numbers = #tpu.dot_dimension_numbers<[1], [1], [0], [0], [0, 0, 1, 0], [], []>} : vector<16x8xf32>, vector<16x8xf32>, vector<16x16xf32> -> vector<16x16xf32>
    %298 = arith.addf %297, %2 : vector<16x16xf32>
    %cst_131 = arith.constant dense<0xFF800000> : vector<16xf32>
    %299 = vector.multi_reduction <maximumf>, %298, %cst_131 [1] : vector<16x16xf32> to vector<16xf32>
    %300 = vector.shape_cast %299 : vector<16xf32> to vector<16x1xf32>
    %301 = vector.broadcast %300 : vector<16x1xf32> to vector<16x16xf32>
    %302 = arith.subf %298, %301 : vector<16x16xf32>
    %303 = math.exp %302 : vector<16x16xf32>
    %cst_132 = arith.constant dense<0.000000e+00> : vector<16xf32>
    %304 = vector.multi_reduction <add>, %303, %cst_132 [1] : vector<16x16xf32> to vector<16xf32>
    %305 = vector.shape_cast %304 : vector<16xf32> to vector<16x1xf32>
    %306 = tpu.reciprocal %305 {approx = true} : vector<16x1xf32> -> vector<16x1xf32>
    %307 = vector.broadcast %306 : vector<16x1xf32> to vector<16x16xf32>
    %308 = arith.mulf %303, %307 : vector<16x16xf32>
    %309 = vector.extract_strided_slice %274 {offsets = [0, 8], sizes = [16, 8], strides = [1, 1]} : vector<16x32xf32> to vector<16x8xf32>
    %cst_133 = arith.constant dense<0.000000e+00> : vector<16x8xf32>
    %310 = tpu.matmul %308, %309, %cst_133 {dimension_numbers = #tpu.dot_dimension_numbers<[1], [0], [0], [1], [0, 0, 1, 1], [], []>} : vector<16x16xf32>, vector<16x8xf32>, vector<16x8xf32> -> vector<16x8xf32>
    %311 = vector.extract_strided_slice %276 {offsets = [8, 0], sizes = [8, 32], strides = [1, 1]} : vector<32x32xf32> to vector<8x32xf32>
    %cst_134 = arith.constant dense<0.000000e+00> : vector<16x32xf32>
    %312 = tpu.matmul %310, %311, %cst_134 {dimension_numbers = #tpu.dot_dimension_numbers<[1], [0], [0], [1], [0, 0, 1, 1], [], []>} : vector<16x8xf32>, vector<8x32xf32>, vector<16x32xf32> -> vector<16x32xf32>
    %313 = arith.addf %294, %312 : vector<16x32xf32>
    %314 = vector.extract_strided_slice %272 {offsets = [0, 16], sizes = [16, 8], strides = [1, 1]} : vector<16x32xf32> to vector<16x8xf32>
    %315 = vector.extract_strided_slice %273 {offsets = [0, 16], sizes = [16, 8], strides = [1, 1]} : vector<16x32xf32> to vector<16x8xf32>
    %cst_135 = arith.constant dense<0.000000e+00> : vector<16x16xf32>
    %316 = tpu.matmul %314, %315, %cst_135 {dimension_numbers = #tpu.dot_dimension_numbers<[1], [1], [0], [0], [0, 0, 1, 0], [], []>} : vector<16x8xf32>, vector<16x8xf32>, vector<16x16xf32> -> vector<16x16xf32>
    %317 = arith.addf %316, %2 : vector<16x16xf32>
    %cst_136 = arith.constant dense<0xFF800000> : vector<16xf32>
    %318 = vector.multi_reduction <maximumf>, %317, %cst_136 [1] : vector<16x16xf32> to vector<16xf32>
    %319 = vector.shape_cast %318 : vector<16xf32> to vector<16x1xf32>
    %320 = vector.broadcast %319 : vector<16x1xf32> to vector<16x16xf32>
    %321 = arith.subf %317, %320 : vector<16x16xf32>
    %322 = math.exp %321 : vector<16x16xf32>
    %cst_137 = arith.constant dense<0.000000e+00> : vector<16xf32>
    %323 = vector.multi_reduction <add>, %322, %cst_137 [1] : vector<16x16xf32> to vector<16xf32>
    %324 = vector.shape_cast %323 : vector<16xf32> to vector<16x1xf32>
    %325 = tpu.reciprocal %324 {approx = true} : vector<16x1xf32> -> vector<16x1xf32>
    %326 = vector.broadcast %325 : vector<16x1xf32> to vector<16x16xf32>
    %327 = arith.mulf %322, %326 : vector<16x16xf32>
    %328 = vector.extract_strided_slice %274 {offsets = [0, 16], sizes = [16, 8], strides = [1, 1]} : vector<16x32xf32> to vector<16x8xf32>
    %cst_138 = arith.constant dense<0.000000e+00> : vector<16x8xf32>
    %329 = tpu.matmul %327, %328, %cst_138 {dimension_numbers = #tpu.dot_dimension_numbers<[1], [0], [0], [1], [0, 0, 1, 1], [], []>} : vector<16x16xf32>, vector<16x8xf32>, vector<16x8xf32> -> vector<16x8xf32>
    %330 = vector.extract_strided_slice %276 {offsets = [16, 0], sizes = [8, 32], strides = [1, 1]} : vector<32x32xf32> to vector<8x32xf32>
    %cst_139 = arith.constant dense<0.000000e+00> : vector<16x32xf32>
    %331 = tpu.matmul %329, %330, %cst_139 {dimension_numbers = #tpu.dot_dimension_numbers<[1], [0], [0], [1], [0, 0, 1, 1], [], []>} : vector<16x8xf32>, vector<8x32xf32>, vector<16x32xf32> -> vector<16x32xf32>
    %332 = arith.addf %313, %331 : vector<16x32xf32>
    %333 = vector.extract_strided_slice %272 {offsets = [0, 24], sizes = [16, 8], strides = [1, 1]} : vector<16x32xf32> to vector<16x8xf32>
    %334 = vector.extract_strided_slice %273 {offsets = [0, 24], sizes = [16, 8], strides = [1, 1]} : vector<16x32xf32> to vector<16x8xf32>
    %cst_140 = arith.constant dense<0.000000e+00> : vector<16x16xf32>
    %335 = tpu.matmul %333, %334, %cst_140 {dimension_numbers = #tpu.dot_dimension_numbers<[1], [1], [0], [0], [0, 0, 1, 0], [], []>} : vector<16x8xf32>, vector<16x8xf32>, vector<16x16xf32> -> vector<16x16xf32>
    %336 = arith.addf %335, %2 : vector<16x16xf32>
    %cst_141 = arith.constant dense<0xFF800000> : vector<16xf32>
    %337 = vector.multi_reduction <maximumf>, %336, %cst_141 [1] : vector<16x16xf32> to vector<16xf32>
    %338 = vector.shape_cast %337 : vector<16xf32> to vector<16x1xf32>
    %339 = vector.broadcast %338 : vector<16x1xf32> to vector<16x16xf32>
    %340 = arith.subf %336, %339 : vector<16x16xf32>
    %341 = math.exp %340 : vector<16x16xf32>
    %cst_142 = arith.constant dense<0.000000e+00> : vector<16xf32>
    %342 = vector.multi_reduction <add>, %341, %cst_142 [1] : vector<16x16xf32> to vector<16xf32>
    %343 = vector.shape_cast %342 : vector<16xf32> to vector<16x1xf32>
    %344 = tpu.reciprocal %343 {approx = true} : vector<16x1xf32> -> vector<16x1xf32>
    %345 = vector.broadcast %344 : vector<16x1xf32> to vector<16x16xf32>
    %346 = arith.mulf %341, %345 : vector<16x16xf32>
    %347 = vector.extract_strided_slice %274 {offsets = [0, 24], sizes = [16, 8], strides = [1, 1]} : vector<16x32xf32> to vector<16x8xf32>
    %cst_143 = arith.constant dense<0.000000e+00> : vector<16x8xf32>
    %348 = tpu.matmul %346, %347, %cst_143 {dimension_numbers = #tpu.dot_dimension_numbers<[1], [0], [0], [1], [0, 0, 1, 1], [], []>} : vector<16x16xf32>, vector<16x8xf32>, vector<16x8xf32> -> vector<16x8xf32>
    %349 = vector.extract_strided_slice %276 {offsets = [24, 0], sizes = [8, 32], strides = [1, 1]} : vector<32x32xf32> to vector<8x32xf32>
    %cst_144 = arith.constant dense<0.000000e+00> : vector<16x32xf32>
    %350 = tpu.matmul %348, %349, %cst_144 {dimension_numbers = #tpu.dot_dimension_numbers<[1], [0], [0], [1], [0, 0, 1, 1], [], []>} : vector<16x8xf32>, vector<8x32xf32>, vector<16x32xf32> -> vector<16x32xf32>
    %351 = arith.addf %332, %350 : vector<16x32xf32>
    %352 = arith.addf %250, %351 : vector<16x32xf32>
    %c1_145 = arith.constant 1 : index
    %c0_146 = arith.constant 0 : index
    %c0_147 = arith.constant 0 : index
    %353 = vector.load %arg8[%c1_145, %c0_146, %c0_147] : memref<2x1x32xf32, #tpu.memory_space<vmem>>, vector<1x1x32xf32>
    %354 = vector.shape_cast %353 : vector<1x1x32xf32> to vector<1x32xf32>
    %355 = vector.broadcast %354 : vector<1x32xf32> to vector<16x32xf32>
    %356 = arith.addf %352, %355 : vector<16x32xf32>
    %c1_148 = arith.constant 1 : index
    %c0_149 = arith.constant 0 : index
    %c0_150 = arith.constant 0 : index
    %357 = vector.load %arg9[%c1_148, %c0_149, %c0_150] : memref<2x1x32xf32, #tpu.memory_space<vmem>>, vector<1x1x32xf32>
    %358 = vector.shape_cast %357 : vector<1x1x32xf32> to vector<1x32xf32>
    %359 = arith.mulf %356, %356 : vector<16x32xf32>
    %cst_151 = arith.constant dense<0.000000e+00> : vector<16xf32>
    %360 = vector.multi_reduction <add>, %359, %cst_151 [1] : vector<16x32xf32> to vector<16xf32>
    %361 = vector.shape_cast %360 : vector<16xf32> to vector<16x1xf32>
    %cst_152 = arith.constant 3.200000e+01 : f32
    %362 = vector.broadcast %cst_152 : f32 to vector<16x1xf32>
    %363 = arith.divf %361, %362 : vector<16x1xf32>
    %cst_153 = arith.constant 9.99999974E-6 : f32
    %364 = vector.broadcast %cst_153 : f32 to vector<16x1xf32>
    %365 = arith.addf %363, %364 : vector<16x1xf32>
    %366 = math.rsqrt %365 : vector<16x1xf32>
    %367 = vector.broadcast %366 : vector<16x1xf32> to vector<16x32xf32>
    %368 = arith.mulf %356, %367 : vector<16x32xf32>
    %369 = vector.broadcast %358 : vector<1x32xf32> to vector<16x32xf32>
    %370 = arith.mulf %368, %369 : vector<16x32xf32>
    %c1_154 = arith.constant 1 : index
    %c0_155 = arith.constant 0 : index
    %c0_156 = arith.constant 0 : index
    %371 = vector.load %arg10[%c1_154, %c0_155, %c0_156] : memref<2x32x32xf32, #tpu.memory_space<vmem>>, vector<1x32x32xf32>
    %372 = vector.shape_cast %371 : vector<1x32x32xf32> to vector<32x32xf32>
    %cst_157 = arith.constant dense<0.000000e+00> : vector<16x32xf32>
    %373 = tpu.matmul %370, %372, %cst_157 {dimension_numbers = #tpu.dot_dimension_numbers<[1], [0], [0], [1], [0, 0, 1, 1], [], []>} : vector<16x32xf32>, vector<32x32xf32>, vector<16x32xf32> -> vector<16x32xf32>
    %c1_158 = arith.constant 1 : index
    %c0_159 = arith.constant 0 : index
    %c0_160 = arith.constant 0 : index
    %374 = vector.load %arg11[%c1_158, %c0_159, %c0_160] : memref<2x1x32xf32, #tpu.memory_space<vmem>>, vector<1x1x32xf32>
    %375 = vector.shape_cast %374 : vector<1x1x32xf32> to vector<1x32xf32>
    %376 = vector.broadcast %375 : vector<1x32xf32> to vector<16x32xf32>
    %377 = arith.addf %373, %376 : vector<16x32xf32>
    %378 = vector.extract_strided_slice %8 {offsets = [0, 64], sizes = [16, 32], strides = [1, 1]} : vector<16x128xf32> to vector<16x32xf32>
    %379 = vector.extract_strided_slice %8 {offsets = [0, 96], sizes = [16, 32], strides = [1, 1]} : vector<16x128xf32> to vector<16x32xf32>
    %c1_161 = arith.constant 1 : index
    %c0_162 = arith.constant 0 : index
    %c0_163 = arith.constant 0 : index
    %380 = vector.load %arg14[%c1_161, %c0_162, %c0_163] : memref<2x32x32xf32, #tpu.memory_space<vmem>>, vector<1x32x32xf32>
    %381 = vector.shape_cast %380 : vector<1x32x32xf32> to vector<32x32xf32>
    %382 = vector.extract_strided_slice %377 {offsets = [0, 0], sizes = [16, 8], strides = [1, 1]} : vector<16x32xf32> to vector<16x8xf32>
    %383 = vector.extract_strided_slice %378 {offsets = [0, 0], sizes = [16, 8], strides = [1, 1]} : vector<16x32xf32> to vector<16x8xf32>
    %cst_164 = arith.constant dense<0.000000e+00> : vector<16x16xf32>
    %384 = tpu.matmul %382, %383, %cst_164 {dimension_numbers = #tpu.dot_dimension_numbers<[1], [1], [0], [0], [0, 0, 1, 0], [], []>} : vector<16x8xf32>, vector<16x8xf32>, vector<16x16xf32> -> vector<16x16xf32>
    %385 = arith.addf %384, %3 : vector<16x16xf32>
    %cst_165 = arith.constant dense<0xFF800000> : vector<16xf32>
    %386 = vector.multi_reduction <maximumf>, %385, %cst_165 [1] : vector<16x16xf32> to vector<16xf32>
    %387 = vector.shape_cast %386 : vector<16xf32> to vector<16x1xf32>
    %388 = vector.broadcast %387 : vector<16x1xf32> to vector<16x16xf32>
    %389 = arith.subf %385, %388 : vector<16x16xf32>
    %390 = math.exp %389 : vector<16x16xf32>
    %cst_166 = arith.constant dense<0.000000e+00> : vector<16xf32>
    %391 = vector.multi_reduction <add>, %390, %cst_166 [1] : vector<16x16xf32> to vector<16xf32>
    %392 = vector.shape_cast %391 : vector<16xf32> to vector<16x1xf32>
    %393 = tpu.reciprocal %392 {approx = true} : vector<16x1xf32> -> vector<16x1xf32>
    %394 = vector.broadcast %393 : vector<16x1xf32> to vector<16x16xf32>
    %395 = arith.mulf %390, %394 : vector<16x16xf32>
    %396 = vector.extract_strided_slice %379 {offsets = [0, 0], sizes = [16, 8], strides = [1, 1]} : vector<16x32xf32> to vector<16x8xf32>
    %cst_167 = arith.constant dense<0.000000e+00> : vector<16x8xf32>
    %397 = tpu.matmul %395, %396, %cst_167 {dimension_numbers = #tpu.dot_dimension_numbers<[1], [0], [0], [1], [0, 0, 1, 1], [], []>} : vector<16x16xf32>, vector<16x8xf32>, vector<16x8xf32> -> vector<16x8xf32>
    %398 = vector.extract_strided_slice %381 {offsets = [0, 0], sizes = [8, 32], strides = [1, 1]} : vector<32x32xf32> to vector<8x32xf32>
    %cst_168 = arith.constant dense<0.000000e+00> : vector<16x32xf32>
    %399 = tpu.matmul %397, %398, %cst_168 {dimension_numbers = #tpu.dot_dimension_numbers<[1], [0], [0], [1], [0, 0, 1, 1], [], []>} : vector<16x8xf32>, vector<8x32xf32>, vector<16x32xf32> -> vector<16x32xf32>
    %400 = vector.extract_strided_slice %377 {offsets = [0, 8], sizes = [16, 8], strides = [1, 1]} : vector<16x32xf32> to vector<16x8xf32>
    %401 = vector.extract_strided_slice %378 {offsets = [0, 8], sizes = [16, 8], strides = [1, 1]} : vector<16x32xf32> to vector<16x8xf32>
    %cst_169 = arith.constant dense<0.000000e+00> : vector<16x16xf32>
    %402 = tpu.matmul %400, %401, %cst_169 {dimension_numbers = #tpu.dot_dimension_numbers<[1], [1], [0], [0], [0, 0, 1, 0], [], []>} : vector<16x8xf32>, vector<16x8xf32>, vector<16x16xf32> -> vector<16x16xf32>
    %403 = arith.addf %402, %3 : vector<16x16xf32>
    %cst_170 = arith.constant dense<0xFF800000> : vector<16xf32>
    %404 = vector.multi_reduction <maximumf>, %403, %cst_170 [1] : vector<16x16xf32> to vector<16xf32>
    %405 = vector.shape_cast %404 : vector<16xf32> to vector<16x1xf32>
    %406 = vector.broadcast %405 : vector<16x1xf32> to vector<16x16xf32>
    %407 = arith.subf %403, %406 : vector<16x16xf32>
    %408 = math.exp %407 : vector<16x16xf32>
    %cst_171 = arith.constant dense<0.000000e+00> : vector<16xf32>
    %409 = vector.multi_reduction <add>, %408, %cst_171 [1] : vector<16x16xf32> to vector<16xf32>
    %410 = vector.shape_cast %409 : vector<16xf32> to vector<16x1xf32>
    %411 = tpu.reciprocal %410 {approx = true} : vector<16x1xf32> -> vector<16x1xf32>
    %412 = vector.broadcast %411 : vector<16x1xf32> to vector<16x16xf32>
    %413 = arith.mulf %408, %412 : vector<16x16xf32>
    %414 = vector.extract_strided_slice %379 {offsets = [0, 8], sizes = [16, 8], strides = [1, 1]} : vector<16x32xf32> to vector<16x8xf32>
    %cst_172 = arith.constant dense<0.000000e+00> : vector<16x8xf32>
    %415 = tpu.matmul %413, %414, %cst_172 {dimension_numbers = #tpu.dot_dimension_numbers<[1], [0], [0], [1], [0, 0, 1, 1], [], []>} : vector<16x16xf32>, vector<16x8xf32>, vector<16x8xf32> -> vector<16x8xf32>
    %416 = vector.extract_strided_slice %381 {offsets = [8, 0], sizes = [8, 32], strides = [1, 1]} : vector<32x32xf32> to vector<8x32xf32>
    %cst_173 = arith.constant dense<0.000000e+00> : vector<16x32xf32>
    %417 = tpu.matmul %415, %416, %cst_173 {dimension_numbers = #tpu.dot_dimension_numbers<[1], [0], [0], [1], [0, 0, 1, 1], [], []>} : vector<16x8xf32>, vector<8x32xf32>, vector<16x32xf32> -> vector<16x32xf32>
    %418 = arith.addf %399, %417 : vector<16x32xf32>
    %419 = vector.extract_strided_slice %377 {offsets = [0, 16], sizes = [16, 8], strides = [1, 1]} : vector<16x32xf32> to vector<16x8xf32>
    %420 = vector.extract_strided_slice %378 {offsets = [0, 16], sizes = [16, 8], strides = [1, 1]} : vector<16x32xf32> to vector<16x8xf32>
    %cst_174 = arith.constant dense<0.000000e+00> : vector<16x16xf32>
    %421 = tpu.matmul %419, %420, %cst_174 {dimension_numbers = #tpu.dot_dimension_numbers<[1], [1], [0], [0], [0, 0, 1, 0], [], []>} : vector<16x8xf32>, vector<16x8xf32>, vector<16x16xf32> -> vector<16x16xf32>
    %422 = arith.addf %421, %3 : vector<16x16xf32>
    %cst_175 = arith.constant dense<0xFF800000> : vector<16xf32>
    %423 = vector.multi_reduction <maximumf>, %422, %cst_175 [1] : vector<16x16xf32> to vector<16xf32>
    %424 = vector.shape_cast %423 : vector<16xf32> to vector<16x1xf32>
    %425 = vector.broadcast %424 : vector<16x1xf32> to vector<16x16xf32>
    %426 = arith.subf %422, %425 : vector<16x16xf32>
    %427 = math.exp %426 : vector<16x16xf32>
    %cst_176 = arith.constant dense<0.000000e+00> : vector<16xf32>
    %428 = vector.multi_reduction <add>, %427, %cst_176 [1] : vector<16x16xf32> to vector<16xf32>
    %429 = vector.shape_cast %428 : vector<16xf32> to vector<16x1xf32>
    %430 = tpu.reciprocal %429 {approx = true} : vector<16x1xf32> -> vector<16x1xf32>
    %431 = vector.broadcast %430 : vector<16x1xf32> to vector<16x16xf32>
    %432 = arith.mulf %427, %431 : vector<16x16xf32>
    %433 = vector.extract_strided_slice %379 {offsets = [0, 16], sizes = [16, 8], strides = [1, 1]} : vector<16x32xf32> to vector<16x8xf32>
    %cst_177 = arith.constant dense<0.000000e+00> : vector<16x8xf32>
    %434 = tpu.matmul %432, %433, %cst_177 {dimension_numbers = #tpu.dot_dimension_numbers<[1], [0], [0], [1], [0, 0, 1, 1], [], []>} : vector<16x16xf32>, vector<16x8xf32>, vector<16x8xf32> -> vector<16x8xf32>
    %435 = vector.extract_strided_slice %381 {offsets = [16, 0], sizes = [8, 32], strides = [1, 1]} : vector<32x32xf32> to vector<8x32xf32>
    %cst_178 = arith.constant dense<0.000000e+00> : vector<16x32xf32>
    %436 = tpu.matmul %434, %435, %cst_178 {dimension_numbers = #tpu.dot_dimension_numbers<[1], [0], [0], [1], [0, 0, 1, 1], [], []>} : vector<16x8xf32>, vector<8x32xf32>, vector<16x32xf32> -> vector<16x32xf32>
    %437 = arith.addf %418, %436 : vector<16x32xf32>
    %438 = vector.extract_strided_slice %377 {offsets = [0, 24], sizes = [16, 8], strides = [1, 1]} : vector<16x32xf32> to vector<16x8xf32>
    %439 = vector.extract_strided_slice %378 {offsets = [0, 24], sizes = [16, 8], strides = [1, 1]} : vector<16x32xf32> to vector<16x8xf32>
    %cst_179 = arith.constant dense<0.000000e+00> : vector<16x16xf32>
    %440 = tpu.matmul %438, %439, %cst_179 {dimension_numbers = #tpu.dot_dimension_numbers<[1], [1], [0], [0], [0, 0, 1, 0], [], []>} : vector<16x8xf32>, vector<16x8xf32>, vector<16x16xf32> -> vector<16x16xf32>
    %441 = arith.addf %440, %3 : vector<16x16xf32>
    %cst_180 = arith.constant dense<0xFF800000> : vector<16xf32>
    %442 = vector.multi_reduction <maximumf>, %441, %cst_180 [1] : vector<16x16xf32> to vector<16xf32>
    %443 = vector.shape_cast %442 : vector<16xf32> to vector<16x1xf32>
    %444 = vector.broadcast %443 : vector<16x1xf32> to vector<16x16xf32>
    %445 = arith.subf %441, %444 : vector<16x16xf32>
    %446 = math.exp %445 : vector<16x16xf32>
    %cst_181 = arith.constant dense<0.000000e+00> : vector<16xf32>
    %447 = vector.multi_reduction <add>, %446, %cst_181 [1] : vector<16x16xf32> to vector<16xf32>
    %448 = vector.shape_cast %447 : vector<16xf32> to vector<16x1xf32>
    %449 = tpu.reciprocal %448 {approx = true} : vector<16x1xf32> -> vector<16x1xf32>
    %450 = vector.broadcast %449 : vector<16x1xf32> to vector<16x16xf32>
    %451 = arith.mulf %446, %450 : vector<16x16xf32>
    %452 = vector.extract_strided_slice %379 {offsets = [0, 24], sizes = [16, 8], strides = [1, 1]} : vector<16x32xf32> to vector<16x8xf32>
    %cst_182 = arith.constant dense<0.000000e+00> : vector<16x8xf32>
    %453 = tpu.matmul %451, %452, %cst_182 {dimension_numbers = #tpu.dot_dimension_numbers<[1], [0], [0], [1], [0, 0, 1, 1], [], []>} : vector<16x16xf32>, vector<16x8xf32>, vector<16x8xf32> -> vector<16x8xf32>
    %454 = vector.extract_strided_slice %381 {offsets = [24, 0], sizes = [8, 32], strides = [1, 1]} : vector<32x32xf32> to vector<8x32xf32>
    %cst_183 = arith.constant dense<0.000000e+00> : vector<16x32xf32>
    %455 = tpu.matmul %453, %454, %cst_183 {dimension_numbers = #tpu.dot_dimension_numbers<[1], [0], [0], [1], [0, 0, 1, 1], [], []>} : vector<16x8xf32>, vector<8x32xf32>, vector<16x32xf32> -> vector<16x32xf32>
    %456 = arith.addf %437, %455 : vector<16x32xf32>
    %457 = arith.addf %356, %456 : vector<16x32xf32>
    %c1_184 = arith.constant 1 : index
    %c0_185 = arith.constant 0 : index
    %c0_186 = arith.constant 0 : index
    %458 = vector.load %arg15[%c1_184, %c0_185, %c0_186] : memref<2x1x32xf32, #tpu.memory_space<vmem>>, vector<1x1x32xf32>
    %459 = vector.shape_cast %458 : vector<1x1x32xf32> to vector<1x32xf32>
    %460 = vector.broadcast %459 : vector<1x32xf32> to vector<16x32xf32>
    %461 = arith.addf %457, %460 : vector<16x32xf32>
    %c1_187 = arith.constant 1 : index
    %c0_188 = arith.constant 0 : index
    %c0_189 = arith.constant 0 : index
    %462 = vector.load %arg16[%c1_187, %c0_188, %c0_189] : memref<2x1x32xf32, #tpu.memory_space<vmem>>, vector<1x1x32xf32>
    %463 = vector.shape_cast %462 : vector<1x1x32xf32> to vector<1x32xf32>
    %464 = arith.mulf %461, %461 : vector<16x32xf32>
    %cst_190 = arith.constant dense<0.000000e+00> : vector<16xf32>
    %465 = vector.multi_reduction <add>, %464, %cst_190 [1] : vector<16x32xf32> to vector<16xf32>
    %466 = vector.shape_cast %465 : vector<16xf32> to vector<16x1xf32>
    %cst_191 = arith.constant 3.200000e+01 : f32
    %467 = vector.broadcast %cst_191 : f32 to vector<16x1xf32>
    %468 = arith.divf %466, %467 : vector<16x1xf32>
    %cst_192 = arith.constant 9.99999974E-6 : f32
    %469 = vector.broadcast %cst_192 : f32 to vector<16x1xf32>
    %470 = arith.addf %468, %469 : vector<16x1xf32>
    %471 = math.rsqrt %470 : vector<16x1xf32>
    %472 = vector.broadcast %471 : vector<16x1xf32> to vector<16x32xf32>
    %473 = arith.mulf %461, %472 : vector<16x32xf32>
    %474 = vector.broadcast %463 : vector<1x32xf32> to vector<16x32xf32>
    %475 = arith.mulf %473, %474 : vector<16x32xf32>
    %c1_193 = arith.constant 1 : index
    %c0_194 = arith.constant 0 : index
    %c0_195 = arith.constant 0 : index
    %476 = vector.load %arg17[%c1_193, %c0_194, %c0_195] : memref<2x32x64xf32, #tpu.memory_space<vmem>>, vector<1x32x64xf32>
    %477 = vector.shape_cast %476 : vector<1x32x64xf32> to vector<32x64xf32>
    %cst_196 = arith.constant dense<0.000000e+00> : vector<16x64xf32>
    %478 = tpu.matmul %475, %477, %cst_196 {dimension_numbers = #tpu.dot_dimension_numbers<[1], [0], [0], [1], [0, 0, 1, 1], [], []>} : vector<16x32xf32>, vector<32x64xf32>, vector<16x64xf32> -> vector<16x64xf32>
    %c1_197 = arith.constant 1 : index
    %c0_198 = arith.constant 0 : index
    %c0_199 = arith.constant 0 : index
    %479 = vector.load %arg18[%c1_197, %c0_198, %c0_199] : memref<2x1x64xf32, #tpu.memory_space<vmem>>, vector<1x1x64xf32>
    %480 = vector.shape_cast %479 : vector<1x1x64xf32> to vector<1x64xf32>
    %481 = vector.broadcast %480 : vector<1x64xf32> to vector<16x64xf32>
    %482 = arith.addf %478, %481 : vector<16x64xf32>
    %cst_200 = arith.constant 0.000000e+00 : f32
    %483 = vector.broadcast %cst_200 : f32 to vector<16x64xf32>
    %484 = arith.maximumf %482, %483 : vector<16x64xf32>
    %c1_201 = arith.constant 1 : index
    %c0_202 = arith.constant 0 : index
    %c0_203 = arith.constant 0 : index
    %485 = vector.load %arg19[%c1_201, %c0_202, %c0_203] : memref<2x64x32xf32, #tpu.memory_space<vmem>>, vector<1x64x32xf32>
    %486 = vector.shape_cast %485 : vector<1x64x32xf32> to vector<64x32xf32>
    %cst_204 = arith.constant dense<0.000000e+00> : vector<16x32xf32>
    %487 = tpu.matmul %484, %486, %cst_204 {dimension_numbers = #tpu.dot_dimension_numbers<[1], [0], [0], [1], [0, 0, 1, 1], [], []>} : vector<16x64xf32>, vector<64x32xf32>, vector<16x32xf32> -> vector<16x32xf32>
    %488 = arith.addf %461, %487 : vector<16x32xf32>
    %c1_205 = arith.constant 1 : index
    %c0_206 = arith.constant 0 : index
    %c0_207 = arith.constant 0 : index
    %489 = vector.load %arg20[%c1_205, %c0_206, %c0_207] : memref<2x1x32xf32, #tpu.memory_space<vmem>>, vector<1x1x32xf32>
    %490 = vector.shape_cast %489 : vector<1x1x32xf32> to vector<1x32xf32>
    %491 = vector.broadcast %490 : vector<1x32xf32> to vector<16x32xf32>
    %492 = arith.addf %488, %491 : vector<16x32xf32>
    %c0_208 = arith.constant 0 : index
    %c0_209 = arith.constant 0 : index
    %493 = vector.load %arg21[%c0_208, %c0_209] : memref<1x32xf32, #tpu.memory_space<vmem>>, vector<1x32xf32>
    %494 = arith.mulf %492, %492 : vector<16x32xf32>
    %cst_210 = arith.constant dense<0.000000e+00> : vector<16xf32>
    %495 = vector.multi_reduction <add>, %494, %cst_210 [1] : vector<16x32xf32> to vector<16xf32>
    %496 = vector.shape_cast %495 : vector<16xf32> to vector<16x1xf32>
    %cst_211 = arith.constant 3.200000e+01 : f32
    %497 = vector.broadcast %cst_211 : f32 to vector<16x1xf32>
    %498 = arith.divf %496, %497 : vector<16x1xf32>
    %cst_212 = arith.constant 9.99999974E-6 : f32
    %499 = vector.broadcast %cst_212 : f32 to vector<16x1xf32>
    %500 = arith.addf %498, %499 : vector<16x1xf32>
    %501 = math.rsqrt %500 : vector<16x1xf32>
    %502 = vector.broadcast %501 : vector<16x1xf32> to vector<16x32xf32>
    %503 = arith.mulf %492, %502 : vector<16x32xf32>
    %504 = vector.broadcast %493 : vector<1x32xf32> to vector<16x32xf32>
    %505 = arith.mulf %503, %504 : vector<16x32xf32>
    %c0_213 = arith.constant 0 : index
    %c0_214 = arith.constant 0 : index
    %506 = vector.load %arg22[%c0_213, %c0_214] : memref<16x32xf32, #tpu.memory_space<vmem>>, vector<16x32xf32>
    tpu.vector_store %arg22[%c0_213, %c0_214], %505 {strides = array<i32>} : memref<16x32xf32, #tpu.memory_space<vmem>>, vector<16x32xf32>,
    return
  }
}

</mosaic_0001>

<bundles_post_ra>
// kernel: _decoder_forward_impl.1
= control target key start
LH: loop header
LB: loop body
LE: loop exit
PB: predicated region body
PF: predicated region fallthrough
CT: control target
= control target key end

     0   :  { %s7780_s0 = inlined_call_operand.vmem [shape: f32[16,32], index: 0, kind: input, shape index: {}]   ;;  %s7781_s1 = inlined_call_operand.vmem [shape: f32[16,32], index: 1, kind: input, shape index: {}]   ;;  %s7782_s2 = inlined_call_operand.vmem [shape: f32[16,16], index: 2, kind: input, shape index: {}]   ;;  %s7783_s3 = inlined_call_operand.vmem [shape: f32[16,16], index: 3, kind: input, shape index: {}]   ;;  %s7784_s4 = inlined_call_operand.vmem [shape: f32[2,1,32], index: 4, kind: input, shape index: {}]   ;;  %s7785_s5 = inlined_call_operand.vmem [shape: f32[2,32,96], index: 5, kind: input, shape index: {}]   ;;  %s7786_s6 = inlined_call_operand.vmem [shape: f32[2,1,96], index: 6, kind: input, shape index: {}]   ;;  %s7787_s7 = inlined_call_operand.vmem [shape: f32[2,32,32], index: 7, kind: input, shape index: {}]   ;;  %s7788_s8 = inlined_call_operand.vmem [shape: f32[2,1,32], index: 8, kind: input, shape index: {}]   ;;  %s7789_s9 = inlined_call_operand.vmem [shape: f32[2,1,32], index: 9, kind: input, shape index: {}]   ;;  %s7790_s10 = inlined_call_operand.vmem [shape: f32[2,32,32], index: 10, kind: input, shape index: {}]   ;;  %s7791_s11 = inlined_call_operand.vmem [shape: f32[2,1,32], index: 11, kind: input, shape index: {}]   ;;  %s7792_s12 = inlined_call_operand.vmem [shape: f32[32,128], index: 12, kind: input, shape index: {}]   ;;  %s7793_s13 = inlined_call_operand.vmem [shape: f32[1,128], index: 13, kind: input, shape index: {}]   ;;  %s7794_s14 = inlined_call_operand.vmem [shape: f32[2,32,32], index: 14, kind: input, shape index: {}]   ;;  %s7795_s15 = inlined_call_operand.vmem [shape: f32[2,1,32], index: 15, kind: input, shape index: {}]   ;;  %s7796_s16 = inlined_call_operand.vmem [shape: f32[2,1,32], index: 16, kind: input, shape index: {}]   ;;  %s7797_s17 = inlined_call_operand.vmem [shape: f32[2,32,64], index: 17, kind: input, shape index: {}]   ;;  %s7798_s18 = inlined_call_operand.vmem [shape: f32[2,1,64], index: 18, kind: input, shape index: {}]   ;;  %s7799_s19 = inlined_call_operand.vmem [shape: f32[2,64,32], index: 19, kind: input, shape index: {}]   ;;  %s7800_s20 = inlined_call_operand.vmem [shape: f32[2,1,32], index: 20, kind: input, shape index: {}]   ;;  %s7801_s21 = inlined_call_operand.vmem [shape: f32[1,32], index: 21, kind: input, shape index: {}]   ;;  %s7802_s22 = inlined_call_operand.hbm [shape: f32[16,32], index: 22, kind: output, shape index: {}]  }
   0x1   :  { %7828 = sst [smem:[#allocation5_spill]] %s7780_s0 }
   0x2   :  { %7829 = sst [smem:[#allocation6_spill]] %s7781_s1 }
   0x3   :  { %7830 = sst [smem:[#allocation7_spill]] %s7782_s2 }
   0x4   :  { %7831 = sst [smem:[#allocation8_spill]] %s7783_s3 }
   0x5   :  { %7832 = sst [smem:[#allocation9_spill]] %s7784_s4 }
   0x6   :  { %7833 = sst [smem:[#allocation10_spill]] %s7785_s5 }
   0x7   :  { %7834 = sst [smem:[#allocation11_spill]] %s7786_s6 }
   0x8   :  { %s7835_s29 = sld [smem:[#allocation5_spill]]  ;;  %vm91_vm0 = vcmask 261120  }
   0xe   :  { %v6897_v0 = vld [vmem:[%s7835_s29] sm:$0xff]  ;;  %v6902_v1 = vld [vmem:[%s7835_s29 + $0x8] sm:$0xff] }
   0xf   :  { %27 = vsyncpa [#allocation3], 0  ;;  %v174_v2 = vmul.f32 %v6897_v0, %v6897_v0  ;;  %v175_v3 = vmul.f32 %v6902_v1, %v6902_v1  ;;  %s7836_s1 = sld [smem:[#allocation10_spill]]  ;;  %v83_v10 = vld [vmem:[%s7792_s12 + $0x18] sm:$0xff]  ;;  %v82_v11 = vld [vmem:[%s7792_s12 + $0x10] sm:$0xff]  ;;  %vm301_vm1 = vcmask 64512  }
  0x10   :  { %6144 = vmatprep.subr.mxu0 %v83_v10  ;;  %v81_v12 = vld [vmem:[%s7792_s12 + $0x8] sm:$0xff]  ;;  %s7837_s5 = sld [smem:[#allocation9_spill]]  ;;  %v80_v26 = vld [vmem:[%s7792_s12] sm:$0xff]  ;;  %s6762_s12 = smov 88   ;;  %vm385_vm2 = vcmask 130048   ;;  %vm2817_vm3 = vcmask 523264  }
  0x11   :  { %v176_v4 = vsel %vm91_vm0, %v174_v2, 0.0  ;;  %v179_v5 = vsel %vm91_vm0, %v175_v3, 0.0  ;;  %6145 = vmatpush3.msra.mxu0 %v83_v10  ;;  %s7838_s2 = sld [smem:[#allocation6_spill]]  ;;  %s6763_s4 = smov 96  }
  0x12   :  { %177 = vadd.xlane.f32.xlu0 %v176_v4  ;;  %6146 = vmatprep.subr.mxu0 %v82_v11  ;;  %s7839_s30 = sld [smem:[#allocation11_spill]]  ;;  %s7826_s0 = smov 120  }
  0x13   :  { %6147 = vmatpush3.msra.mxu0 %v82_v11  ;;  %s7840_s6 = sld [smem:[#allocation7_spill]]  ;;  %s7810_s27 = smov 56  }
  0x14   :  { %6148 = vmatprep.subr.mxu0 %v81_v12  ;;  %s7820_s3 = smov 80   ;;  %s7824_s28 = smov 112  }
  0x15   :  { %v202_v6 = vld [vmem:[%s7836_s1 + $0x18] sm:$0xff]  ;;  %v201_v7 = vld [vmem:[%s7836_s1 + $0x10] sm:$0xff]  ;;  %v200_v8 = vld [vmem:[%s7836_s1 + $0x8] sm:$0xff]  ;;  %6149 = vmatpush3.msra.mxu0 %v81_v12  ;;  %s7818_s29 = smov 72   ;;  %s7822_s23 = smov 104  }
  0x16   :  { %180 = vadd.xlane.f32.xlu0 %v179_v5  ;;  %6155 = vmatprep.subr.mxu1 %v202_v6  ;;  %v199_v9 = vld [vmem:[%s7836_s1] sm:$0xff]  ;;  %s7812_s26 = smov 40   ;;  %s7842_s25 = smov 80  }
  0x17   :  { %6156 = vmatpush3.msra.mxu1 %v202_v6  ;;  %v5706_v20 = vld [vmem:[%s7837_s5] ss:$0 sm:$0xff]  ;;  %6150 = vmatprep.subr.mxu0 %v80_v26  ;;  %v75_v28 = vld [vmem:[%s7838_s2 + $0x8] sm:$0xff] }
  0x18   :  { %6157 = vmatprep.subr.mxu1 %v201_v7  ;;  %v74_v27 = vld [vmem:[%s7838_s2] sm:$0xff]  ;;  %6151 = vmatpush3.msra.mxu0 %v80_v26  ;;  %s7816_s2 = smov 64   ;;  %v292_v26 = vld [vmem:[%s7787_s7 + $0x8] sm:$0xff] }
  0x19   :  { %6158 = vmatpush3.msra.mxu1 %v201_v7  ;;  %6152 = vmatprep.mubr.msk.f32.mxu0 %vm91_vm0, %v74_v27  ;;  %v5707_v29 = vld [vmem:[%s7839_s30] ss:$0 sm:$0xff]  ;;  %v6989_v42 = vld [vmem:[%s7840_s6 + $0x8] sm:$0xff] }
  0x1a   :  { %6159 = vmatprep.subr.mxu1 %v200_v8  ;;  %6153 = vmatmul.mubr.msk.f32.vlgmr.msra.gmra.mxu0 %vm91_vm0, %v75_v28  ;;  %v6994_v44 = vld [vmem:[%s7840_s6] sm:$0xff] }
  0x1b   :  { %6160 = vmatpush3.msra.mxu1 %v200_v8 }
  0x1c   :  { %6161 = vmatprep.subr.mxu1 %v199_v9 }
  0x1d   :  { %6162 = vmatpush3.msra.mxu1 %v199_v9 }
  0x9b   :  { %v178_v13 = vpop.xlane.xlu0 %177 }
  0x9c   :  { %v183_v14 = vmul.f32 0.03125, %v178_v13 }
  0x9e   :  { %v185_v15 = vadd.f32 1e-05, %v183_v14 }
  0x9f   :  { %v181_v16 = vpop.xlane.xlu0 %180 }
  0xa0   :  { %6580 = vrsqrt.f32 %v185_v15  ;;  %v184_v17 = vmul.f32 0.03125, %v181_v16 }
  0xa2   :  { %v186_v18 = vadd.f32 1e-05, %v184_v17 }
  0xa4   :  { %6582 = vrsqrt.f32 %v186_v18 }
  0xad   :  { %v6581_v19 = vpop.eup %6580 }
  0xae   :  { %v189_v21 = vmul.f32 %v6581_v19, %v6897_v0 }
  0xb0   :  { %v197_v22 = vmul.f32 %v5706_v20, %v189_v21 }
  0xb1   :  { %v6583_v23 = vpop.eup %6582 }
  0xb2   :  { %v190_v24 = vmul.f32 %v6583_v23, %v6902_v1  ;;  %6163 = vmatprep.mubr.msk.f32.mxu1 %vm91_vm0, %v197_v22 }
  0xb4   :  { %v198_v25 = vmul.f32 %v5706_v20, %v190_v24 }
  0xb6   :  { %6164 = vmatmul.mubr.msk.f32.vlgmr.msra.gmra.mxu1 %vm91_vm0, %v198_v25 }
  0xda   :  { %v6982_v40 = vpop.f32.mrf.mxu0 }
  0xdc   :  { %v6984_v41 = vpop.f32.mrf.mxu0 }
 0x176   :  { %v6165_v30 = vpop.f32.mrf.mxu1 }
 0x177   :  { %v6952_v31 = vadd.f32 %v6165_v30, %v5707_v29 }
 0x178   :  { %v282_v32 = vpop.f32.mrf.mxu1 }
 0x179   :  { %v6954_v33 = vadd.f32 %v5707_v29, %v282_v32  ;;  %501 = vrot.lane.b32.xlu0 %v6952_v31, %s6762_s12  ;;  %299 = vrot.lane.b32.xlu1 %v6952_v31, %s6763_s4 }
 0x17b   :  { %6170 = vmatprep.mubr.msk.f32.mxu0 %vm301_vm1, %v6954_v33 }
 0x17d   :  { %297 = vrot.lane.b32.xlu1 %v6954_v33, %s6763_s4 }
 0x181   :  { %499 = vrot.lane.b32.xlu1 %v6954_v33, %s6762_s12 }
 0x185   :  { %495 = vrot.lane.b32.xlu1 %v6954_v33, %s7826_s0 }
 0x189   :  { %497 = vrot.lane.b32.xlu1 %v6952_v31, %s7826_s0 }
 0x1eb   :  { %v502_v34 = vpop.permute.xlu0 %501  ;;  %v300_v35 = vpop.permute.xlu1 %299 }
 0x1ec   :  { %6166 = vmatprep.subr.msk.mxu0 %vm301_vm1, %v300_v35  ;;  %6180 = vmatprep.subr.msk.mxu1 %vm301_vm1, %v502_v34 }
 0x1ed   :  { %6167 = vmatpush3.xpose.msk.msra.mxu0 %vm301_vm1, %v300_v35  ;;  %6181 = vmatpush3.xpose.msk.msra.mxu1 %vm301_vm1, %v502_v34  ;;  %v291_v34 = vld [vmem:[%s7787_s7] sm:$0xff] }
 0x1ef   :  { %v298_v36 = vpop.permute.xlu1 %297 }
 0x1f0   :  { %6168 = vmatprep.subr.msk.mxu0 %vm301_vm1, %v298_v36 }
 0x1f1   :  { %6169 = vmatpush3.xpose.msk.msra.mxu0 %vm301_vm1, %v298_v36 }
 0x1f3   :  { %v500_v37 = vpop.permute.xlu1 %499 }
 0x1f4   :  { %6171 = vmatmul.mubr.msk.f32.vlgmr.msra.gmra.mxu0 %vm301_vm1, %v6952_v31  ;;  %6182 = vmatprep.subr.msk.mxu1 %vm301_vm1, %v500_v37 }
 0x1f5   :  { %6183 = vmatpush3.xpose.msk.msra.mxu1 %vm301_vm1, %v500_v37 }
 0x1f6   :  { %6199 = vmatprep.subr.mxu1 %v291_v34 }
 0x1f7   :  { %v496_v38 = vpop.permute.xlu1 %495 }
 0x1f8   :  { %6184 = vmatprep.mubr.msk.f32.mxu1 %vm301_vm1, %v496_v38 }
 0x1fb   :  { %v498_v39 = vpop.permute.xlu1 %497 }
 0x1fc   :  { %6185 = vmatmul.mubr.msk.f32.vlgmr.msra.gmra.mxu1 %vm301_vm1, %v498_v39 }
 0x1fd   :  { %6200 = vmatpush3.msra.mxu1 %v291_v34 }
 0x2b4   :  { %v6172_v43 = vpop.f32.mrf.mxu0 }
 0x2b5   :  { %v382_v45 = vadd.f32 %v6172_v43, %v6989_v42 }
 0x2b6   :  { %v376_v46 = vpop.f32.mrf.mxu0 }
 0x2b7   :  { %v377_v47 = vadd.f32 %v376_v46, %v6994_v44  ;;  %v389_v48 = vsel %vm385_vm2, %v382_v45, -inf }
 0x2b8   :  { %390 = vmax.xlane.f32.xlu0 %v389_v48 }
 0x2b9   :  { %v386_v49 = vsel %vm385_vm2, %v377_v47, -inf }
 0x2ba   :  { %387 = vmax.xlane.f32.xlu1 %v386_v49 }
 0x2bc   :  { %v6186_v50 = vpop.f32.mrf.mxu1 }
 0x2bd   :  { %v583_v53 = vadd.f32 %v6186_v50, %v6989_v42 }
 0x2be   :  { %v577_v51 = vpop.f32.mrf.mxu1 }
 0x2bf   :  { %v578_v52 = vadd.f32 %v577_v51, %v6994_v44  ;;  %v589_v55 = vsel %vm385_vm2, %v583_v53, -inf }
 0x2c1   :  { %v586_v54 = vsel %vm385_vm2, %v578_v52, -inf }
 0x2c2   :  { %587 = vmax.xlane.f32.xlu1 %v586_v54 }
 0x2c6   :  { %590 = vmax.xlane.f32.xlu1 %v589_v55 }
 0x2ce   :  { %410 = vrot.lane.b32.xlu0 %v6952_v31, %s7816_s2 }
 0x2d7   :  { %408 = vrot.lane.b32.xlu1 %v6954_v33, %s7816_s2 }
 0x341   :  { %v391_v56 = vpop.xlane.xlu0 %390 }
 0x342   :  { %v393_v57 = vsub.f32 %v382_v45, %v391_v56 }
 0x343   :  { %v388_v58 = vpop.xlane.xlu1 %387 }
 0x344   :  { %v396_v59 = vmul.f32 1.442695, %v393_v57  ;;  %v392_v60 = vsub.f32 %v377_v47, %v388_v58 }
 0x345   :  { %v411_v61 = vpop.permute.xlu0 %410 }
 0x346   :  { %6584 = vpow2.f32 %v396_v59  ;;  %v394_v62 = vmul.f32 1.442695, %v392_v60  ;;  %6173 = vmatprep.subr.mxu0 %v411_v61 }
 0x347   :  { %6174 = vmatpush3.msra.mxu0 %v411_v61 }
 0x348   :  { %6586 = vpow2.f32 %v394_v62 }
 0x34b   :  { %v588_v63 = vpop.xlane.xlu1 %587 }
 0x34c   :  { %v592_v2 = vsub.f32 %v578_v52, %v588_v63 }
 0x34e   :  { %v594_v3 = vmul.f32 1.442695, %v592_v2 }
 0x34f   :  { %v591_v4 = vpop.xlane.xlu1 %590 }
 0x350   :  { %6588 = vpow2.f32 %v594_v3  ;;  %v593_v5 = vsub.f32 %v583_v53, %v591_v4 }
 0x352   :  { %v596_v6 = vmul.f32 1.442695, %v593_v5 }
 0x353   :  { %v6585_v7 = vpop.eup %6584  ;;  %v409_v8 = vpop.permute.xlu1 %408 }
 0x354   :  { %6590 = vpow2.f32 %v596_v6  ;;  %6175 = vmatprep.subr.mxu0 %v409_v8  ;;  %v401_v9 = vsel %vm385_vm2, %v6585_v7, 0.0 }
 0x355   :  { %v6587_v10 = vpop.eup %6586  ;;  %402 = vadd.xlane.f32.xlu1 %v401_v9  ;;  %6176 = vmatpush3.msra.mxu0 %v409_v8 }
 0x356   :  { %v398_v11 = vsel %vm385_vm2, %v6587_v10, 0.0 }
 0x357   :  { %399 = vadd.xlane.f32.xlu0 %v398_v11 }
 0x35d   :  { %v6589_v12 = vpop.eup %6588 }
 0x35e   :  { %v598_v13 = vsel %vm385_vm2, %v6589_v12, 0.0 }
 0x35f   :  { %599 = vadd.xlane.f32.xlu0 %v598_v13 }
 0x361   :  { %v6591_v14 = vpop.eup %6590 }
 0x362   :  { %v601_v15 = vsel %vm385_vm2, %v6591_v14, 0.0 }
 0x363   :  { %602 = vadd.xlane.f32.xlu1 %v601_v15 }
 0x374   :  { %610 = vrot.lane.b32.xlu1 %v6952_v31, %s7810_s27 }
 0x375   :  { %608 = vrot.lane.b32.xlu0 %v6954_v33, %s7810_s27  ;;  %s7814_s27 = smov 48  }
 0x378   :  { %863 = vrot.lane.b32.xlu1 %v6952_v31, %s7820_s3 }
 0x379   :  { %861 = vrot.lane.b32.xlu0 %v6954_v33, %s7820_s3  ;;  %s7843_s3 = smov 72  }
 0x37c   :  { %857 = vrot.lane.b32.xlu1 %v6954_v33, %s7824_s28 }
 0x37d   :  { %859 = vrot.lane.b32.xlu0 %v6952_v31, %s7824_s28 }
 0x380   :  { %1146 = vrot.lane.b32.xlu1 %v6952_v31, %s7818_s29 }
 0x381   :  { %1144 = vrot.lane.b32.xlu0 %v6954_v33, %s7818_s29 }
 0x384   :  { %1140 = vrot.lane.b32.xlu1 %v6954_v33, %s7822_s23 }
 0x385   :  { %1142 = vrot.lane.b32.xlu0 %v6952_v31, %s7822_s23 }
 0x3de   :  { %v403_v16 = vpop.xlane.xlu1 %402 }
 0x3df   :  { %6592 = vrcp.f32 %v403_v16 }
 0x3e0   :  { %v400_v17 = vpop.xlane.xlu0 %399 }
 0x3e1   :  { %6594 = vrcp.f32 %v400_v17 }
 0x3e8   :  { %v600_v18 = vpop.xlane.xlu0 %599 }
 0x3e9   :  { %6596 = vrcp.f32 %v600_v18 }
 0x3ec   :  { %v603_v19 = vpop.xlane.xlu1 %602  ;;  %v6593_v20 = vpop.eup %6592 }
 0x3ed   :  { %6598 = vrcp.f32 %v603_v19  ;;  %v407_v24 = vmul.f32 %v6593_v20, %v6585_v7  ;;  %v609_v25 = vpop.permute.xlu0 %608 }
 0x3ee   :  { %v6595_v21 = vpop.eup %6594 }
 0x3ef   :  { %v406_v22 = vmul.f32 %v6595_v21, %v6587_v10 }
 0x3f0   :  { %v611_v23 = vpop.permute.xlu1 %610 }
 0x3f1   :  { %6177 = vmatprep.mubr.msk.f32.mxu0 %vm385_vm2, %v406_v22  ;;  %6187 = vmatprep.subr.mxu0 %v611_v23  ;;  %v862_v39 = vpop.permute.xlu0 %861 }
 0x3f2   :  { %6178 = vmatmul.mubr.msk.f32.vlgmr.msra.gmra.mxu0 %vm385_vm2, %v407_v24 }
 0x3f3   :  { %6188 = vmatpush3.msra.mxu0 %v611_v23 }
 0x3f4   :  { %6189 = vmatprep.subr.mxu0 %v609_v25  ;;  %v864_v32 = vpop.permute.xlu1 %863 }
 0x3f5   :  { %6190 = vmatpush3.msra.mxu0 %v609_v25  ;;  %v860_v46 = vpop.permute.xlu0 %859 }
 0x3f6   :  { %v6597_v27 = vpop.eup %6596  ;;  %6194 = vmatprep.subr.mxu0 %v292_v26 }
 0x3f7   :  { %v606_v28 = vmul.f32 %v6597_v27, %v6589_v12 }
 0x3f8   :  { %v858_v37 = vpop.permute.xlu1 %857 }
 0x3f9   :  { %6191 = vmatprep.mubr.msk.f32.mxu0 %vm385_vm2, %v606_v28  ;;  %v1145_v48 = vpop.permute.xlu0 %1144 }
 0x3fa   :  { %v6599_v29 = vpop.eup %6598 }
 0x3fb   :  { %v607_v30 = vmul.f32 %v6599_v29, %v6591_v14 }
 0x3fc   :  { %v1147_v45 = vpop.permute.xlu1 %1146 }
 0x3fd   :  { %6192 = vmatmul.mubr.msk.f32.vlgmr.msra.gmra.mxu0 %vm385_vm2, %v607_v30  ;;  %v1143_v49 = vpop.permute.xlu0 %1142  ;;  %v293_v30 = vld [vmem:[%s7787_s7 + $0x10] sm:$0xff] }
 0x3fe   :  { %6195 = vmatpush3.msra.mxu0 %v292_v26 }
 0x3ff   :  { %6204 = vmatprep.subr.msk.mxu0 %vm301_vm1, %v864_v32 }
 0x400   :  { %v1141_v47 = vpop.permute.xlu1 %1140 }
 0x4b2   :  { %v6179_v35 = vpop.f32.mrf.mxu0 }
 0x4b4   :  { %v486_v36 = vpop.f32.mrf.mxu0 }
 0x4b5   :  { %6201 = vmatprep.mubr.msk.f32.mxu1 %vm301_vm1, %v486_v36 }
 0x4b6   :  { %6202 = vmatmul.mubr.msk.f32.vlgmr.msra.gmra.mxu1 %vm301_vm1, %v6179_v35 }
 0x4bd   :  { %v6193_v38 = vpop.f32.mrf.mxu0 }
 0x4bf   :  { %v686_v43 = vpop.f32.mrf.mxu0 }
 0x4c0   :  { %6196 = vmatprep.mubr.msk.f32.mxu0 %vm301_vm1, %v686_v43 }
 0x4c1   :  { %6197 = vmatmul.mubr.msk.f32.vlgmr.msra.gmra.mxu0 %vm301_vm1, %v6193_v38 }
 0x4c2   :  { %6205 = vmatpush3.xpose.msk.msra.mxu0 %vm301_vm1, %v864_v32  ;;  %6208 = vmatprep.mubr.msk.f32.mxu0 %vm301_vm1, %v858_v37 }
 0x4c3   :  { %6206 = vmatprep.subr.msk.mxu0 %vm301_vm1, %v862_v39 }
 0x4c6   :  { %6207 = vmatpush3.xpose.msk.msra.mxu0 %vm301_vm1, %v862_v39 }
 0x4c7   :  { %6223 = vmatprep.subr.msk.mxu0 %vm301_vm1, %v1147_v45 }
 0x4c9   :  { %6209 = vmatmul.mubr.msk.f32.vlgmr.msra.gmra.mxu0 %vm301_vm1, %v860_v46  ;;  %v5703_v46 = vld [vmem:[%s7793_s13] ss:$0 sm:$0xff]  ;;  %s7841_s13 = sld [smem:[#allocation8_spill]] }
 0x4ca   :  { %6224 = vmatpush3.xpose.msk.msra.mxu0 %vm301_vm1, %v1147_v45  ;;  %6227 = vmatprep.mubr.msk.f32.mxu0 %vm301_vm1, %v1141_v47 }
 0x4cb   :  { %6225 = vmatprep.subr.msk.mxu0 %vm301_vm1, %v1145_v48 }
 0x4ce   :  { %6226 = vmatpush3.xpose.msk.msra.mxu0 %vm301_vm1, %v1145_v48  ;;  %v7097_v48 = vadd.f32 %v6982_v40, %v5703_v46  ;;  %v7106_v40 = vadd.f32 %v5703_v46, %v6984_v41 }
 0x4d1   :  { %6228 = vmatmul.mubr.msk.f32.vlgmr.msra.gmra.mxu0 %vm301_vm1, %v1143_v49 }
 0x576   :  { %v6203_v50 = vpop.f32.mrf.mxu1 }
 0x578   :  { %v848_v32 = vpop.f32.mrf.mxu1 }
 0x581   :  { %v6198_v51 = vpop.f32.mrf.mxu0 }
 0x582   :  { %v7058_v52 = vadd.f32 %v6203_v50, %v6198_v51 }
 0x583   :  { %v7060_v53 = vpop.f32.mrf.mxu0 }
 0x584   :  { %v849_v50 = vadd.f32 %v848_v32, %v7060_v53 }
 0x589   :  { %v6210_v54 = vpop.f32.mrf.mxu0 }
 0x58a   :  { %v945_v55 = vadd.f32 %v6210_v54, %v6989_v42 }
 0x58b   :  { %v939_v56 = vpop.f32.mrf.mxu0 }
 0x58c   :  { %v940_v57 = vadd.f32 %v939_v56, %v6994_v44  ;;  %v951_v58 = vsel %vm385_vm2, %v945_v55, -inf }
 0x58d   :  { %952 = vmax.xlane.f32.xlu0 %v951_v58  ;;  %v5742_v58 = vld [vmem:[%s7788_s8] ss:$0 sm:$0xff] }
 0x58e   :  { %v948_v59 = vsel %vm385_vm2, %v940_v57, -inf }
 0x58f   :  { %949 = vmax.xlane.f32.xlu1 %v948_v59 }
 0x591   :  { %v6229_v8 = vpop.f32.mrf.mxu0 }
 0x592   :  { %v1228_v11 = vadd.f32 %v6229_v8, %v6989_v42 }
 0x593   :  { %v1222_v9 = vpop.f32.mrf.mxu0 }
 0x594   :  { %v1223_v10 = vadd.f32 %v1222_v9, %v6994_v44  ;;  %v1234_v13 = vsel %vm385_vm2, %v1228_v11, -inf }
 0x596   :  { %v1231_v12 = vsel %vm385_vm2, %v1223_v10, -inf }
 0x616   :  { %v953_v60 = vpop.xlane.xlu0 %952 }
 0x617   :  { %v955_v61 = vsub.f32 %v945_v55, %v953_v60 }
 0x618   :  { %v950_v62 = vpop.xlane.xlu1 %949 }
 0x619   :  { %v958_v63 = vmul.f32 1.442695, %v955_v61  ;;  %v954_v2 = vsub.f32 %v940_v57, %v950_v62 }
 0x61b   :  { %6600 = vpow2.f32 %v958_v63  ;;  %v956_v3 = vmul.f32 1.442695, %v954_v2 }
 0x61d   :  { %6602 = vpow2.f32 %v956_v3 }
 0x628   :  { %v6601_v4 = vpop.eup %6600 }
 0x629   :  { %v963_v5 = vsel %vm385_vm2, %v6601_v4, 0.0 }
 0x62a   :  { %v6603_v6 = vpop.eup %6602  ;;  %964 = vadd.xlane.f32.xlu1 %v963_v5 }
 0x62b   :  { %v960_v7 = vsel %vm385_vm2, %v6603_v6, 0.0 }
 0x62c   :  { %961 = vadd.xlane.f32.xlu0 %v960_v7  ;;  %v1459_v7 = vld [vmem:[%s7790_s10] sm:$0xff] }
 0x63b   :  { %970 = vrot.lane.b32.xlu1 %v6954_v33, %s7814_s27 }
 0x642   :  { %972 = vrot.lane.b32.xlu0 %v6952_v31, %s7814_s27  ;;  %s7847_s27 = smov 112  }
 0x65f   :  { %1232 = vmax.xlane.f32.xlu1 %v1231_v12 }
 0x661   :  { %1235 = vmax.xlane.f32.xlu0 %v1234_v13 }
 0x6b3   :  { %v965_v14 = vpop.xlane.xlu1 %964 }
 0x6b4   :  { %6604 = vrcp.f32 %v965_v14 }
 0x6b5   :  { %v962_v15 = vpop.xlane.xlu0 %961 }
 0x6b6   :  { %6606 = vrcp.f32 %v962_v15 }
 0x6b7   :  { %v971_v17 = vpop.permute.xlu1 %970 }
 0x6b9   :  { %v973_v16 = vpop.permute.xlu0 %972 }
 0x6ba   :  { %6211 = vmatprep.subr.mxu1 %v973_v16 }
 0x6bb   :  { %6212 = vmatpush3.msra.mxu1 %v973_v16 }
 0x6bc   :  { %6213 = vmatprep.subr.mxu1 %v971_v17 }
 0x6bd   :  { %6214 = vmatpush3.msra.mxu1 %v971_v17 }
 0x6be   :  { %6218 = vmatprep.subr.mxu1 %v293_v30 }
 0x6c1   :  { %v6605_v18 = vpop.eup %6604 }
 0x6c2   :  { %v969_v42 = vmul.f32 %v6605_v18, %v6601_v4  ;;  %v5743_v18 = vld [vmem:[%s7789_s9] ss:$0 sm:$0xff] }
 0x6c3   :  { %v6607_v44 = vpop.eup %6606 }
 0x6c4   :  { %v968_v19 = vmul.f32 %v6607_v44, %v6603_v6  ;;  %v1460_v6 = vld [vmem:[%s7790_s10 + $0x8] sm:$0xff] }
 0x6c6   :  { %6215 = vmatprep.mubr.msk.f32.mxu1 %vm385_vm2, %v968_v19 }
 0x6c7   :  { %6216 = vmatmul.mubr.msk.f32.vlgmr.msra.gmra.mxu1 %vm385_vm2, %v969_v42 }
 0x6c8   :  { %6219 = vmatpush3.msra.mxu1 %v293_v30  ;;  %v7182_v30 = vld [vmem:[%s7841_s13] sm:$0xff] }
 0x6e8   :  { %v1233_v20 = vpop.xlane.xlu1 %1232 }
 0x6e9   :  { %v1237_v21 = vsub.f32 %v1223_v10, %v1233_v20  ;;  %v5744_v20 = vld [vmem:[%s7791_s11] ss:$0 sm:$0xff] }
 0x6ea   :  { %v1236_v22 = vpop.xlane.xlu0 %1235 }
 0x6eb   :  { %v1239_v23 = vmul.f32 1.442695, %v1237_v21  ;;  %v1238_v24 = vsub.f32 %v1228_v11, %v1236_v22 }
 0x6ed   :  { %6608 = vpow2.f32 %v1239_v23  ;;  %v1241_v25 = vmul.f32 1.442695, %v1238_v24 }
 0x6ef   :  { %6610 = vpow2.f32 %v1241_v25 }
 0x6fa   :  { %v6609_v26 = vpop.eup %6608 }
 0x6fb   :  { %v1243_v27 = vsel %vm385_vm2, %v6609_v26, 0.0 }
 0x6fc   :  { %v6611_v28 = vpop.eup %6610  ;;  %1244 = vadd.xlane.f32.xlu0 %v1243_v27 }
 0x6fd   :  { %v1246_v29 = vsel %vm385_vm2, %v6611_v28, 0.0 }
 0x6fe   :  { %1247 = vadd.xlane.f32.xlu1 %v1246_v29 }
 0x70f   :  { %1253 = vrot.lane.b32.xlu1 %v6954_v33, %s7812_s26  ;;  %v294_v33 = vld [vmem:[%s7787_s7 + $0x18] sm:$0xff] }
 0x712   :  { %1255 = vrot.lane.b32.xlu0 %v6952_v31, %s7812_s26  ;;  %s7845_s26 = smov 120  }
 0x785   :  { %v1245_v34 = vpop.xlane.xlu0 %1244 }
 0x786   :  { %6612 = vrcp.f32 %v1245_v34 }
 0x787   :  { %v6217_v35 = vpop.f32.mrf.mxu1  ;;  %v1248_v36 = vpop.xlane.xlu1 %1247 }
 0x788   :  { %6614 = vrcp.f32 %v1248_v36 }
 0x789   :  { %v1048_v37 = vpop.f32.mrf.mxu1  ;;  %v1256_v38 = vpop.permute.xlu0 %1255 }
 0x78a   :  { %6220 = vmatprep.mubr.msk.f32.mxu1 %vm301_vm1, %v1048_v37  ;;  %6230 = vmatprep.subr.mxu1 %v1256_v38 }
 0x78b   :  { %6221 = vmatmul.mubr.msk.f32.vlgmr.msra.gmra.mxu1 %vm301_vm1, %v6217_v35  ;;  %v1254_v39 = vpop.permute.xlu1 %1253 }
 0x78c   :  { %6231 = vmatpush3.msra.mxu1 %v1256_v38 }
 0x78d   :  { %6232 = vmatprep.subr.mxu1 %v1254_v39 }
 0x78e   :  { %6233 = vmatpush3.msra.mxu1 %v1254_v39 }
 0x78f   :  { %6237 = vmatprep.subr.mxu1 %v294_v33 }
 0x793   :  { %v6613_v31 = vpop.eup %6612 }
 0x794   :  { %v1251_v43 = vmul.f32 %v6613_v31, %v6609_v26 }
 0x795   :  { %v6615_v45 = vpop.eup %6614 }
 0x796   :  { %6234 = vmatprep.mubr.msk.f32.mxu1 %vm385_vm2, %v1251_v43  ;;  %v1252_v47 = vmul.f32 %v6615_v45, %v6611_v28  ;;  %v7177_v28 = vld [vmem:[%s7841_s13 + $0x8] sm:$0xff] }
 0x798   :  { %6235 = vmatmul.mubr.msk.f32.vlgmr.msra.gmra.mxu1 %vm385_vm2, %v1252_v47 }
 0x799   :  { %6238 = vmatpush3.msra.mxu1 %v294_v33 }
 0x79a   :  { %6253 = vmatprep.subr.msk.mxu1 %vm301_vm1, %v7097_v48 }
 0x84b   :  { %v6222_v49 = vpop.f32.mrf.mxu1 }
 0x84c   :  { %v1139_v51 = vadd.f32 %v6222_v49, %v7058_v52 }
 0x84d   :  { %v1129_v54 = vpop.f32.mrf.mxu1 }
 0x84e   :  { %v1138_v55 = vadd.f32 %v1129_v54, %v849_v50 }
 0x858   :  { %v6236_v56 = vpop.f32.mrf.mxu1 }
 0x85a   :  { %v1331_v57 = vpop.f32.mrf.mxu1 }
 0x85b   :  { %6239 = vmatprep.mubr.msk.f32.mxu1 %vm301_vm1, %v1331_v57 }
 0x85c   :  { %6240 = vmatmul.mubr.msk.f32.vlgmr.msra.gmra.mxu1 %vm301_vm1, %v6236_v56 }
 0x85d   :  { %6254 = vmatpush3.xpose.msk.msra.mxu1 %vm301_vm1, %v7097_v48 }
 0x85e   :  { %6255 = vmatprep.subr.msk.mxu1 %vm301_vm1, %v7106_v40 }
 0x861   :  { %6256 = vmatpush3.xpose.msk.msra.mxu1 %vm301_vm1, %v7106_v40 }
 0x91c   :  { %v6241_v52 = vpop.f32.mrf.mxu1 }
 0x91d   :  { %v1422_v53 = vadd.f32 %v6241_v52, %v1139_v51 }
 0x91e   :  { %v1412_v59 = vpop.f32.mrf.mxu1 }
 0x91f   :  { %v1424_v41 = vadd.f32 %v1422_v53, %v6902_v1  ;;  %v1421_v60 = vadd.f32 %v1412_v59, %v1138_v55  ;;  %v1462_v1 = vld [vmem:[%s7790_s10 + $0x18] sm:$0xff] }
 0x920   :  { %6242 = vmatprep.subr.mxu0 %v1462_v1 }
 0x921   :  { %v7119_v61 = vadd.f32 %v5742_v58, %v1424_v41  ;;  %v1423_v62 = vadd.f32 %v1421_v60, %v6897_v0  ;;  %v1461_v0 = vld [vmem:[%s7790_s10 + $0x10] sm:$0xff]  ;;  %6243 = vmatpush3.msra.mxu0 %v1462_v1 }
 0x922   :  { %6244 = vmatprep.subr.mxu0 %v1461_v0 }
 0x923   :  { %v7122_v63 = vadd.f32 %v5742_v58, %v1423_v62  ;;  %v1436_v2 = vmul.f32 %v7119_v61, %v7119_v61  ;;  %6245 = vmatpush3.msra.mxu0 %v1461_v0 }
 0x924   :  { %6246 = vmatprep.subr.mxu0 %v1460_v6 }
 0x925   :  { %v1440_v3 = vsel %vm91_vm0, %v1436_v2, 0.0  ;;  %v1435_v4 = vmul.f32 %v7122_v63, %v7122_v63  ;;  %6247 = vmatpush3.msra.mxu0 %v1460_v6 }
 0x926   :  { %1441 = vadd.xlane.f32.xlu0 %v1440_v3  ;;  %6248 = vmatprep.subr.mxu0 %v1459_v7 }
 0x927   :  { %v1437_v5 = vsel %vm91_vm0, %v1435_v4, 0.0  ;;  %6249 = vmatpush3.msra.mxu0 %v1459_v7 }
 0x928   :  { %1438 = vadd.xlane.f32.xlu1 %v1437_v5 }
 0x939   :  { %1755 = vrot.lane.b32.xlu1 %v7106_v40, %s7826_s0 }
 0x93c   :  { %1757 = vrot.lane.b32.xlu0 %v7097_v48, %s7826_s0 }
 0x9af   :  { %v1442_v8 = vpop.xlane.xlu0 %1441 }
 0x9b0   :  { %v1444_v9 = vmul.f32 0.03125, %v1442_v8 }
 0x9b1   :  { %v1439_v10 = vpop.xlane.xlu1 %1438 }
 0x9b2   :  { %v1446_v11 = vadd.f32 1e-05, %v1444_v9  ;;  %v1443_v12 = vmul.f32 0.03125, %v1439_v10 }
 0x9b3   :  { %v1758_v13 = vpop.permute.xlu0 %1757 }
 0x9b4   :  { %6616 = vrsqrt.f32 %v1446_v11  ;;  %v1445_v14 = vadd.f32 1e-05, %v1443_v12  ;;  %6267 = vmatprep.subr.msk.mxu1 %vm301_vm1, %v1758_v13  ;;  %v1551_v12 = vld [vmem:[%s7794_s14] sm:$0xff] }
 0x9b5   :  { %v1756_v25 = vpop.permute.xlu1 %1755 }
 0x9b6   :  { %6618 = vrsqrt.f32 %v1445_v14 }
 0x9c1   :  { %v6617_v15 = vpop.eup %6616 }
 0x9c2   :  { %v1450_v17 = vmul.f32 %v6617_v15, %v7119_v61 }
 0x9c3   :  { %v6619_v16 = vpop.eup %6618 }
 0x9c4   :  { %v1449_v44 = vmul.f32 %v6619_v16, %v7122_v63  ;;  %v1458_v42 = vmul.f32 %v5743_v18, %v1450_v17  ;;  %v1552_v17 = vld [vmem:[%s7794_s14 + $0x8] sm:$0xff] }
 0x9c6   :  { %v1457_v19 = vmul.f32 %v5743_v18, %v1449_v44 }
 0x9c8   :  { %6250 = vmatprep.mubr.msk.f32.mxu0 %vm91_vm0, %v1457_v19 }
 0x9c9   :  { %6251 = vmatmul.mubr.msk.f32.vlgmr.msra.gmra.mxu0 %vm91_vm0, %v1458_v42 }
 0xa89   :  { %v6252_v21 = vpop.f32.mrf.mxu0 }
 0xa8a   :  { %v7157_v22 = vadd.f32 %v6252_v21, %v5744_v20 }
 0xa8b   :  { %v1542_v23 = vpop.f32.mrf.mxu0 }
 0xa8c   :  { %v7159_v24 = vadd.f32 %v5744_v20, %v1542_v23  ;;  %1753 = vrot.lane.b32.xlu0 %v7157_v22, %s7826_s0 }
 0xa8e   :  { %1751 = vrot.lane.b32.xlu1 %v7159_v24, %s7826_s0  ;;  %6257 = vmatprep.mubr.msk.f32.mxu1 %vm301_vm1, %v7159_v24  ;;  %s7848_s0 = smov 104  }
 0xa8f   :  { %6258 = vmatmul.mubr.msk.f32.vlgmr.msra.gmra.mxu1 %vm301_vm1, %v7157_v22 }
 0xa90   :  { %6268 = vmatpush3.xpose.msk.msra.mxu1 %vm301_vm1, %v1758_v13 }
 0xa91   :  { %6269 = vmatprep.subr.msk.mxu1 %vm301_vm1, %v1756_v25 }
 0xa94   :  { %6270 = vmatpush3.xpose.msk.msra.mxu1 %vm301_vm1, %v1756_v25 }
 0xa95   :  { %6286 = vmatprep.subr.mxu1 %v1551_v12 }
 0xafe   :  { %v1754_v27 = vpop.permute.xlu0 %1753 }
 0xb00   :  { %v1752_v26 = vpop.permute.xlu1 %1751 }
 0xb01   :  { %6271 = vmatprep.mubr.msk.f32.mxu1 %vm301_vm1, %v1752_v26 }
 0xb02   :  { %6272 = vmatmul.mubr.msk.f32.vlgmr.msra.gmra.mxu1 %vm301_vm1, %v1754_v27 }
 0xb03   :  { %6287 = vmatpush3.msra.mxu1 %v1551_v12 }
 0xb4f   :  { %v6259_v29 = vpop.f32.mrf.mxu1 }
 0xb50   :  { %v1639_v32 = vadd.f32 %v6259_v29, %v7177_v28 }
 0xb51   :  { %v1633_v34 = vpop.f32.mrf.mxu1 }
 0xb52   :  { %v1634_v35 = vadd.f32 %v1633_v34, %v7182_v30  ;;  %v1645_v36 = vsel %vm385_vm2, %v1639_v32, -inf }
 0xb53   :  { %1646 = vmax.xlane.f32.xlu0 %v1645_v36 }
 0xb54   :  { %v1642_v37 = vsel %vm385_vm2, %v1634_v35, -inf }
 0xb55   :  { %1643 = vmax.xlane.f32.xlu1 %v1642_v37 }
 0xbc2   :  { %v6273_v38 = vpop.f32.mrf.mxu1 }
 0xbc3   :  { %v1839_v39 = vadd.f32 %v6273_v38, %v7177_v28 }
 0xbc4   :  { %v1833_v33 = vpop.f32.mrf.mxu1 }
 0xbc5   :  { %v1834_v31 = vadd.f32 %v1833_v33, %v7182_v30  ;;  %v1845_v43 = vsel %vm385_vm2, %v1839_v39, -inf }
 0xbc6   :  { %1846 = vmax.xlane.f32.xlu1 %v1845_v43 }
 0xbc7   :  { %v1842_v45 = vsel %vm385_vm2, %v1834_v31, -inf }
 0xbc8   :  { %1843 = vmax.xlane.f32.xlu0 %v1842_v45 }
 0xbd7   :  { %1664 = vrot.lane.b32.xlu1 %v7106_v40, %s6763_s4 }
 0xbdc   :  { %v1647_v46 = vpop.xlane.xlu0 %1646 }
 0xbdd   :  { %v1649_v49 = vsub.f32 %v1639_v32, %v1647_v46 }
 0xbde   :  { %1666 = vrot.lane.b32.xlu0 %v7097_v48, %s6763_s4  ;;  %v1644_v47 = vpop.xlane.xlu1 %1643 }
 0xbdf   :  { %v1648_v50 = vsub.f32 %v1634_v35, %v1644_v47  ;;  %v1652_v51 = vmul.f32 1.442695, %v1649_v49 }
 0xbe1   :  { %v1650_v54 = vmul.f32 1.442695, %v1648_v50  ;;  %6620 = vpow2.f32 %v1652_v51 }
 0xbe3   :  { %6622 = vpow2.f32 %v1650_v54 }
 0xbee   :  { %v6621_v55 = vpop.eup %6620 }
 0xbef   :  { %v1657_v57 = vsel %vm385_vm2, %v6621_v55, 0.0 }
 0xbf0   :  { %v6623_v56 = vpop.eup %6622 }
 0xbf1   :  { %v1654_v52 = vsel %vm385_vm2, %v6623_v56, 0.0 }
 0xbfb   :  { %1658 = vadd.xlane.f32.xlu1 %v1657_v57 }
 0xbfd   :  { %1655 = vadd.xlane.f32.xlu0 %v1654_v52 }
 0xc4f   :  { %v1847_v53 = vpop.xlane.xlu1 %1846 }
 0xc50   :  { %v1849_v58 = vsub.f32 %v1839_v39, %v1847_v53 }
 0xc51   :  { %v1844_v59 = vpop.xlane.xlu0 %1843 }
 0xc52   :  { %v1852_v41 = vmul.f32 1.442695, %v1849_v58  ;;  %v1848_v60 = vsub.f32 %v1834_v31, %v1844_v59 }
 0xc53   :  { %v1665_v3 = vpop.permute.xlu1 %1664 }
 0xc54   :  { %6624 = vpow2.f32 %v1852_v41  ;;  %v1850_v62 = vmul.f32 1.442695, %v1848_v60 }
 0xc55   :  { %v1667_v2 = vpop.permute.xlu0 %1666 }
 0xc56   :  { %6626 = vpow2.f32 %v1850_v62  ;;  %6260 = vmatprep.subr.mxu0 %v1667_v2 }
 0xc57   :  { %6261 = vmatpush3.msra.mxu0 %v1667_v2 }
 0xc58   :  { %6262 = vmatprep.subr.mxu0 %v1665_v3 }
 0xc59   :  { %6263 = vmatpush3.msra.mxu0 %v1665_v3 }
 0xc61   :  { %v6625_v4 = vpop.eup %6624 }
 0xc62   :  { %v1857_v5 = vsel %vm385_vm2, %v6625_v4, 0.0 }
 0xc63   :  { %v6627_v1 = vpop.eup %6626  ;;  %1858 = vadd.xlane.f32.xlu1 %v1857_v5 }
 0xc64   :  { %v1854_v0 = vsel %vm385_vm2, %v6627_v1, 0.0 }
 0xc65   :  { %1855 = vadd.xlane.f32.xlu0 %v1854_v0 }
 0xc74   :  { %1866 = vrot.lane.b32.xlu1 %v7097_v48, %s6762_s12 }
 0xc78   :  { %2119 = vrot.lane.b32.xlu1 %v7097_v48, %s7824_s28 }
 0xc7b   :  { %1864 = vrot.lane.b32.xlu0 %v7106_v40, %s6762_s12 }
 0xc7c   :  { %2113 = vrot.lane.b32.xlu1 %v7159_v24, %s7824_s28 }
 0xc7f   :  { %2117 = vrot.lane.b32.xlu0 %v7106_v40, %s7824_s28 }
 0xc80   :  { %2402 = vrot.lane.b32.xlu1 %v7097_v48, %s7822_s23 }
 0xc83   :  { %2115 = vrot.lane.b32.xlu0 %v7157_v22, %s7824_s28 }
 0xc84   :  { %2396 = vrot.lane.b32.xlu1 %v7159_v24, %s7822_s23  ;;  %v1659_v6 = vpop.xlane.xlu1 %1658 }
 0xc85   :  { %6628 = vrcp.f32 %v1659_v6 }
 0xc86   :  { %v1656_v7 = vpop.xlane.xlu0 %1655 }
 0xc87   :  { %6630 = vrcp.f32 %v1656_v7  ;;  %2400 = vrot.lane.b32.xlu0 %v7106_v40, %s7822_s23 }
 0xc8b   :  { %2398 = vrot.lane.b32.xlu0 %v7157_v22, %s7822_s23  ;;  %s7846_s23 = smov 56  }
 0xc92   :  { %v6629_v8 = vpop.eup %6628 }
 0xc93   :  { %v1663_v11 = vmul.f32 %v6629_v8, %v6621_v55 }
 0xc94   :  { %v6631_v9 = vpop.eup %6630 }
 0xc95   :  { %v1662_v10 = vmul.f32 %v6631_v9, %v6623_v56 }
 0xc97   :  { %6264 = vmatprep.mubr.msk.f32.mxu0 %vm385_vm2, %v1662_v10 }
 0xc98   :  { %6265 = vmatmul.mubr.msk.f32.vlgmr.msra.gmra.mxu0 %vm385_vm2, %v1663_v11 }
 0xcec   :  { %v1859_v13 = vpop.xlane.xlu1 %1858 }
 0xced   :  { %6632 = vrcp.f32 %v1859_v13 }
 0xcee   :  { %v1856_v14 = vpop.xlane.xlu0 %1855 }
 0xcef   :  { %6634 = vrcp.f32 %v1856_v14 }
 0xcf0   :  { %v1867_v15 = vpop.permute.xlu1 %1866 }
 0xcf1   :  { %6274 = vmatprep.subr.mxu0 %v1867_v15 }
 0xcf2   :  { %v1865_v16 = vpop.permute.xlu0 %1864  ;;  %6275 = vmatpush3.msra.mxu0 %v1867_v15 }
 0xcf3   :  { %6276 = vmatprep.subr.mxu0 %v1865_v16 }
 0xcf4   :  { %6277 = vmatpush3.msra.mxu0 %v1865_v16  ;;  %v2120_v20 = vpop.permute.xlu1 %2119  ;;  %v1553_v16 = vld [vmem:[%s7794_s14 + $0x10] sm:$0xff] }
 0xcf5   :  { %6281 = vmatprep.subr.mxu0 %v1552_v17 }
 0xcf6   :  { %v2118_v25 = vpop.permute.xlu0 %2117 }
 0xcf8   :  { %v2114_v23 = vpop.permute.xlu1 %2113 }
 0xcfa   :  { %v6633_v18 = vpop.eup %6632  ;;  %v2116_v29 = vpop.permute.xlu0 %2115 }
 0xcfb   :  { %v1863_v42 = vmul.f32 %v6633_v18, %v6625_v4 }
 0xcfc   :  { %v6635_v44 = vpop.eup %6634  ;;  %v2403_v27 = vpop.permute.xlu1 %2402 }
 0xcfd   :  { %v1862_v19 = vmul.f32 %v6635_v44, %v6627_v1 }
 0xcfe   :  { %v2401_v34 = vpop.permute.xlu0 %2400 }
 0xcff   :  { %6278 = vmatprep.mubr.msk.f32.mxu0 %vm385_vm2, %v1862_v19 }
 0xd00   :  { %6279 = vmatmul.mubr.msk.f32.vlgmr.msra.gmra.mxu0 %vm385_vm2, %v1863_v42  ;;  %v2397_v32 = vpop.permute.xlu1 %2396 }
 0xd01   :  { %6282 = vmatpush3.msra.mxu0 %v1552_v17 }
 0xd02   :  { %6291 = vmatprep.subr.msk.mxu0 %vm301_vm1, %v2120_v20  ;;  %v2399_v35 = vpop.permute.xlu0 %2398 }
 0xd58   :  { %v6266_v21 = vpop.f32.mrf.mxu0 }
 0xd5a   :  { %v1742_v22 = vpop.f32.mrf.mxu0 }
 0xd5b   :  { %6288 = vmatprep.mubr.msk.f32.mxu1 %vm301_vm1, %v1742_v22 }
 0xd5c   :  { %6289 = vmatmul.mubr.msk.f32.vlgmr.msra.gmra.mxu1 %vm301_vm1, %v6266_v21 }
 0xdc0   :  { %v6280_v24 = vpop.f32.mrf.mxu0 }
 0xdc2   :  { %v1942_v26 = vpop.f32.mrf.mxu0 }
 0xdc3   :  { %6283 = vmatprep.mubr.msk.f32.mxu0 %vm301_vm1, %v1942_v26 }
 0xdc4   :  { %6284 = vmatmul.mubr.msk.f32.vlgmr.msra.gmra.mxu0 %vm301_vm1, %v6280_v24 }
 0xdc5   :  { %6292 = vmatpush3.xpose.msk.msra.mxu0 %vm301_vm1, %v2120_v20  ;;  %6295 = vmatprep.mubr.msk.f32.mxu0 %vm301_vm1, %v2114_v23 }
 0xdc6   :  { %6293 = vmatprep.subr.msk.mxu0 %vm301_vm1, %v2118_v25 }
 0xdc9   :  { %6294 = vmatpush3.xpose.msk.msra.mxu0 %vm301_vm1, %v2118_v25 }
 0xdca   :  { %6310 = vmatprep.subr.msk.mxu0 %vm301_vm1, %v2403_v27 }
 0xdcc   :  { %6296 = vmatmul.mubr.msk.f32.vlgmr.msra.gmra.mxu0 %vm301_vm1, %v2116_v29 }
 0xdcd   :  { %6311 = vmatpush3.xpose.msk.msra.mxu0 %vm301_vm1, %v2403_v27  ;;  %6314 = vmatprep.mubr.msk.f32.mxu0 %vm301_vm1, %v2397_v32  ;;  %v1554_v27 = vld [vmem:[%s7794_s14 + $0x18] sm:$0xff] }
 0xdce   :  { %6312 = vmatprep.subr.msk.mxu0 %vm301_vm1, %v2401_v34 }
 0xdd1   :  { %6313 = vmatpush3.xpose.msk.msra.mxu0 %vm301_vm1, %v2401_v34 }
 0xdd4   :  { %6315 = vmatmul.mubr.msk.f32.vlgmr.msra.gmra.mxu0 %vm301_vm1, %v2399_v35 }
 0xe1c   :  { %v6290_v17 = vpop.f32.mrf.mxu1 }
 0xe1e   :  { %v2104_v18 = vpop.f32.mrf.mxu1 }
 0xe84   :  { %v7246_v36 = vpop.f32.mrf.mxu0 }
 0xe85   :  { %v2110_v29 = vadd.f32 %v6290_v17, %v7246_v36 }
 0xe86   :  { %v7248_v37 = vpop.f32.mrf.mxu0 }
 0xe87   :  { %v2105_v34 = vadd.f32 %v2104_v18, %v7248_v37 }
 0xe8c   :  { %v6297_v38 = vpop.f32.mrf.mxu0 }
 0xe8d   :  { %v2201_v39 = vadd.f32 %v6297_v38, %v7177_v28 }
 0xe8e   :  { %v2195_v33 = vpop.f32.mrf.mxu0 }
 0xe8f   :  { %v2196_v31 = vadd.f32 %v2195_v33, %v7182_v30  ;;  %v2207_v43 = vsel %vm385_vm2, %v2201_v39, -inf }
 0xe90   :  { %2208 = vmax.xlane.f32.xlu0 %v2207_v43 }
 0xe91   :  { %v2204_v45 = vsel %vm385_vm2, %v2196_v31, -inf }
 0xe92   :  { %2205 = vmax.xlane.f32.xlu1 %v2204_v45 }
 0xe94   :  { %v6316_v53 = vpop.f32.mrf.mxu0 }
 0xe95   :  { %v2484_v41 = vadd.f32 %v6316_v53, %v7177_v28  ;;  %v2715_v53 = vld [vmem:[%s7797_s17] sm:$0xff] }
 0xe96   :  { %v2478_v58 = vpop.f32.mrf.mxu0 }
 0xe97   :  { %v2479_v59 = vadd.f32 %v2478_v58, %v7182_v30  ;;  %v2490_v62 = vsel %vm385_vm2, %v2484_v41, -inf  ;;  %v2816_v58 = vld [vmem:[%s7799_s19 + $0x38] sm:$0xff] }
 0xe99   :  { %v2487_v60 = vsel %vm385_vm2, %v2479_v59, -inf }
 0xf19   :  { %v2209_v46 = vpop.xlane.xlu0 %2208 }
 0xf1a   :  { %v2211_v47 = vsub.f32 %v2201_v39, %v2209_v46  ;;  %v5779_v46 = vld [vmem:[%s7795_s15] ss:$0 sm:$0xff] }
 0xf1b   :  { %v2206_v49 = vpop.xlane.xlu1 %2205 }
 0xf1c   :  { %v2214_v50 = vmul.f32 1.442695, %v2211_v47  ;;  %v2210_v51 = vsub.f32 %v2196_v31, %v2206_v49 }
 0xf1e   :  { %6636 = vpow2.f32 %v2214_v50  ;;  %v2212_v54 = vmul.f32 1.442695, %v2210_v51 }
 0xf20   :  { %6638 = vpow2.f32 %v2212_v54 }
 0xf2b   :  { %v6637_v55 = vpop.eup %6636 }
 0xf2c   :  { %v2219_v56 = vsel %vm385_vm2, %v6637_v55, 0.0 }
 0xf2d   :  { %v6639_v57 = vpop.eup %6638  ;;  %2220 = vadd.xlane.f32.xlu1 %v2219_v56 }
 0xf2e   :  { %v2216_v52 = vsel %vm385_vm2, %v6639_v57, 0.0 }
 0xf2f   :  { %2217 = vadd.xlane.f32.xlu0 %v2216_v52  ;;  %v2716_v52 = vld [vmem:[%s7797_s17 + $0x8] sm:$0xff] }
 0xf3e   :  { %2226 = vrot.lane.b32.xlu1 %v7106_v40, %s7842_s25 }
 0xf45   :  { %2228 = vrot.lane.b32.xlu0 %v7097_v48, %s7842_s25 }
 0xf62   :  { %2488 = vmax.xlane.f32.xlu1 %v2487_v60  ;;  %v2813_v60 = vld [vmem:[%s7799_s19 + $0x20] sm:$0xff] }
 0xf64   :  { %2491 = vmax.xlane.f32.xlu0 %v2490_v62 }
 0xfb6   :  { %v2221_v2 = vpop.xlane.xlu1 %2220 }
 0xfb7   :  { %6640 = vrcp.f32 %v2221_v2 }
 0xfb8   :  { %v2218_v3 = vpop.xlane.xlu0 %2217 }
 0xfb9   :  { %6642 = vrcp.f32 %v2218_v3 }
 0xfba   :  { %v2227_v5 = vpop.permute.xlu1 %2226 }
 0xfbc   :  { %v2229_v4 = vpop.permute.xlu0 %2228 }
 0xfbd   :  { %6298 = vmatprep.subr.mxu1 %v2229_v4 }
 0xfbe   :  { %6299 = vmatpush3.msra.mxu1 %v2229_v4 }
 0xfbf   :  { %6300 = vmatprep.subr.mxu1 %v2227_v5 }
 0xfc0   :  { %6301 = vmatpush3.msra.mxu1 %v2227_v5 }
 0xfc1   :  { %6305 = vmatprep.subr.mxu1 %v1553_v16 }
 0xfc4   :  { %v6641_v1 = vpop.eup %6640 }
 0xfc5   :  { %v2225_v28 = vmul.f32 %v6641_v1, %v6637_v55 }
 0xfc6   :  { %v6643_v30 = vpop.eup %6642 }
 0xfc7   :  { %v2224_v0 = vmul.f32 %v6643_v30, %v6639_v57 }
 0xfc9   :  { %6302 = vmatprep.mubr.msk.f32.mxu1 %vm385_vm2, %v2224_v0 }
 0xfca   :  { %6303 = vmatmul.mubr.msk.f32.vlgmr.msra.gmra.mxu1 %vm385_vm2, %v2225_v28 }
 0xfcb   :  { %6306 = vmatpush3.msra.mxu1 %v1553_v16 }
 0xfeb   :  { %v2489_v6 = vpop.xlane.xlu1 %2488 }
 0xfec   :  { %v2493_v7 = vsub.f32 %v2479_v59, %v2489_v6  ;;  %v2815_v59 = vld [vmem:[%s7799_s19 + $0x30] sm:$0xff]  ;;  %v5780_v6 = vld [vmem:[%s7796_s16] ss:$0 sm:$0xff] }
 0xfed   :  { %v2492_v8 = vpop.xlane.xlu0 %2491 }
 0xfee   :  { %v2495_v9 = vmul.f32 1.442695, %v2493_v7  ;;  %v2494_v10 = vsub.f32 %v2484_v41, %v2492_v8  ;;  %v2814_v41 = vld [vmem:[%s7799_s19 + $0x28] sm:$0xff] }
 0xff0   :  { %6644 = vpow2.f32 %v2495_v9  ;;  %v2497_v11 = vmul.f32 1.442695, %v2494_v10  ;;  %v2812_v10 = vld [vmem:[%s7799_s19 + $0x18] sm:$0xff] }
 0xff2   :  { %6646 = vpow2.f32 %v2497_v11  ;;  %v2811_v11 = vld [vmem:[%s7799_s19 + $0x10] sm:$0xff] }
 0xffd   :  { %v6645_v12 = vpop.eup %6644 }
 0xffe   :  { %v2499_v13 = vsel %vm385_vm2, %v6645_v12, 0.0 }
 0xfff   :  { %v6647_v14 = vpop.eup %6646  ;;  %2500 = vadd.xlane.f32.xlu0 %v2499_v13  ;;  %v2809_v13 = vld [vmem:[%s7799_s19] sm:$0xff] }
0x1000   :  { %v2502_v15 = vsel %vm385_vm2, %v6647_v14, 0.0 }
0x1001   :  { %2503 = vadd.xlane.f32.xlu1 %v2502_v15 }
0x1012   :  { %2509 = vrot.lane.b32.xlu1 %v7106_v40, %s7843_s3 }
0x1015   :  { %2511 = vrot.lane.b32.xlu0 %v7097_v48, %s7843_s3 }
0x1088   :  { %v2501_v44 = vpop.xlane.xlu0 %2500 }
0x1089   :  { %6648 = vrcp.f32 %v2501_v44 }
0x108a   :  { %v6304_v19 = vpop.f32.mrf.mxu1  ;;  %v2504_v42 = vpop.xlane.xlu1 %2503 }
0x108b   :  { %6650 = vrcp.f32 %v2504_v42 }
0x108c   :  { %v2304_v20 = vpop.f32.mrf.mxu1  ;;  %v2512_v21 = vpop.permute.xlu0 %2511 }
0x108d   :  { %6307 = vmatprep.mubr.msk.f32.mxu1 %vm301_vm1, %v2304_v20  ;;  %6317 = vmatprep.subr.mxu1 %v2512_v21  ;;  %v5786_v20 = vld [vmem:[%s7800_s20] ss:$0 sm:$0xff] }
0x108e   :  { %6308 = vmatmul.mubr.msk.f32.vlgmr.msra.gmra.mxu1 %vm301_vm1, %v6304_v19  ;;  %v2510_v22 = vpop.permute.xlu1 %2509 }
0x108f   :  { %6318 = vmatpush3.msra.mxu1 %v2512_v21 }
0x1090   :  { %6319 = vmatprep.subr.mxu1 %v2510_v22 }
0x1091   :  { %6320 = vmatpush3.msra.mxu1 %v2510_v22 }
0x1092   :  { %6324 = vmatprep.subr.mxu1 %v1554_v27 }
0x1096   :  { %v6649_v23 = vpop.eup %6648 }
0x1097   :  { %v2507_v24 = vmul.f32 %v6649_v23, %v6645_v12  ;;  %v2810_v12 = vld [vmem:[%s7799_s19 + $0x8] sm:$0xff] }
0x1098   :  { %v6651_v25 = vpop.eup %6650 }
0x1099   :  { %6321 = vmatprep.mubr.msk.f32.mxu1 %vm385_vm2, %v2507_v24  ;;  %v2508_v26 = vmul.f32 %v6651_v25, %v6647_v14  ;;  %v5781_v14 = vld [vmem:[%s7798_s18] ss:$0 sm:$0xff] }
0x109b   :  { %6322 = vmatmul.mubr.msk.f32.vlgmr.msra.gmra.mxu1 %vm385_vm2, %v2508_v26 }
0x109c   :  { %6325 = vmatpush3.msra.mxu1 %v1554_v27 }
0x109d   :  { %6340 = vmatprep.subr.mxu1 %v2816_v58 }
0x114e   :  { %v6309_v32 = vpop.f32.mrf.mxu1 }
0x114f   :  { %v2395_v35 = vadd.f32 %v6309_v32, %v2110_v29 }
0x1150   :  { %v2385_v38 = vpop.f32.mrf.mxu1 }
0x1151   :  { %v2394_v39 = vadd.f32 %v2385_v38, %v2105_v34  ;;  %v5792_v34 = vld [vmem:[%s7836_s1 + $0x38] sm:$0xff]  ;;  %v5790_v38 = vld [vmem:[%s7836_s1 + $0x28] sm:$0xff] }
0x115b   :  { %v6323_v33 = vpop.f32.mrf.mxu1 }
0x115d   :  { %v2587_v31 = vpop.f32.mrf.mxu1 }
0x115e   :  { %6326 = vmatprep.mubr.msk.f32.mxu1 %vm301_vm1, %v2587_v31 }
0x115f   :  { %6327 = vmatmul.mubr.msk.f32.vlgmr.msra.gmra.mxu1 %vm301_vm1, %v6323_v33 }
0x1160   :  { %6341 = vmatpush3.msra.mxu1 %v2816_v58 }
0x1161   :  { %6342 = vmatprep.subr.mxu1 %v2815_v59 }
0x1162   :  { %6343 = vmatpush3.msra.mxu1 %v2815_v59 }
0x1163   :  { %6344 = vmatprep.subr.mxu1 %v2814_v41 }
0x1164   :  { %6345 = vmatpush3.msra.mxu1 %v2814_v41  ;;  %v7405_v41 = vld [vmem:[%s7840_s6 + $0x8] sm:$0xff] }
0x1165   :  { %6346 = vmatprep.subr.mxu1 %v2813_v60 }
0x1166   :  { %6347 = vmatpush3.msra.mxu1 %v2813_v60 }
0x1167   :  { %6348 = vmatprep.subr.mxu1 %v2812_v10 }
0x1168   :  { %6349 = vmatpush3.msra.mxu1 %v2812_v10 }
0x1169   :  { %6350 = vmatprep.subr.mxu1 %v2811_v11 }
0x116a   :  { %6351 = vmatpush3.msra.mxu1 %v2811_v11 }
0x116b   :  { %6352 = vmatprep.subr.mxu1 %v2810_v12 }
0x116c   :  { %6353 = vmatpush3.msra.mxu1 %v2810_v12 }
0x116d   :  { %6354 = vmatprep.subr.mxu1 %v2809_v13 }
0x116e   :  { %6355 = vmatpush3.msra.mxu1 %v2809_v13 }
0x121f   :  { %v6328_v43 = vpop.f32.mrf.mxu1 }
0x1220   :  { %v2678_v45 = vadd.f32 %v6328_v43, %v2395_v35  ;;  %v5791_v35 = vld [vmem:[%s7836_s1 + $0x30] sm:$0xff] }
0x1221   :  { %v2668_v47 = vpop.f32.mrf.mxu1 }
0x1222   :  { %v2680_v36 = vadd.f32 %v2678_v45, %v7119_v61  ;;  %v2677_v49 = vadd.f32 %v2668_v47, %v2394_v39  ;;  %v2718_v61 = vld [vmem:[%s7797_s17 + $0x18] sm:$0xff]  ;;  %v5789_v39 = vld [vmem:[%s7836_s1 + $0x20] sm:$0xff] }
0x1223   :  { %6329 = vmatprep.subr.mxu0 %v2718_v61 }
0x1224   :  { %v7290_v37 = vadd.f32 %v5779_v46, %v2680_v36  ;;  %v2679_v50 = vadd.f32 %v2677_v49, %v7122_v63  ;;  %v2717_v63 = vld [vmem:[%s7797_s17 + $0x10] sm:$0xff]  ;;  %6330 = vmatpush3.msra.mxu0 %v2718_v61 }
0x1225   :  { %6331 = vmatprep.subr.mxu0 %v2717_v63 }
0x1226   :  { %v7293_v51 = vadd.f32 %v5779_v46, %v2679_v50  ;;  %v2692_v54 = vmul.f32 %v7290_v37, %v7290_v37  ;;  %6332 = vmatpush3.msra.mxu0 %v2717_v63  ;;  %v5788_v50 = vld [vmem:[%s7837_s5 + $0x1] ss:$0 sm:$0xff]  ;;  %s7850_s5 = smov 40  }
0x1227   :  { %6333 = vmatprep.subr.mxu0 %v2716_v52 }
0x1228   :  { %v2696_v55 = vsel %vm91_vm0, %v2692_v54, 0.0  ;;  %v2691_v56 = vmul.f32 %v7293_v51, %v7293_v51  ;;  %6334 = vmatpush3.msra.mxu0 %v2716_v52 }
0x1229   :  { %2697 = vadd.xlane.f32.xlu0 %v2696_v55  ;;  %6335 = vmatprep.subr.mxu0 %v2715_v53 }
0x122a   :  { %v2693_v57 = vsel %vm91_vm0, %v2691_v56, 0.0  ;;  %6336 = vmatpush3.msra.mxu0 %v2715_v53  ;;  %v5794_v56 = vld [vmem:[%s7839_s30 + $0x1] ss:$0 sm:$0xff] }
0x122b   :  { %2694 = vadd.xlane.f32.xlu1 %v2693_v57  ;;  %6359 = vmatprep.subr.mxu0 %v5792_v34 }
0x12b2   :  { %v2698_v62 = vpop.xlane.xlu0 %2697 }
0x12b3   :  { %v2700_v2 = vmul.f32 0.03125, %v2698_v62 }
0x12b4   :  { %v2695_v3 = vpop.xlane.xlu1 %2694 }
0x12b5   :  { %v2702_v4 = vadd.f32 1e-05, %v2700_v2  ;;  %v2699_v5 = vmul.f32 0.03125, %v2695_v3  ;;  %v7411_v2 = vld [vmem:[%s7840_s6] sm:$0xff]  ;;  %s7844_s6 = smov 64  }
0x12b7   :  { %6652 = vrsqrt.f32 %v2702_v4  ;;  %v2701_v1 = vadd.f32 1e-05, %v2699_v5 }
0x12b9   :  { %6654 = vrsqrt.f32 %v2701_v1 }
0x12c4   :  { %v6653_v30 = vpop.eup %6652 }
0x12c5   :  { %v2706_v28 = vmul.f32 %v6653_v30, %v7290_v37 }
0x12c6   :  { %v6655_v0 = vpop.eup %6654 }
0x12c7   :  { %v2705_v7 = vmul.f32 %v6655_v0, %v7293_v51  ;;  %v2714_v9 = vmul.f32 %v5780_v6, %v2706_v28 }
0x12c9   :  { %v2713_v8 = vmul.f32 %v5780_v6, %v2705_v7 }
0x12cb   :  { %6337 = vmatprep.mubr.msk.f32.mxu0 %vm91_vm0, %v2713_v8 }
0x12cc   :  { %6338 = vmatmul.mubr.msk.f32.vlgmr.msra.gmra.mxu0 %vm91_vm0, %v2714_v9 }
0x12cd   :  { %6360 = vmatpush3.msra.mxu0 %v5792_v34 }
0x12ce   :  { %6361 = vmatprep.subr.mxu0 %v5791_v35 }
0x12cf   :  { %6362 = vmatpush3.msra.mxu0 %v5791_v35 }
0x12d0   :  { %6363 = vmatprep.subr.mxu0 %v5790_v38 }
0x12d1   :  { %6364 = vmatpush3.msra.mxu0 %v5790_v38 }
0x12d2   :  { %6365 = vmatprep.subr.mxu0 %v5789_v39 }
0x12d3   :  { %6366 = vmatpush3.msra.mxu0 %v5789_v39 }
0x138c   :  { %v6339_v15 = vpop.f32.mrf.mxu0 }
0x138d   :  { %v2804_v16 = vadd.f32 %v6339_v15, %v5781_v14 }
0x138e   :  { %v2798_v17 = vpop.f32.mrf.mxu0 }
0x138f   :  { %v2799_v18 = vadd.f32 %v5781_v14, %v2798_v17  ;;  %v2808_v19 = vmax.f32 %v2804_v16, 0.0 }
0x1391   :  { %v2807_v44 = vmax.f32 %v2799_v18, 0.0 }
0x1393   :  { %6356 = vmatprep.mubr.msk.f32.mxu1 %vm2817_vm3, %v2807_v44 }
0x1394   :  { %6357 = vmatmul.mubr.msk.f32.vlgmr.msra.gmra.mxu1 %vm2817_vm3, %v2808_v19 }
0x1454   :  { %v6358_v42 = vpop.f32.mrf.mxu1 }
0x1455   :  { %v2900_v21 = vadd.f32 %v6358_v42, %v7290_v37 }
0x1456   :  { %v2890_v22 = vpop.f32.mrf.mxu1 }
0x1457   :  { %v7353_v23 = vadd.f32 %v5786_v20, %v2900_v21  ;;  %v2899_v24 = vadd.f32 %v2890_v22, %v7293_v51  ;;  %v5797_v22 = vld [vmem:[%s7787_s7 + $0x20] sm:$0xff] }
0x1459   :  { %v7356_v25 = vadd.f32 %v5786_v20, %v2899_v24  ;;  %v2913_v26 = vmul.f32 %v7353_v23, %v7353_v23 }
0x145b   :  { %v2917_v27 = vsel %vm91_vm0, %v2913_v26, 0.0  ;;  %v2912_v29 = vmul.f32 %v7356_v25, %v7356_v25 }
0x145c   :  { %2918 = vadd.xlane.f32.xlu1 %v2917_v27 }
0x145d   :  { %v2914_v32 = vsel %vm91_vm0, %v2912_v29, 0.0 }
0x145e   :  { %2915 = vadd.xlane.f32.xlu0 %v2914_v32 }
0x14e5   :  { %v2919_v33 = vpop.xlane.xlu1 %2918 }
0x14e6   :  { %v2921_v31 = vmul.f32 0.03125, %v2919_v33 }
0x14e7   :  { %v2916_v43 = vpop.xlane.xlu0 %2915 }
0x14e8   :  { %v2923_v45 = vadd.f32 1e-05, %v2921_v31  ;;  %v2920_v46 = vmul.f32 0.03125, %v2916_v43 }
0x14ea   :  { %6656 = vrsqrt.f32 %v2923_v45  ;;  %v2922_v47 = vadd.f32 1e-05, %v2920_v46 }
0x14ec   :  { %6658 = vrsqrt.f32 %v2922_v47 }
0x14f7   :  { %v6657_v36 = vpop.eup %6656 }
0x14f8   :  { %v2927_v37 = vmul.f32 %v6657_v36, %v7353_v23 }
0x14f9   :  { %v6659_v49 = vpop.eup %6658 }
0x14fa   :  { %v2926_v51 = vmul.f32 %v6659_v49, %v7356_v25  ;;  %v2935_v55 = vmul.f32 %v5788_v50, %v2927_v37 }
0x14fc   :  { %v2934_v54 = vmul.f32 %v5788_v50, %v2926_v51 }
0x14fe   :  { %6367 = vmatprep.mubr.msk.f32.mxu0 %vm91_vm0, %v2934_v54 }
0x14ff   :  { %6368 = vmatmul.mubr.msk.f32.vlgmr.msra.gmra.mxu0 %vm91_vm0, %v2935_v55 }
0x15bf   :  { %v6369_v57 = vpop.f32.mrf.mxu0 }
0x15c0   :  { %v7386_v61 = vadd.f32 %v6369_v57, %v5794_v56 }
0x15c1   :  { %v3021_v63 = vpop.f32.mrf.mxu0 }
0x15c2   :  { %v7388_v52 = vadd.f32 %v5794_v56, %v3021_v63  ;;  %3039 = vrot.lane.b32.xlu0 %v7386_v61, %s6763_s4  ;;  %v5798_v56 = vld [vmem:[%s7787_s7 + $0x28] sm:$0xff] }
0x15c4   :  { %3037 = vrot.lane.b32.xlu1 %v7388_v52, %s6763_s4  ;;  %6374 = vmatprep.mubr.msk.f32.mxu0 %vm301_vm1, %v7388_v52 }
0x1634   :  { %v3040_v53 = vpop.permute.xlu0 %3039 }
0x1635   :  { %6370 = vmatprep.subr.msk.mxu0 %vm301_vm1, %v3040_v53 }
0x1636   :  { %6371 = vmatpush3.xpose.msk.msra.mxu0 %vm301_vm1, %v3040_v53  ;;  %v3038_v58 = vpop.permute.xlu1 %3037 }
0x1637   :  { %6372 = vmatprep.subr.msk.mxu0 %vm301_vm1, %v3038_v58 }
0x163a   :  { %6373 = vmatpush3.xpose.msk.msra.mxu0 %vm301_vm1, %v3038_v58 }
0x163d   :  { %6375 = vmatmul.mubr.msk.f32.vlgmr.msra.gmra.mxu0 %vm301_vm1, %v7386_v61 }
0x16fd   :  { %v6376_v59 = vpop.f32.mrf.mxu0 }
0x16fe   :  { %v3121_v60 = vadd.f32 %v7405_v41, %v6376_v59 }
0x16ff   :  { %v3115_v62 = vpop.f32.mrf.mxu0 }
0x1700   :  { %v3116_v3 = vadd.f32 %v7411_v2, %v3115_v62  ;;  %v3127_v4 = vsel %vm385_vm2, %v3121_v60, -inf }
0x1701   :  { %3128 = vmax.xlane.f32.xlu0 %v3127_v4 }
0x1702   :  { %v3124_v5 = vsel %vm385_vm2, %v3116_v3, -inf }
0x1703   :  { %3125 = vmax.xlane.f32.xlu1 %v3124_v5 }
0x178a   :  { %v3129_v1 = vpop.xlane.xlu0 %3128 }
0x178b   :  { %v3131_v30 = vsub.f32 %v3121_v60, %v3129_v1 }
0x178c   :  { %v3126_v0 = vpop.xlane.xlu1 %3125 }
0x178d   :  { %v3134_v28 = vmul.f32 1.442695, %v3131_v30  ;;  %v3130_v6 = vsub.f32 %v3116_v3, %v3126_v0 }
0x178f   :  { %6660 = vpow2.f32 %v3134_v28  ;;  %v3132_v7 = vmul.f32 1.442695, %v3130_v6 }
0x1791   :  { %6662 = vpow2.f32 %v3132_v7 }
0x179c   :  { %v6661_v8 = vpop.eup %6660 }
0x179d   :  { %v3139_v9 = vsel %vm385_vm2, %v6661_v8, 0.0 }
0x179e   :  { %v6663_v10 = vpop.eup %6662  ;;  %3140 = vadd.xlane.f32.xlu1 %v3139_v9 }
0x179f   :  { %v3136_v11 = vsel %vm385_vm2, %v6663_v10, 0.0 }
0x17a0   :  { %3137 = vadd.xlane.f32.xlu0 %v3136_v11 }
0x17af   :  { %3146 = vrot.lane.b32.xlu1 %v7388_v52, %s7844_s6 }
0x17b3   :  { %3239 = vrot.lane.b32.xlu1 %v7386_v61, %s6762_s12 }
0x17b6   :  { %3148 = vrot.lane.b32.xlu0 %v7386_v61, %s7844_s6 }
0x17b7   :  { %3233 = vrot.lane.b32.xlu1 %v7388_v52, %s7845_s26 }
0x17ba   :  { %3237 = vrot.lane.b32.xlu0 %v7388_v52, %s6762_s12 }
0x17be   :  { %3235 = vrot.lane.b32.xlu0 %v7386_v61, %s7845_s26 }
0x1827   :  { %v3141_v12 = vpop.xlane.xlu1 %3140 }
0x1828   :  { %6664 = vrcp.f32 %v3141_v12 }
0x1829   :  { %v3138_v13 = vpop.xlane.xlu0 %3137 }
0x182a   :  { %6666 = vrcp.f32 %v3138_v13 }
0x182b   :  { %v3147_v14 = vpop.permute.xlu1 %3146 }
0x182d   :  { %v3149_v15 = vpop.permute.xlu0 %3148 }
0x182e   :  { %6377 = vmatprep.subr.mxu1 %v3149_v15 }
0x182f   :  { %6378 = vmatpush3.msra.mxu1 %v3149_v15  ;;  %v3240_v16 = vpop.permute.xlu1 %3239 }
0x1830   :  { %6379 = vmatprep.subr.mxu1 %v3147_v14 }
0x1831   :  { %6380 = vmatpush3.msra.mxu1 %v3147_v14  ;;  %v3238_v20 = vpop.permute.xlu0 %3237 }
0x1832   :  { %6384 = vmatprep.subr.msk.mxu1 %vm301_vm1, %v3240_v16 }
0x1833   :  { %v3234_v42 = vpop.permute.xlu1 %3233 }
0x1835   :  { %v6665_v17 = vpop.eup %6664  ;;  %v3236_v21 = vpop.permute.xlu0 %3235 }
0x1836   :  { %v3145_v19 = vmul.f32 %v6665_v17, %v6661_v8 }
0x1837   :  { %v6667_v18 = vpop.eup %6666 }
0x1838   :  { %v3144_v44 = vmul.f32 %v6667_v18, %v6663_v10 }
0x183a   :  { %6381 = vmatprep.mubr.msk.f32.mxu1 %vm385_vm2, %v3144_v44 }
0x183b   :  { %6382 = vmatmul.mubr.msk.f32.vlgmr.msra.gmra.mxu1 %vm385_vm2, %v3145_v19 }
0x183c   :  { %6385 = vmatpush3.xpose.msk.msra.mxu1 %vm301_vm1, %v3240_v16  ;;  %6388 = vmatprep.mubr.msk.f32.mxu1 %vm301_vm1, %v3234_v42 }
0x183d   :  { %6386 = vmatprep.subr.msk.mxu1 %vm301_vm1, %v3238_v20 }
0x1840   :  { %6387 = vmatpush3.xpose.msk.msra.mxu1 %vm301_vm1, %v3238_v20 }
0x1841   :  { %6403 = vmatprep.subr.mxu1 %v5797_v22 }
0x1843   :  { %6389 = vmatmul.mubr.msk.f32.vlgmr.msra.gmra.mxu1 %vm301_vm1, %v3236_v21 }
0x1844   :  { %6404 = vmatpush3.msra.mxu1 %v5797_v22 }
0x18fb   :  { %v6383_v24 = vpop.f32.mrf.mxu1 }
0x18fd   :  { %v3224_v26 = vpop.f32.mrf.mxu1 }
0x18fe   :  { %6405 = vmatprep.mubr.msk.f32.mxu1 %vm301_vm1, %v3224_v26 }
0x18ff   :  { %6406 = vmatmul.mubr.msk.f32.vlgmr.msra.gmra.mxu1 %vm301_vm1, %v6383_v24 }
0x1903   :  { %v6390_v27 = vpop.f32.mrf.mxu1 }
0x1904   :  { %v3321_v29 = vadd.f32 %v7405_v41, %v6390_v27 }
0x1905   :  { %v3315_v32 = vpop.f32.mrf.mxu1 }
0x1906   :  { %v3316_v34 = vadd.f32 %v7411_v2, %v3315_v32  ;;  %v3327_v35 = vsel %vm385_vm2, %v3321_v29, -inf }
0x1907   :  { %3328 = vmax.xlane.f32.xlu0 %v3327_v35 }
0x1908   :  { %v3324_v38 = vsel %vm385_vm2, %v3316_v34, -inf }
0x1909   :  { %3325 = vmax.xlane.f32.xlu1 %v3324_v38 }
0x1990   :  { %v3329_v39 = vpop.xlane.xlu0 %3328 }
0x1991   :  { %v3331_v33 = vsub.f32 %v3321_v29, %v3329_v39 }
0x1992   :  { %v3326_v31 = vpop.xlane.xlu1 %3325 }
0x1993   :  { %v3334_v43 = vmul.f32 1.442695, %v3331_v33  ;;  %v3330_v45 = vsub.f32 %v3316_v34, %v3326_v31 }
0x1995   :  { %6668 = vpow2.f32 %v3334_v43  ;;  %v3332_v46 = vmul.f32 1.442695, %v3330_v45 }
0x1997   :  { %6670 = vpow2.f32 %v3332_v46 }
0x19a2   :  { %v6669_v47 = vpop.eup %6668 }
0x19a3   :  { %v3339_v36 = vsel %vm385_vm2, %v6669_v47, 0.0 }
0x19a4   :  { %v6671_v49 = vpop.eup %6670  ;;  %3340 = vadd.xlane.f32.xlu1 %v3339_v36 }
0x19a5   :  { %v3336_v37 = vsel %vm385_vm2, %v6671_v49, 0.0 }
0x19a6   :  { %3337 = vadd.xlane.f32.xlu0 %v3336_v37 }
0x19b5   :  { %3346 = vrot.lane.b32.xlu1 %v7388_v52, %s7846_s23 }
0x19b9   :  { %3601 = vrot.lane.b32.xlu1 %v7386_v61, %s7842_s25 }
0x19bc   :  { %3348 = vrot.lane.b32.xlu0 %v7386_v61, %s7846_s23 }
0x19bd   :  { %3595 = vrot.lane.b32.xlu1 %v7388_v52, %s7847_s27 }
0x19c0   :  { %3599 = vrot.lane.b32.xlu0 %v7388_v52, %s7842_s25  ;;  %s6776_s25 = smov 8  }
0x19c1   :  { %3884 = vrot.lane.b32.xlu1 %v7386_v61, %s7843_s3 }
0x19c4   :  { %3597 = vrot.lane.b32.xlu0 %v7386_v61, %s7847_s27 }
0x19c5   :  { %3878 = vrot.lane.b32.xlu1 %v7388_v52, %s7848_s0 }
0x19c8   :  { %3882 = vrot.lane.b32.xlu0 %v7388_v52, %s7843_s3  ;;  %s7849_s3 = smov 48  }
0x19cc   :  { %3880 = vrot.lane.b32.xlu0 %v7386_v61, %s7848_s0 }
0x1a2d   :  { %v3341_v50 = vpop.xlane.xlu1 %3340 }
0x1a2e   :  { %6672 = vrcp.f32 %v3341_v50 }
0x1a2f   :  { %v3338_v51 = vpop.xlane.xlu0 %3337 }
0x1a30   :  { %6674 = vrcp.f32 %v3338_v51 }
0x1a31   :  { %v3347_v55 = vpop.permute.xlu1 %3346 }
0x1a33   :  { %v3349_v54 = vpop.permute.xlu0 %3348 }
0x1a34   :  { %6391 = vmatprep.subr.mxu0 %v3349_v54 }
0x1a35   :  { %6392 = vmatpush3.msra.mxu0 %v3349_v54  ;;  %v3602_v59 = vpop.permute.xlu1 %3601 }
0x1a36   :  { %6393 = vmatprep.subr.mxu0 %v3347_v55 }
0x1a37   :  { %6394 = vmatpush3.msra.mxu0 %v3347_v55  ;;  %v3600_v3 = vpop.permute.xlu0 %3599  ;;  %v5799_v55 = vld [vmem:[%s7787_s7 + $0x30] sm:$0xff] }
0x1a38   :  { %6398 = vmatprep.subr.mxu0 %v5798_v56 }
0x1a39   :  { %v3596_v60 = vpop.permute.xlu1 %3595 }
0x1a3b   :  { %v6673_v57 = vpop.eup %6672  ;;  %v3598_v1 = vpop.permute.xlu0 %3597 }
0x1a3c   :  { %v3345_v58 = vmul.f32 %v6673_v57, %v6669_v47 }
0x1a3d   :  { %v6675_v63 = vpop.eup %6674  ;;  %v3885_v5 = vpop.permute.xlu1 %3884 }
0x1a3e   :  { %v3344_v53 = vmul.f32 %v6675_v63, %v6671_v49 }
0x1a3f   :  { %v3883_v0 = vpop.permute.xlu0 %3882 }
0x1a40   :  { %6395 = vmatprep.mubr.msk.f32.mxu0 %vm385_vm2, %v3344_v53 }
0x1a41   :  { %6396 = vmatmul.mubr.msk.f32.vlgmr.msra.gmra.mxu0 %vm385_vm2, %v3345_v58  ;;  %v3879_v30 = vpop.permute.xlu1 %3878 }
0x1a42   :  { %6399 = vmatpush3.msra.mxu0 %v5798_v56  ;;  %v6407_v56 = vpop.f32.mrf.mxu1 }
0x1a43   :  { %6408 = vmatprep.subr.msk.mxu0 %vm301_vm1, %v3602_v59  ;;  %v3881_v28 = vpop.permute.xlu0 %3880 }
0x1a44   :  { %v3586_v57 = vpop.f32.mrf.mxu1 }
0x1b01   :  { %v6397_v62 = vpop.f32.mrf.mxu0 }
0x1b03   :  { %v3424_v4 = vpop.f32.mrf.mxu0 }
0x1b04   :  { %6400 = vmatprep.mubr.msk.f32.mxu0 %vm301_vm1, %v3424_v4 }
0x1b05   :  { %6401 = vmatmul.mubr.msk.f32.vlgmr.msra.gmra.mxu0 %vm301_vm1, %v6397_v62 }
0x1b06   :  { %6409 = vmatpush3.xpose.msk.msra.mxu0 %vm301_vm1, %v3602_v59  ;;  %6412 = vmatprep.mubr.msk.f32.mxu0 %vm301_vm1, %v3596_v60 }
0x1b07   :  { %6410 = vmatprep.subr.msk.mxu0 %vm301_vm1, %v3600_v3 }
0x1b0a   :  { %6411 = vmatpush3.xpose.msk.msra.mxu0 %vm301_vm1, %v3600_v3 }
0x1b0b   :  { %6427 = vmatprep.subr.msk.mxu0 %vm301_vm1, %v3885_v5 }
0x1b0d   :  { %6413 = vmatmul.mubr.msk.f32.vlgmr.msra.gmra.mxu0 %vm301_vm1, %v3598_v1 }
0x1b0e   :  { %6428 = vmatpush3.xpose.msk.msra.mxu0 %vm301_vm1, %v3885_v5  ;;  %6431 = vmatprep.mubr.msk.f32.mxu0 %vm301_vm1, %v3879_v30  ;;  %v5800_v5 = vld [vmem:[%s7787_s7 + $0x38] sm:$0xff]  ;;  %s6774_s7 = smov 24  }
0x1b0f   :  { %6429 = vmatprep.subr.msk.mxu0 %vm301_vm1, %v3883_v0 }
0x1b12   :  { %6430 = vmatpush3.xpose.msk.msra.mxu0 %vm301_vm1, %v3883_v0 }
0x1b15   :  { %6432 = vmatmul.mubr.msk.f32.vlgmr.msra.gmra.mxu0 %vm301_vm1, %v3881_v28 }
0x1bc5   :  { %v7488_v6 = vpop.f32.mrf.mxu0 }
0x1bc6   :  { %v3592_v1 = vadd.f32 %v6407_v56, %v7488_v6 }
0x1bc7   :  { %v7490_v7 = vpop.f32.mrf.mxu0 }
0x1bc8   :  { %v3587_v0 = vadd.f32 %v3586_v57, %v7490_v7  ;;  %v7598_v57 = vld [vmem:[%s7841_s13 + $0x8] sm:$0xff] }
0x1bcd   :  { %v6414_v8 = vpop.f32.mrf.mxu0 }
0x1bce   :  { %v3683_v9 = vadd.f32 %v7405_v41, %v6414_v8 }
0x1bcf   :  { %v3677_v10 = vpop.f32.mrf.mxu0 }
0x1bd0   :  { %v3678_v11 = vadd.f32 %v7411_v2, %v3677_v10  ;;  %v3689_v12 = vsel %vm385_vm2, %v3683_v9, -inf }
0x1bd1   :  { %3690 = vmax.xlane.f32.xlu0 %v3689_v12 }
0x1bd2   :  { %v3686_v13 = vsel %vm385_vm2, %v3678_v11, -inf }
0x1bd3   :  { %3687 = vmax.xlane.f32.xlu1 %v3686_v13 }
0x1bd5   :  { %v6433_v22 = vpop.f32.mrf.mxu0 }
0x1bd6   :  { %v3966_v27 = vadd.f32 %v7405_v41, %v6433_v22  ;;  %v5837_v22 = vld [vmem:[%s7790_s10 + $0x20] sm:$0xff] }
0x1bd7   :  { %v3960_v24 = vpop.f32.mrf.mxu0 }
0x1bd8   :  { %v3961_v26 = vadd.f32 %v7411_v2, %v3960_v24  ;;  %v3972_v32 = vsel %vm385_vm2, %v3966_v27, -inf }
0x1bda   :  { %v3969_v29 = vsel %vm385_vm2, %v3961_v26, -inf }
0x1c5a   :  { %v3691_v14 = vpop.xlane.xlu0 %3690 }
0x1c5b   :  { %v3693_v15 = vsub.f32 %v3683_v9, %v3691_v14  ;;  %v5834_v14 = vld [vmem:[%s7788_s8 + $0x1] ss:$0 sm:$0xff]  ;;  %s6775_s8 = smov 16  }
0x1c5c   :  { %v3688_v16 = vpop.xlane.xlu1 %3687 }
0x1c5d   :  { %v3696_v17 = vmul.f32 1.442695, %v3693_v15  ;;  %v3692_v18 = vsub.f32 %v3678_v11, %v3688_v16 }
0x1c5f   :  { %6676 = vpow2.f32 %v3696_v17  ;;  %v3694_v44 = vmul.f32 1.442695, %v3692_v18 }
0x1c61   :  { %6678 = vpow2.f32 %v3694_v44 }
0x1c6c   :  { %v6677_v19 = vpop.eup %6676 }
0x1c6d   :  { %v3701_v42 = vsel %vm385_vm2, %v6677_v19, 0.0 }
0x1c6e   :  { %v6679_v20 = vpop.eup %6678  ;;  %3702 = vadd.xlane.f32.xlu1 %v3701_v42 }
0x1c6f   :  { %v3698_v21 = vsel %vm385_vm2, %v6679_v20, 0.0 }
0x1c70   :  { %3699 = vadd.xlane.f32.xlu0 %v3698_v21  ;;  %v5838_v21 = vld [vmem:[%s7790_s10 + $0x28] sm:$0xff] }
0x1c7f   :  { %3708 = vrot.lane.b32.xlu1 %v7388_v52, %s7849_s3 }
0x1c86   :  { %3710 = vrot.lane.b32.xlu0 %v7386_v61, %s7849_s3 }
0x1ca3   :  { %3970 = vmax.xlane.f32.xlu1 %v3969_v29 }
0x1ca5   :  { %3973 = vmax.xlane.f32.xlu0 %v3972_v32 }
0x1cf7   :  { %v3703_v34 = vpop.xlane.xlu1 %3702 }
0x1cf8   :  { %6680 = vrcp.f32 %v3703_v34 }
0x1cf9   :  { %v3700_v35 = vpop.xlane.xlu0 %3699 }
0x1cfa   :  { %6682 = vrcp.f32 %v3700_v35 }
0x1cfb   :  { %v3709_v39 = vpop.permute.xlu1 %3708 }
0x1cfd   :  { %v3711_v38 = vpop.permute.xlu0 %3710 }
0x1cfe   :  { %6415 = vmatprep.subr.mxu1 %v3711_v38 }
0x1cff   :  { %6416 = vmatpush3.msra.mxu1 %v3711_v38 }
0x1d00   :  { %6417 = vmatprep.subr.mxu1 %v3709_v39 }
0x1d01   :  { %6418 = vmatpush3.msra.mxu1 %v3709_v39 }
0x1d02   :  { %6422 = vmatprep.subr.mxu1 %v5799_v55 }
0x1d05   :  { %v6681_v33 = vpop.eup %6680 }
0x1d06   :  { %v3707_v41 = vmul.f32 %v6681_v33, %v6677_v19 }
0x1d07   :  { %v6683_v2 = vpop.eup %6682 }
0x1d08   :  { %v3706_v31 = vmul.f32 %v6683_v2, %v6679_v20 }
0x1d0a   :  { %6419 = vmatprep.mubr.msk.f32.mxu1 %vm385_vm2, %v3706_v31 }
0x1d0b   :  { %6420 = vmatmul.mubr.msk.f32.vlgmr.msra.gmra.mxu1 %vm385_vm2, %v3707_v41  ;;  %v5836_v41 = vld [vmem:[%s7789_s9 + $0x1] ss:$0 sm:$0xff] }
0x1d0c   :  { %6423 = vmatpush3.msra.mxu1 %v5799_v55 }
0x1d2c   :  { %v3971_v43 = vpop.xlane.xlu1 %3970 }
0x1d2d   :  { %v3975_v45 = vsub.f32 %v3961_v26, %v3971_v43 }
0x1d2e   :  { %v3974_v46 = vpop.xlane.xlu0 %3973 }
0x1d2f   :  { %v3977_v47 = vmul.f32 1.442695, %v3975_v45  ;;  %v3976_v36 = vsub.f32 %v3966_v27, %v3974_v46 }
0x1d31   :  { %6684 = vpow2.f32 %v3977_v47  ;;  %v3979_v49 = vmul.f32 1.442695, %v3976_v36  ;;  %v5842_v47 = vld [vmem:[%s7791_s11 + $0x1] ss:$0 sm:$0xff] }
0x1d33   :  { %6686 = vpow2.f32 %v3979_v49 }
0x1d3e   :  { %v6685_v37 = vpop.eup %6684 }
0x1d3f   :  { %v3981_v50 = vsel %vm385_vm2, %v6685_v37, 0.0 }
0x1d40   :  { %v6687_v51 = vpop.eup %6686  ;;  %3982 = vadd.xlane.f32.xlu0 %v3981_v50 }
0x1d41   :  { %v3984_v54 = vsel %vm385_vm2, %v6687_v51, 0.0 }
0x1d42   :  { %3985 = vadd.xlane.f32.xlu1 %v3984_v54 }
0x1d53   :  { %3991 = vrot.lane.b32.xlu1 %v7388_v52, %s7850_s5 }
0x1d56   :  { %3993 = vrot.lane.b32.xlu0 %v7386_v61, %s7850_s5 }
0x1dc9   :  { %v3983_v63 = vpop.xlane.xlu0 %3982 }
0x1dca   :  { %6688 = vrcp.f32 %v3983_v63 }
0x1dcb   :  { %v6421_v53 = vpop.f32.mrf.mxu1  ;;  %v3986_v58 = vpop.xlane.xlu1 %3985 }
0x1dcc   :  { %6690 = vrcp.f32 %v3986_v58  ;;  %v7604_v58 = vld [vmem:[%s7841_s13] sm:$0xff]  ;;  %s6773_s13 = smov 32  }
0x1dcd   :  { %v3786_v59 = vpop.f32.mrf.mxu1  ;;  %v3994_v60 = vpop.permute.xlu0 %3993 }
0x1dce   :  { %6424 = vmatprep.mubr.msk.f32.mxu1 %vm301_vm1, %v3786_v59  ;;  %6434 = vmatprep.subr.mxu1 %v3994_v60 }
0x1dcf   :  { %6425 = vmatmul.mubr.msk.f32.vlgmr.msra.gmra.mxu1 %vm301_vm1, %v6421_v53  ;;  %v3992_v62 = vpop.permute.xlu1 %3991 }
0x1dd0   :  { %6435 = vmatpush3.msra.mxu1 %v3994_v60 }
0x1dd1   :  { %6436 = vmatprep.subr.mxu1 %v3992_v62 }
0x1dd2   :  { %6437 = vmatpush3.msra.mxu1 %v3992_v62 }
0x1dd3   :  { %6441 = vmatprep.subr.mxu1 %v5800_v5 }
0x1dd7   :  { %v6689_v52 = vpop.eup %6688 }
0x1dd8   :  { %v3989_v61 = vmul.f32 %v6689_v52, %v6685_v37 }
0x1dd9   :  { %v6691_v3 = vpop.eup %6690 }
0x1dda   :  { %6438 = vmatprep.mubr.msk.f32.mxu1 %vm385_vm2, %v3989_v61  ;;  %v3990_v4 = vmul.f32 %v6691_v3, %v6687_v51 }
0x1ddc   :  { %6439 = vmatmul.mubr.msk.f32.vlgmr.msra.gmra.mxu1 %vm385_vm2, %v3990_v4 }
0x1ddd   :  { %6442 = vmatpush3.msra.mxu1 %v5800_v5 }
0x1e8f   :  { %v6426_v30 = vpop.f32.mrf.mxu1 }
0x1e90   :  { %v3877_v28 = vadd.f32 %v6426_v30, %v3592_v1 }
0x1e91   :  { %v3867_v8 = vpop.f32.mrf.mxu1 }
0x1e92   :  { %v3876_v9 = vadd.f32 %v3867_v8, %v3587_v0 }
0x1e9c   :  { %v6440_v10 = vpop.f32.mrf.mxu1 }
0x1e9e   :  { %v4069_v11 = vpop.f32.mrf.mxu1 }
0x1e9f   :  { %6443 = vmatprep.mubr.msk.f32.mxu1 %vm301_vm1, %v4069_v11 }
0x1ea0   :  { %6444 = vmatmul.mubr.msk.f32.vlgmr.msra.gmra.mxu1 %vm301_vm1, %v6440_v10 }
0x1f60   :  { %v6445_v12 = vpop.f32.mrf.mxu1 }
0x1f61   :  { %v4160_v13 = vadd.f32 %v6445_v12, %v3877_v28 }
0x1f62   :  { %v4150_v15 = vpop.f32.mrf.mxu1 }
0x1f63   :  { %v4162_v6 = vadd.f32 %v4160_v13, %v7353_v23  ;;  %v4159_v16 = vadd.f32 %v4150_v15, %v3876_v9  ;;  %v5840_v23 = vld [vmem:[%s7790_s10 + $0x38] sm:$0xff] }
0x1f64   :  { %6446 = vmatprep.subr.mxu0 %v5840_v23 }
0x1f65   :  { %v7532_v7 = vadd.f32 %v5834_v14, %v4162_v6  ;;  %v4161_v17 = vadd.f32 %v4159_v16, %v7356_v25  ;;  %v5839_v25 = vld [vmem:[%s7790_s10 + $0x30] sm:$0xff]  ;;  %6447 = vmatpush3.msra.mxu0 %v5840_v23 }
0x1f66   :  { %6448 = vmatprep.subr.mxu0 %v5839_v25 }
0x1f67   :  { %v7535_v18 = vadd.f32 %v5834_v14, %v4161_v17  ;;  %v4176_v44 = vmul.f32 %v7532_v7, %v7532_v7  ;;  %6449 = vmatpush3.msra.mxu0 %v5839_v25 }
0x1f68   :  { %6450 = vmatprep.subr.mxu0 %v5838_v21 }
0x1f69   :  { %v4180_v19 = vsel %vm91_vm0, %v4176_v44, 0.0  ;;  %v4175_v42 = vmul.f32 %v7535_v18, %v7535_v18  ;;  %6451 = vmatpush3.msra.mxu0 %v5838_v21 }
0x1f6a   :  { %4181 = vadd.xlane.f32.xlu0 %v4180_v19  ;;  %6452 = vmatprep.subr.mxu0 %v5837_v22 }
0x1f6b   :  { %v4177_v20 = vsel %vm91_vm0, %v4175_v42, 0.0  ;;  %6453 = vmatpush3.msra.mxu0 %v5837_v22 }
0x1f6c   :  { %4178 = vadd.xlane.f32.xlu1 %v4177_v20 }
0x1f7d   :  { %4298 = vrot.lane.b32.xlu1 %v7106_v40, %s7844_s6 }
0x1f80   :  { %4300 = vrot.lane.b32.xlu0 %v7097_v48, %s7844_s6 }
0x1f81   :  { %4502 = vrot.lane.b32.xlu1 %v7097_v48, %s7846_s23 }
0x1f84   :  { %4500 = vrot.lane.b32.xlu0 %v7106_v40, %s7846_s23  ;;  %s6777_s23 = smov [#allocation2]  }
0x1f85   :  { %s5692_s4 = sshll.u32 %s6777_s23, 4  ;;  %s5693_s4 = int_to_ptr.vmem [resolvable:$true] %s5692_s4 }
0x1f86   :  { %s6740_s9 = scalar_lea.vmem %s5693_s4, 256  ;;  %p6745_p1 = scmp.lt.s32.totalorder %s5693_s4, %s5693_s4 }
0x1f87   :  { %p6741_p0 = scmp.ne.s32.totalorder %s5693_s4, %s6740_s9  ;;  %p6746_p2 = scmp.lt.s32.totalorder %s6740_s9, %s6740_s9 }
0x1f89   :  { %p6747_p3 = por %p6746_p2, %p6745_p1 }
0x1f8b   :  { %p6748_p4 = pnand %p6747_p3, %p6741_p0 }
0x1ff3   :  { %v4182_v24 = vpop.xlane.xlu0 %4181 }
0x1ff4   :  { %v4184_v26 = vmul.f32 0.03125, %v4182_v24 }
0x1ff5   :  { %v4179_v27 = vpop.xlane.xlu1 %4178 }
0x1ff6   :  { %v4186_v29 = vadd.f32 1e-05, %v4184_v26  ;;  %v4183_v32 = vmul.f32 0.03125, %v4179_v27 }
0x1ff7   :  { %v4301_v34 = vpop.permute.xlu0 %4300 }
0x1ff8   :  { %6692 = vrsqrt.f32 %v4186_v29  ;;  %v4185_v35 = vadd.f32 1e-05, %v4183_v32  ;;  %6457 = vmatprep.subr.msk.mxu1 %vm301_vm1, %v4301_v34 }
0x1ff9   :  { %6458 = vmatpush3.xpose.msk.msra.mxu1 %vm301_vm1, %v4301_v34  ;;  %v4299_v38 = vpop.permute.xlu1 %4298 }
0x1ffa   :  { %6694 = vrsqrt.f32 %v4185_v35  ;;  %6459 = vmatprep.subr.msk.mxu1 %vm301_vm1, %v4299_v38  ;;  %v5845_v35 = vld [vmem:[%s7794_s14 + $0x20] sm:$0xff] }
0x1ffb   :  { %v4501_v51 = vpop.permute.xlu0 %4500 }
0x1ffd   :  { %6460 = vmatpush3.xpose.msk.msra.mxu1 %vm301_vm1, %v4299_v38  ;;  %v4503_v39 = vpop.permute.xlu1 %4502 }
0x1ffe   :  { %6471 = vmatprep.subr.msk.mxu1 %vm301_vm1, %v4503_v39 }
0x2005   :  { %v6693_v33 = vpop.eup %6692 }
0x2006   :  { %v4190_v31 = vmul.f32 %v6693_v33, %v7532_v7 }
0x2007   :  { %v6695_v2 = vpop.eup %6694 }
0x2008   :  { %v4189_v43 = vmul.f32 %v6695_v2, %v7535_v18  ;;  %v4198_v46 = vmul.f32 %v5836_v41, %v4190_v31  ;;  %v5846_v31 = vld [vmem:[%s7794_s14 + $0x28] sm:$0xff] }
0x200a   :  { %v4197_v45 = vmul.f32 %v5836_v41, %v4189_v43 }
0x200c   :  { %6454 = vmatprep.mubr.msk.f32.mxu0 %vm91_vm0, %v4197_v45 }
0x200d   :  { %6455 = vmatmul.mubr.msk.f32.vlgmr.msra.gmra.mxu0 %vm91_vm0, %v4198_v46 }
0x20cd   :  { %v6456_v36 = vpop.f32.mrf.mxu0 }
0x20ce   :  { %v7578_v49 = vadd.f32 %v6456_v36, %v5842_v47 }
0x20cf   :  { %v4284_v37 = vpop.f32.mrf.mxu0 }
0x20d0   :  { %v7580_v50 = vadd.f32 %v5842_v47, %v4284_v37  ;;  %4498 = vrot.lane.b32.xlu0 %v7578_v49, %s7845_s26 }
0x20d2   :  { %4496 = vrot.lane.b32.xlu1 %v7580_v50, %s7845_s26  ;;  %6461 = vmatprep.mubr.msk.f32.mxu1 %vm301_vm1, %v7580_v50 }
0x20d3   :  { %6462 = vmatmul.mubr.msk.f32.vlgmr.msra.gmra.mxu1 %vm301_vm1, %v7578_v49 }
0x20d4   :  { %6472 = vmatpush3.xpose.msk.msra.mxu1 %vm301_vm1, %v4503_v39 }
0x20d5   :  { %6473 = vmatprep.subr.msk.mxu1 %vm301_vm1, %v4501_v51 }
0x20d8   :  { %6474 = vmatpush3.xpose.msk.msra.mxu1 %vm301_vm1, %v4501_v51 }
0x20d9   :  { %6490 = vmatprep.subr.mxu1 %v5845_v35 }
0x2142   :  { %v4499_v55 = vpop.permute.xlu0 %4498 }
0x2144   :  { %v4497_v54 = vpop.permute.xlu1 %4496 }
0x2145   :  { %6475 = vmatprep.mubr.msk.f32.mxu1 %vm301_vm1, %v4497_v54 }
0x2146   :  { %6476 = vmatmul.mubr.msk.f32.vlgmr.msra.gmra.mxu1 %vm301_vm1, %v4499_v55 }
0x2147   :  { %6491 = vmatpush3.msra.mxu1 %v5845_v35 }
0x2193   :  { %v6463_v56 = vpop.f32.mrf.mxu1 }
0x2194   :  { %v4384_v63 = vadd.f32 %v7598_v57, %v6463_v56 }
0x2195   :  { %v4378_v53 = vpop.f32.mrf.mxu1 }
0x2196   :  { %v4379_v59 = vadd.f32 %v7604_v58, %v4378_v53  ;;  %v4390_v60 = vsel %vm385_vm2, %v4384_v63, -inf }
0x2197   :  { %4391 = vmax.xlane.f32.xlu0 %v4390_v60 }
0x2198   :  { %v4387_v62 = vsel %vm385_vm2, %v4379_v59, -inf }
0x2199   :  { %4388 = vmax.xlane.f32.xlu1 %v4387_v62 }
0x2206   :  { %v6477_v52 = vpop.f32.mrf.mxu1 }
0x2207   :  { %v4584_v61 = vadd.f32 %v7598_v57, %v6477_v52 }
0x2208   :  { %v4578_v3 = vpop.f32.mrf.mxu1 }
0x2209   :  { %v4579_v4 = vadd.f32 %v7604_v58, %v4578_v3  ;;  %v4590_v5 = vsel %vm385_vm2, %v4584_v61, -inf }
0x220a   :  { %4591 = vmax.xlane.f32.xlu1 %v4590_v5 }
0x220b   :  { %v4587_v1 = vsel %vm385_vm2, %v4579_v4, -inf }
0x220c   :  { %4588 = vmax.xlane.f32.xlu0 %v4587_v1 }
0x221b   :  { %4409 = vrot.lane.b32.xlu1 %v7106_v40, %s6773_s13 }
0x2220   :  { %v4392_v30 = vpop.xlane.xlu0 %4391 }
0x2221   :  { %v4394_v28 = vsub.f32 %v4384_v63, %v4392_v30 }
0x2222   :  { %4411 = vrot.lane.b32.xlu0 %v7097_v48, %s6773_s13  ;;  %v4389_v0 = vpop.xlane.xlu1 %4388 }
0x2223   :  { %v4393_v8 = vsub.f32 %v4379_v59, %v4389_v0  ;;  %v4397_v9 = vmul.f32 1.442695, %v4394_v28 }
0x2225   :  { %v4395_v10 = vmul.f32 1.442695, %v4393_v8  ;;  %6696 = vpow2.f32 %v4397_v9 }
0x2227   :  { %6698 = vpow2.f32 %v4395_v10 }
0x2232   :  { %v6697_v11 = vpop.eup %6696 }
0x2233   :  { %v4402_v13 = vsel %vm385_vm2, %v6697_v11, 0.0 }
0x2234   :  { %v6699_v12 = vpop.eup %6698 }
0x2235   :  { %v4399_v14 = vsel %vm385_vm2, %v6699_v12, 0.0 }
0x223f   :  { %4403 = vadd.xlane.f32.xlu1 %v4402_v13 }
0x2241   :  { %4400 = vadd.xlane.f32.xlu0 %v4399_v14 }
0x2293   :  { %v4592_v15 = vpop.xlane.xlu1 %4591 }
0x2294   :  { %v4594_v6 = vsub.f32 %v4584_v61, %v4592_v15 }
0x2295   :  { %v4589_v16 = vpop.xlane.xlu0 %4588 }
0x2296   :  { %v4597_v17 = vmul.f32 1.442695, %v4594_v6  ;;  %v4593_v44 = vsub.f32 %v4579_v4, %v4589_v16 }
0x2297   :  { %v4410_v20 = vpop.permute.xlu1 %4409 }
0x2298   :  { %6700 = vpow2.f32 %v4597_v17  ;;  %v4595_v19 = vmul.f32 1.442695, %v4593_v44 }
0x2299   :  { %v4412_v42 = vpop.permute.xlu0 %4411 }
0x229a   :  { %6702 = vpow2.f32 %v4595_v19  ;;  %6464 = vmatprep.subr.mxu0 %v4412_v42 }
0x229b   :  { %6465 = vmatpush3.msra.mxu0 %v4412_v42 }
0x229c   :  { %6466 = vmatprep.subr.mxu0 %v4410_v20 }
0x229d   :  { %6467 = vmatpush3.msra.mxu0 %v4410_v20 }
0x22a5   :  { %v6701_v23 = vpop.eup %6700 }
0x22a6   :  { %v4602_v25 = vsel %vm385_vm2, %v6701_v23, 0.0 }
0x22a7   :  { %v6703_v21 = vpop.eup %6702  ;;  %4603 = vadd.xlane.f32.xlu1 %v4602_v25 }
0x22a8   :  { %v4599_v22 = vsel %vm385_vm2, %v6703_v21, 0.0 }
0x22a9   :  { %4600 = vadd.xlane.f32.xlu0 %v4599_v22 }
0x22b8   :  { %4611 = vrot.lane.b32.xlu1 %v7097_v48, %s6774_s7 }
0x22bc   :  { %4864 = vrot.lane.b32.xlu1 %v7097_v48, %s7849_s3 }
0x22bf   :  { %4609 = vrot.lane.b32.xlu0 %v7106_v40, %s6774_s7 }
0x22c0   :  { %4858 = vrot.lane.b32.xlu1 %v7580_v50, %s7847_s27 }
0x22c3   :  { %4862 = vrot.lane.b32.xlu0 %v7106_v40, %s7849_s3 }
0x22c4   :  { %5147 = vrot.lane.b32.xlu1 %v7097_v48, %s7850_s5 }
0x22c7   :  { %4860 = vrot.lane.b32.xlu0 %v7578_v49, %s7847_s27 }
0x22c8   :  { %5141 = vrot.lane.b32.xlu1 %v7580_v50, %s7848_s0  ;;  %v4404_v24 = vpop.xlane.xlu1 %4403 }
0x22c9   :  { %6704 = vrcp.f32 %v4404_v24 }
0x22ca   :  { %v4401_v26 = vpop.xlane.xlu0 %4400 }
0x22cb   :  { %6706 = vrcp.f32 %v4401_v26  ;;  %5145 = vrot.lane.b32.xlu0 %v7106_v40, %s7850_s5 }
0x22cf   :  { %5143 = vrot.lane.b32.xlu0 %v7578_v49, %s7848_s0 }
0x22d6   :  { %v6705_v27 = vpop.eup %6704 }
0x22d7   :  { %v4408_v34 = vmul.f32 %v6705_v27, %v6697_v11 }
0x22d8   :  { %v6707_v29 = vpop.eup %6706 }
0x22d9   :  { %v4407_v32 = vmul.f32 %v6707_v29, %v6699_v12 }
0x22db   :  { %6468 = vmatprep.mubr.msk.f32.mxu0 %vm385_vm2, %v4407_v32 }
0x22dc   :  { %6469 = vmatmul.mubr.msk.f32.vlgmr.msra.gmra.mxu0 %vm385_vm2, %v4408_v34 }
0x2330   :  { %v4604_v38 = vpop.xlane.xlu1 %4603 }
0x2331   :  { %6708 = vrcp.f32 %v4604_v38 }
0x2332   :  { %v4601_v39 = vpop.xlane.xlu0 %4600 }
0x2333   :  { %6710 = vrcp.f32 %v4601_v39 }
0x2334   :  { %v4612_v33 = vpop.permute.xlu1 %4611 }
0x2335   :  { %6478 = vmatprep.subr.mxu0 %v4612_v33 }
0x2336   :  { %v4610_v2 = vpop.permute.xlu0 %4609  ;;  %6479 = vmatpush3.msra.mxu0 %v4612_v33 }
0x2337   :  { %6480 = vmatprep.subr.mxu0 %v4610_v2 }
0x2338   :  { %6481 = vmatpush3.msra.mxu0 %v4610_v2  ;;  %v4865_v47 = vpop.permute.xlu1 %4864  ;;  %v5847_v2 = vld [vmem:[%s7794_s14 + $0x30] sm:$0xff] }
0x2339   :  { %6485 = vmatprep.subr.mxu0 %v5846_v31 }
0x233a   :  { %v4863_v51 = vpop.permute.xlu0 %4862 }
0x233c   :  { %v4859_v37 = vpop.permute.xlu1 %4858 }
0x233e   :  { %v6709_v41 = vpop.eup %6708  ;;  %v4861_v56 = vpop.permute.xlu0 %4860 }
0x233f   :  { %v4608_v46 = vmul.f32 %v6709_v41, %v6701_v23 }
0x2340   :  { %v6711_v43 = vpop.eup %6710  ;;  %v5148_v55 = vpop.permute.xlu1 %5147 }
0x2341   :  { %v4607_v45 = vmul.f32 %v6711_v43, %v6703_v21 }
0x2342   :  { %v5146_v53 = vpop.permute.xlu0 %5145 }
0x2343   :  { %6482 = vmatprep.mubr.msk.f32.mxu0 %vm385_vm2, %v4607_v45 }
0x2344   :  { %6483 = vmatmul.mubr.msk.f32.vlgmr.msra.gmra.mxu0 %vm385_vm2, %v4608_v46  ;;  %v5142_v63 = vpop.permute.xlu1 %5141 }
0x2345   :  { %6486 = vmatpush3.msra.mxu0 %v5846_v31 }
0x2346   :  { %6495 = vmatprep.subr.msk.mxu0 %vm301_vm1, %v4865_v47  ;;  %v5144_v59 = vpop.permute.xlu0 %5143 }
0x239c   :  { %v6470_v36 = vpop.f32.mrf.mxu0 }
0x239e   :  { %v4487_v49 = vpop.f32.mrf.mxu0 }
0x239f   :  { %6492 = vmatprep.mubr.msk.f32.mxu1 %vm301_vm1, %v4487_v49 }
0x23a0   :  { %6493 = vmatmul.mubr.msk.f32.vlgmr.msra.gmra.mxu1 %vm301_vm1, %v6470_v36 }
0x2404   :  { %v6484_v50 = vpop.f32.mrf.mxu0 }
0x2406   :  { %v4687_v54 = vpop.f32.mrf.mxu0 }
0x2407   :  { %6487 = vmatprep.mubr.msk.f32.mxu0 %vm301_vm1, %v4687_v54 }
0x2408   :  { %6488 = vmatmul.mubr.msk.f32.vlgmr.msra.gmra.mxu0 %vm301_vm1, %v6484_v50 }
0x2409   :  { %6496 = vmatpush3.xpose.msk.msra.mxu0 %vm301_vm1, %v4865_v47  ;;  %6499 = vmatprep.mubr.msk.f32.mxu0 %vm301_vm1, %v4859_v37 }
0x240a   :  { %6497 = vmatprep.subr.msk.mxu0 %vm301_vm1, %v4863_v51 }
0x240d   :  { %6498 = vmatpush3.xpose.msk.msra.mxu0 %vm301_vm1, %v4863_v51  ;;  %v5848_v51 = vld [vmem:[%s7794_s14 + $0x38] sm:$0xff] }
0x240e   :  { %6514 = vmatprep.subr.msk.mxu0 %vm301_vm1, %v5148_v55 }
0x2410   :  { %6500 = vmatmul.mubr.msk.f32.vlgmr.msra.gmra.mxu0 %vm301_vm1, %v4861_v56 }
0x2411   :  { %6515 = vmatpush3.xpose.msk.msra.mxu0 %vm301_vm1, %v5148_v55  ;;  %6518 = vmatprep.mubr.msk.f32.mxu0 %vm301_vm1, %v5142_v63 }
0x2412   :  { %6516 = vmatprep.subr.msk.mxu0 %vm301_vm1, %v5146_v53 }
0x2415   :  { %6517 = vmatpush3.xpose.msk.msra.mxu0 %vm301_vm1, %v5146_v53 }
0x2418   :  { %6519 = vmatmul.mubr.msk.f32.vlgmr.msra.gmra.mxu0 %vm301_vm1, %v5144_v59 }
0x2460   :  { %v6494_v31 = vpop.f32.mrf.mxu1 }
0x2462   :  { %v4849_v41 = vpop.f32.mrf.mxu1 }
0x24c8   :  { %v7663_v60 = vpop.f32.mrf.mxu0 }
0x24c9   :  { %v4855_v54 = vadd.f32 %v6494_v31, %v7663_v60 }
0x24ca   :  { %v7665_v62 = vpop.f32.mrf.mxu0 }
0x24cb   :  { %v4850_v56 = vadd.f32 %v4849_v41, %v7665_v62 }
0x24d0   :  { %v6501_v52 = vpop.f32.mrf.mxu0 }
0x24d1   :  { %v4946_v61 = vadd.f32 %v7598_v57, %v6501_v52 }
0x24d2   :  { %v4940_v3 = vpop.f32.mrf.mxu0 }
0x24d3   :  { %v4941_v4 = vadd.f32 %v7604_v58, %v4940_v3  ;;  %v4952_v5 = vsel %vm385_vm2, %v4946_v61, -inf }
0x24d4   :  { %4953 = vmax.xlane.f32.xlu0 %v4952_v5  ;;  %v5882_v5 = vld [vmem:[%s7795_s15 + $0x1] ss:$0 sm:$0xff] }
0x24d5   :  { %v4949_v1 = vsel %vm385_vm2, %v4941_v4, -inf }
0x24d6   :  { %4950 = vmax.xlane.f32.xlu1 %v4949_v1 }
0x24d8   :  { %v6520_v15 = vpop.f32.mrf.mxu0 }
0x24d9   :  { %v5229_v17 = vadd.f32 %v7598_v57, %v6520_v15  ;;  %v5899_v15 = vld [vmem:[%s7799_s19 + $0x70] sm:$0xff] }
0x24da   :  { %v5223_v6 = vpop.f32.mrf.mxu0 }
0x24db   :  { %v5224_v16 = vadd.f32 %v7604_v58, %v5223_v6  ;;  %v5235_v19 = vsel %vm385_vm2, %v5229_v17, -inf  ;;  %v5898_v6 = vld [vmem:[%s7799_s19 + $0x68] sm:$0xff] }
0x24dd   :  { %v5232_v44 = vsel %vm385_vm2, %v5224_v16, -inf }
0x255d   :  { %v4954_v30 = vpop.xlane.xlu0 %4953 }
0x255e   :  { %v4956_v0 = vsub.f32 %v4946_v61, %v4954_v30 }
0x255f   :  { %v4951_v28 = vpop.xlane.xlu1 %4950 }
0x2560   :  { %v4959_v8 = vmul.f32 1.442695, %v4956_v0  ;;  %v4955_v9 = vsub.f32 %v4941_v4, %v4951_v28 }
0x2562   :  { %6712 = vpow2.f32 %v4959_v8  ;;  %v4957_v10 = vmul.f32 1.442695, %v4955_v9 }
0x2564   :  { %6714 = vpow2.f32 %v4957_v10 }
0x256f   :  { %v6713_v11 = vpop.eup %6712 }
0x2570   :  { %v4964_v12 = vsel %vm385_vm2, %v6713_v11, 0.0 }
0x2571   :  { %v6715_v13 = vpop.eup %6714  ;;  %4965 = vadd.xlane.f32.xlu1 %v4964_v12  ;;  %v5886_v12 = vld [vmem:[%s7797_s17 + $0x28] sm:$0xff] }
0x2572   :  { %v4961_v14 = vsel %vm385_vm2, %v6715_v13, 0.0 }
0x2573   :  { %4962 = vadd.xlane.f32.xlu0 %v4961_v14  ;;  %v5900_v14 = vld [vmem:[%s7799_s19 + $0x78] sm:$0xff] }
0x2582   :  { %4971 = vrot.lane.b32.xlu1 %v7106_v40, %s6775_s8 }
0x2589   :  { %4973 = vrot.lane.b32.xlu0 %v7097_v48, %s6775_s8 }
0x25a6   :  { %5233 = vmax.xlane.f32.xlu1 %v5232_v44 }
0x25a8   :  { %5236 = vmax.xlane.f32.xlu0 %v5235_v19 }
0x25fa   :  { %v4966_v42 = vpop.xlane.xlu1 %4965 }
0x25fb   :  { %6716 = vrcp.f32 %v4966_v42 }
0x25fc   :  { %v4963_v20 = vpop.xlane.xlu0 %4962 }
0x25fd   :  { %6718 = vrcp.f32 %v4963_v20 }
0x25fe   :  { %v4972_v25 = vpop.permute.xlu1 %4971 }
0x2600   :  { %v4974_v23 = vpop.permute.xlu0 %4973 }
0x2601   :  { %6502 = vmatprep.subr.mxu1 %v4974_v23 }
0x2602   :  { %6503 = vmatpush3.msra.mxu1 %v4974_v23 }
0x2603   :  { %6504 = vmatprep.subr.mxu1 %v4972_v25 }
0x2604   :  { %6505 = vmatpush3.msra.mxu1 %v4972_v25 }
0x2605   :  { %6509 = vmatprep.subr.mxu1 %v5847_v2 }
0x2608   :  { %v6717_v21 = vpop.eup %6716 }
0x2609   :  { %v4970_v57 = vmul.f32 %v6717_v21, %v6713_v11 }
0x260a   :  { %v6719_v58 = vpop.eup %6718 }
0x260b   :  { %v4969_v22 = vmul.f32 %v6719_v58, %v6715_v13  ;;  %v5885_v13 = vld [vmem:[%s7797_s17 + $0x20] sm:$0xff] }
0x260d   :  { %6506 = vmatprep.mubr.msk.f32.mxu1 %vm385_vm2, %v4969_v22  ;;  %v5884_v22 = vld [vmem:[%s7796_s16 + $0x1] ss:$0 sm:$0xff] }
0x260e   :  { %6507 = vmatmul.mubr.msk.f32.vlgmr.msra.gmra.mxu1 %vm385_vm2, %v4970_v57 }
0x260f   :  { %6510 = vmatpush3.msra.mxu1 %v5847_v2 }
0x262f   :  { %v5234_v24 = vpop.xlane.xlu1 %5233 }
0x2630   :  { %v5238_v26 = vsub.f32 %v5224_v16, %v5234_v24  ;;  %v5897_v16 = vld [vmem:[%s7799_s19 + $0x60] sm:$0xff] }
0x2631   :  { %v5237_v27 = vpop.xlane.xlu0 %5236 }
0x2632   :  { %v5240_v29 = vmul.f32 1.442695, %v5238_v26  ;;  %v5239_v32 = vsub.f32 %v5229_v17, %v5237_v27  ;;  %v5896_v27 = vld [vmem:[%s7799_s19 + $0x58] sm:$0xff] }
0x2634   :  { %6720 = vpow2.f32 %v5240_v29  ;;  %v5242_v34 = vmul.f32 1.442695, %v5239_v32  ;;  %v5895_v29 = vld [vmem:[%s7799_s19 + $0x50] sm:$0xff]  ;;  %v5894_v32 = vld [vmem:[%s7799_s19 + $0x48] sm:$0xff] }
0x2636   :  { %6722 = vpow2.f32 %v5242_v34  ;;  %v5893_v34 = vld [vmem:[%s7799_s19 + $0x40] sm:$0xff] }
0x2641   :  { %v6721_v35 = vpop.eup %6720 }
0x2642   :  { %v5244_v38 = vsel %vm385_vm2, %v6721_v35, 0.0 }
0x2643   :  { %v6723_v39 = vpop.eup %6722  ;;  %5245 = vadd.xlane.f32.xlu0 %v5244_v38 }
0x2644   :  { %v5247_v33 = vsel %vm385_vm2, %v6723_v39, 0.0 }
0x2645   :  { %5248 = vadd.xlane.f32.xlu1 %v5247_v33 }
0x2656   :  { %5254 = vrot.lane.b32.xlu1 %v7106_v40, %s6776_s25 }
0x2659   :  { %5256 = vrot.lane.b32.xlu0 %v7097_v48, %s6776_s25 }
0x26cc   :  { %v5246_v43 = vpop.xlane.xlu0 %5245 }
0x26cd   :  { %6724 = vrcp.f32 %v5246_v43 }
0x26ce   :  { %v6508_v45 = vpop.f32.mrf.mxu1  ;;  %v5249_v46 = vpop.xlane.xlu1 %5248 }
0x26cf   :  { %6726 = vrcp.f32 %v5249_v46 }
0x26d0   :  { %v5049_v47 = vpop.f32.mrf.mxu1  ;;  %v5257_v36 = vpop.permute.xlu0 %5256 }
0x26d1   :  { %6511 = vmatprep.mubr.msk.f32.mxu1 %vm301_vm1, %v5049_v47  ;;  %6521 = vmatprep.subr.mxu1 %v5257_v36 }
0x26d2   :  { %6512 = vmatmul.mubr.msk.f32.vlgmr.msra.gmra.mxu1 %vm301_vm1, %v6508_v45  ;;  %v5255_v49 = vpop.permute.xlu1 %5254  ;;  %v5904_v45 = vld [vmem:[%s7800_s20 + $0x1] ss:$0 sm:$0xff] }
0x26d3   :  { %6522 = vmatpush3.msra.mxu1 %v5257_v36 }
0x26d4   :  { %6523 = vmatprep.subr.mxu1 %v5255_v49 }
0x26d5   :  { %6524 = vmatpush3.msra.mxu1 %v5255_v49 }
0x26d6   :  { %6528 = vmatprep.subr.mxu1 %v5848_v51 }
0x26da   :  { %v6725_v40 = vpop.eup %6724 }
0x26db   :  { %v5252_v48 = vmul.f32 %v6725_v40, %v6721_v35  ;;  %v5890_v35 = vld [vmem:[%s7798_s18 + $0x1] ss:$0 sm:$0xff] }
0x26dc   :  { %v6727_v37 = vpop.eup %6726 }
0x26dd   :  { %6525 = vmatprep.mubr.msk.f32.mxu1 %vm385_vm2, %v5252_v48  ;;  %v5253_v50 = vmul.f32 %v6727_v37, %v6723_v39 }
0x26df   :  { %6526 = vmatmul.mubr.msk.f32.vlgmr.msra.gmra.mxu1 %vm385_vm2, %v5253_v50 }
0x26e0   :  { %6529 = vmatpush3.msra.mxu1 %v5848_v51 }
0x26e1   :  { %6544 = vmatprep.subr.mxu1 %v5900_v14 }
0x2792   :  { %v6513_v55 = vpop.f32.mrf.mxu1 }
0x2793   :  { %v5140_v63 = vadd.f32 %v6513_v55, %v4855_v54 }
0x2794   :  { %v5130_v53 = vpop.f32.mrf.mxu1 }
0x2795   :  { %v5139_v59 = vadd.f32 %v5130_v53, %v4850_v56 }
0x279f   :  { %v6527_v52 = vpop.f32.mrf.mxu1 }
0x27a1   :  { %v5332_v61 = vpop.f32.mrf.mxu1 }
0x27a2   :  { %6530 = vmatprep.mubr.msk.f32.mxu1 %vm301_vm1, %v5332_v61  ;;  %v5905_v61 = vld [vmem:[%s7801_s21] ss:$0 sm:$0xff] }
0x27a3   :  { %6531 = vmatmul.mubr.msk.f32.vlgmr.msra.gmra.mxu1 %vm301_vm1, %v6527_v52 }
0x27a4   :  { %6545 = vmatpush3.msra.mxu1 %v5900_v14 }
0x27a5   :  { %6546 = vmatprep.subr.mxu1 %v5899_v15 }
0x27a6   :  { %6547 = vmatpush3.msra.mxu1 %v5899_v15 }
0x27a7   :  { %6548 = vmatprep.subr.mxu1 %v5898_v6 }
0x27a8   :  { %6549 = vmatpush3.msra.mxu1 %v5898_v6 }
0x27a9   :  { %6550 = vmatprep.subr.mxu1 %v5897_v16 }
0x27aa   :  { %6551 = vmatpush3.msra.mxu1 %v5897_v16 }
0x27ab   :  { %6552 = vmatprep.subr.mxu1 %v5896_v27 }
0x27ac   :  { %6553 = vmatpush3.msra.mxu1 %v5896_v27 }
0x27ad   :  { %6554 = vmatprep.subr.mxu1 %v5895_v29 }
0x27ae   :  { %6555 = vmatpush3.msra.mxu1 %v5895_v29 }
0x27af   :  { %6556 = vmatprep.subr.mxu1 %v5894_v32 }
0x27b0   :  { %6557 = vmatpush3.msra.mxu1 %v5894_v32 }
0x27b1   :  { %6558 = vmatprep.subr.mxu1 %v5893_v34 }
0x27b2   :  { %6559 = vmatpush3.msra.mxu1 %v5893_v34 }
0x2863   :  { %v6532_v3 = vpop.f32.mrf.mxu1 }
0x2864   :  { %v5423_v4 = vadd.f32 %v6532_v3, %v5140_v63 }
0x2865   :  { %v5413_v1 = vpop.f32.mrf.mxu1 }
0x2866   :  { %v5425_v60 = vadd.f32 %v5423_v4, %v7532_v7  ;;  %v5422_v30 = vadd.f32 %v5413_v1, %v5139_v59  ;;  %v5888_v7 = vld [vmem:[%s7797_s17 + $0x38] sm:$0xff] }
0x2867   :  { %6533 = vmatprep.subr.mxu0 %v5888_v7 }
0x2868   :  { %v7705_v62 = vadd.f32 %v5882_v5, %v5425_v60  ;;  %v5424_v0 = vadd.f32 %v5422_v30, %v7535_v18  ;;  %v5887_v18 = vld [vmem:[%s7797_s17 + $0x30] sm:$0xff]  ;;  %6534 = vmatpush3.msra.mxu0 %v5888_v7 }
0x2869   :  { %6535 = vmatprep.subr.mxu0 %v5887_v18 }
0x286a   :  { %v7708_v28 = vadd.f32 %v5882_v5, %v5424_v0  ;;  %v5439_v8 = vmul.f32 %v7705_v62, %v7705_v62  ;;  %6536 = vmatpush3.msra.mxu0 %v5887_v18 }
0x286b   :  { %6537 = vmatprep.subr.mxu0 %v5886_v12 }
0x286c   :  { %v5443_v9 = vsel %vm91_vm0, %v5439_v8, 0.0  ;;  %v5438_v10 = vmul.f32 %v7708_v28, %v7708_v28  ;;  %6538 = vmatpush3.msra.mxu0 %v5886_v12 }
0x286d   :  { %5444 = vadd.xlane.f32.xlu0 %v5443_v9  ;;  %6539 = vmatprep.subr.mxu0 %v5885_v13 }
0x286e   :  { %v5440_v11 = vsel %vm91_vm0, %v5438_v10, 0.0  ;;  %6540 = vmatpush3.msra.mxu0 %v5885_v13 }
0x286f   :  { %5441 = vadd.xlane.f32.xlu1 %v5440_v11 }
0x28f6   :  { %v5445_v17 = vpop.xlane.xlu0 %5444 }
0x28f7   :  { %v5447_v44 = vmul.f32 0.03125, %v5445_v17 }
0x28f8   :  { %v5442_v19 = vpop.xlane.xlu1 %5441 }
0x28f9   :  { %v5449_v42 = vadd.f32 1e-05, %v5447_v44  ;;  %v5446_v20 = vmul.f32 0.03125, %v5442_v19 }
0x28fb   :  { %6728 = vrsqrt.f32 %v5449_v42  ;;  %v5448_v23 = vadd.f32 1e-05, %v5446_v20 }
0x28fd   :  { %6730 = vrsqrt.f32 %v5448_v23 }
0x2908   :  { %v6729_v25 = vpop.eup %6728 }
0x2909   :  { %v5453_v58 = vmul.f32 %v6729_v25, %v7705_v62 }
0x290a   :  { %v6731_v21 = vpop.eup %6730 }
0x290b   :  { %v5452_v57 = vmul.f32 %v6731_v21, %v7708_v28  ;;  %v5461_v26 = vmul.f32 %v5884_v22, %v5453_v58 }
0x290d   :  { %v5460_v24 = vmul.f32 %v5884_v22, %v5452_v57 }
0x290f   :  { %6541 = vmatprep.mubr.msk.f32.mxu0 %vm91_vm0, %v5460_v24 }
0x2910   :  { %6542 = vmatmul.mubr.msk.f32.vlgmr.msra.gmra.mxu0 %vm91_vm0, %v5461_v26 }
0x29d0   :  { %v6543_v38 = vpop.f32.mrf.mxu0 }
0x29d1   :  { %v5553_v39 = vadd.f32 %v6543_v38, %v5890_v35 }
0x29d2   :  { %v5547_v33 = vpop.f32.mrf.mxu0 }
0x29d3   :  { %v5548_v2 = vadd.f32 %v5890_v35, %v5547_v33  ;;  %v5557_v41 = vmax.f32 %v5553_v39, 0.0 }
0x29d5   :  { %v5556_v31 = vmax.f32 %v5548_v2, 0.0 }
0x29d7   :  { %6560 = vmatprep.mubr.msk.f32.mxu1 %vm2817_vm3, %v5556_v31 }
0x29d8   :  { %6561 = vmatmul.mubr.msk.f32.vlgmr.msra.gmra.mxu1 %vm2817_vm3, %v5557_v41 }
0x2a98   :  { %v6562_v43 = vpop.f32.mrf.mxu1 }
0x2a99   :  { %v5649_v46 = vadd.f32 %v6562_v43, %v7705_v62 }
0x2a9a   :  { %v5639_v47 = vpop.f32.mrf.mxu1 }
0x2a9b   :  { %v5659_v36 = vadd.f32 %v5904_v45, %v5649_v46  ;;  %v5648_v49 = vadd.f32 %v5639_v47, %v7708_v28 }
0x2a9d   :  { %v5658_v40 = vadd.f32 %v5904_v45, %v5648_v49  ;;  %v5662_v48 = vmul.f32 %v5659_v36, %v5659_v36 }
0x2a9f   :  { %v5666_v37 = vsel %vm91_vm0, %v5662_v48, 0.0  ;;  %v5661_v50 = vmul.f32 %v5658_v40, %v5658_v40 }
0x2aa0   :  { %5667 = vadd.xlane.f32.xlu1 %v5666_v37 }
0x2aa1   :  { %v5663_v51 = vsel %vm91_vm0, %v5661_v50, 0.0 }
0x2aa2   :  { %5664 = vadd.xlane.f32.xlu0 %v5663_v51 }
0x2b29   :  { %v5668_v54 = vpop.xlane.xlu1 %5667 }
0x2b2a   :  { %v5670_v55 = vmul.f32 0.03125, %v5668_v54 }
0x2b2b   :  { %v5665_v56 = vpop.xlane.xlu0 %5664 }
0x2b2c   :  { %v5672_v63 = vadd.f32 1e-05, %v5670_v55  ;;  %v5669_v53 = vmul.f32 0.03125, %v5665_v56 }
0x2b2e   :  { %6732 = vrsqrt.f32 %v5672_v63  ;;  %v5671_v59 = vadd.f32 1e-05, %v5669_v53 }
0x2b30   :  { %6734 = vrsqrt.f32 %v5671_v59 }
0x2b3b   :  { %v6733_v52 = vpop.eup %6732 }
0x2b3c   :  { %v5676_v3 = vmul.f32 %v6733_v52, %v5659_v36 }
0x2b3d   :  { %v6735_v4 = vpop.eup %6734 }
0x2b3e   :  { %v5675_v5 = vmul.f32 %v6735_v4, %v5658_v40  ;;  %v5684_v1 = vmul.f32 %v5905_v61, %v5676_v3 }
0x2b40   :  { %v5683_v60 = vmul.f32 %v5905_v61, %v5675_v5  ;;  %5686 = vst.msk [vmem:[#allocation2 + $0x8] sm:$0xff] %vm91_vm0, %v5684_v1 }
0x2b42   :  { %5685 = vst.msk [vmem:[#allocation2] sm:$0xff] %vm91_vm0, %v5683_v60 }
0x2b43   :  { %6751 = shalt.err (!%p6748_p4)
}
0x2b44   :  { %s6778_s21 = smov 128  }
0x2b45   :  { %5698 = dma.vmem_to_hbm [thread:$0]  %s5693_s4, 256, %s7802_s22, [#allocation3], %s6778_s21, %s6778_s21, %s6776_s25  }
0x2b46   :  { %6760 = dma.done.wait [#allocation3], 256  }
0x2b47   :  { %6761 = vsyncadd [#allocation3], 4294967040 }
0x2b48   :  { %5702 = vsyncpa [#allocation3], 1 }

</bundles_post_ra>
